<compile_context>
chip_gen: v7x
topology: tpu7x:2x2x1
jax: 0.10.0
libtpu: 0.0.40
codegen_flags: <defaults>
</compile_context>

<pallas_src>
import math

import numpy as np

import jax
import jax.numpy as jnp
from jax import lax
from jax.experimental import pallas as pl
from jax.experimental.pallas import tpu as pltpu


# ----------------------------------------------------------------------------
# In-kernel math helpers (operate on values, not refs)
# ----------------------------------------------------------------------------

def _log1p_pos(e):
    """log1p(e) for e in (0, 1], built only from guaranteed-lowerable ops.

    Classic correction: u = fl(1+e); log1p(e) = log(u) * e / (u - 1), which
    recovers the low bits of e that fl(1+e) drops (u-1 is exact by Sterbenz).
    """
    u = 1.0 + e
    d = u - 1.0
    safe_d = jnp.where(d == 0.0, 1.0, d)
    return jnp.where(d == 0.0, e, jnp.log(u) * (e / safe_d))


def _coupling(y, w1_k, w2_k, b_k, ch, hidden):
    """Affine coupling on a post-1x1-conv activation.

    y    : (C, N) f32
    w1_k : (hidden, ch) bf16, w2_k : (C, hidden) bf16
    b_k  : (hidden + C, 1) f32   (b1 stacked over b2)
    Returns (xa, yb, col_logdet) with col_logdet (1, N).
    """
    xa = y[:ch, :]
    xb = y[ch:, :]
    b1 = b_k[:hidden, :]
    b2 = b_k[hidden:, :]

    h = jnp.dot(w1_k, xa.astype(jnp.bfloat16),
                preferred_element_type=jnp.float32) + b1
    h = jnp.maximum(h, 0.0)
    st = jnp.dot(w2_k, h.astype(jnp.bfloat16),
                 preferred_element_type=jnp.float32) + b2
    raw = st[:ch, :] + 2.0
    t = st[ch:, :]

    # sigmoid and log-sigmoid share one exp (EUP) pass.
    e = jnp.exp(-jnp.abs(raw))
    log_s = jnp.minimum(raw, 0.0) - _log1p_pos(e)
    s = jnp.where(raw >= 0.0, 1.0, e) * pl.reciprocal(1.0 + e, approx=True)

    yb = (xb + t) * s
    col_ld = jnp.sum(log_s, axis=0, keepdims=True)          # (1, N)
    return xa, yb, col_ld


def _run_stage(blocks, first_wc_ref, wc_a_ref, wc_b_ref, w1_ref, w2_ref, b_ref,
               n_steps, ch, hidden):
    """Run all rev-net steps of one stage on a block-list activation.

    blocks: list of (rows_i, N) f32 channel blocks (sum rows_i == C).
    Weight refs are stacked over steps (leading dim K); step 0 of stages > 0
    uses first_wc_ref (8, C, C/8) which is pre-permuted for the group-major
    channel layout produced by the in-kernel squeeze.
    """

    def conv_pair(k, t_, b_):
        return (jnp.dot(wc_a_ref[k], t_.astype(jnp.bfloat16),
                        preferred_element_type=jnp.float32)
                + jnp.dot(wc_b_ref[k], b_.astype(jnp.bfloat16),
                          preferred_element_type=jnp.float32))

    # ---- step 0 (consumes the incoming block list) ----
    if first_wc_ref is None:
        y0 = conv_pair(0, blocks[0], blocks[1])
    else:
        y0 = None
        for j, blk in enumerate(blocks):                     # 8 group blocks
            part = jnp.dot(first_wc_ref[j], blk.astype(jnp.bfloat16),
                           preferred_element_type=jnp.float32)
            y0 = part if y0 is None else y0 + part
    top, bot, col_acc = _coupling(y0, w1_ref[0], w2_ref[0], b_ref[0], ch, hidden)

    # ---- steps 1..K-1: fori_loop with dynamic-indexed weight slabs ----
    if n_steps > 1:
        def body(k, carry):
            t_, b_, acc = carry
            t2, b2, ld = _coupling(conv_pair(k, t_, b_),
                                   w1_ref[k], w2_ref[k], b_ref[k], ch, hidden)
            return (t2, b2, acc + ld)
        top, bot, col_acc = lax.fori_loop(1, n_steps, body, (top, bot, col_acc))

    return top, bot, col_acc


# ----------------------------------------------------------------------------
# Fused whole-flow kernel
# ----------------------------------------------------------------------------

def build_glow_kernel(steps_per_stage, chans, n_cols, hiddens):
    """Kernel ref order:
         x_ref,
         stage 0:  wc_a, wc_b, w1, w2, b
         stage s>0: wc_first, wc_a, wc_b, w1, w2, b
         out_ref[s] (1, N_s) for every stage.
    """
    n_stages = len(steps_per_stage)

    def kernel(*refs):
        it = iter(refs)
        x_ref = next(it)
        stage_refs = []
        for s in range(n_stages):
            if s == 0:
                stage_refs.append((None,) + tuple(next(it) for _ in range(5)))
            else:
                stage_refs.append(tuple(next(it) for _ in range(6)))
        out_refs = [next(it) for _ in range(n_stages)]

        ch0 = chans[0] // 2
        x_full = x_ref[...]                                  # (C0, N0) f32
        blocks = [x_full[:ch0, :], x_full[ch0:, :]]

        for s in range(n_stages):
            ch = chans[s] // 2
            first_wc, wc_a, wc_b, w1_r, w2_r, b_r = stage_refs[s]
            top, bot, col_acc = _run_stage(
                blocks, first_wc, wc_a, wc_b, w1_r, w2_r, b_r,
                steps_per_stage[s], ch, hiddens[s])

            if s == n_stages - 1:
                # Prior data term -0.5 * z^2 per column; invariant to the final
                # squeeze (a pure permutation), which is therefore skipped.
                col_acc = col_acc - 0.5 * (
                    jnp.sum(top * top, axis=0, keepdims=True)
                    + jnp.sum(bot * bot, axis=0, keepdims=True))

            out_refs[s][...] = col_acc                       # (1, N_s)

            if s < n_stages - 1:
                # Factor-2 squeeze: group-major-outer column packing makes it
                # four 128-aligned static lane slices (no selector matrices).
                nn = n_cols[s + 1]
                new_blocks = []
                for g in range(4):
                    new_blocks.append(top[:, g * nn:(g + 1) * nn])
                    new_blocks.append(bot[:, g * nn:(g + 1) * nn])
                blocks = new_blocks

    return kernel


# ----------------------------------------------------------------------------
# Host-side layout helpers
# ----------------------------------------------------------------------------

def squeeze2d(x, factor=2):
    """Exact replica of Glow2d._squeeze (NCHW)."""
    b, c, h, w = x.shape
    x = x.reshape(b, c, h // factor, factor, w // factor, factor)
    x = x.transpose(0, 1, 3, 5, 2, 4)
    return x.reshape(b, c * factor * factor, h // factor, w // factor)


def pack_group_major(x_sq, n_squeezes):
    """(B, C, H, W) -> (C, N) with columns ordered (g_0, ..., g_{n-1}, b, i, j),
    g_s = fh_s*2 + fw_s the parity pair consumed by the s-th inter-stage squeeze.
    Makes every in-kernel squeeze a contiguous 4-way lane split."""
    B, C, H, W = x_sq.shape
    n = n_squeezes
    if n == 0:
        return jnp.transpose(x_sq, (1, 0, 2, 3)).reshape(C, B * H * W)
    Hf, Wf = H >> n, W >> n
    a = x_sq.reshape((B, C, Hf) + (2,) * n + (Wf,) + (2,) * n)
    # axes: 0 b, 1 c, 2 i_f, 3..2+n = fh_{n-1}..fh_0, 3+n = j_f,
    #       4+n..3+2n = fw_{n-1}..fw_0
    order = [1]
    for s_ in range(n):
        order += [2 + (n - s_), (3 + n) + (n - s_)]
    order += [0, 2, 3 + n]
    a = jnp.transpose(a, order)
    return a.reshape(C, -1)


# ----------------------------------------------------------------------------
# Glow2d forward: plain-JAX glue around the single fused pallas_call
# ----------------------------------------------------------------------------

def glow2d_forward(x, stage_params):
    """x: (B, C, H, W) NCHW -> per-sample normalized log-likelihood, shape (B,)."""
    B = x.shape[0]
    n_stages = len(stage_params)
    n_sq = n_stages - 1
    hiddens = tuple(sp[0][1].shape[0] for sp in stage_params)

    # Init squeeze (layout-only, module semantics).
    Fx = squeeze2d(x, 2)
    _, C0, H0, W0 = Fx.shape

    # Static per-stage geometry.
    Cs, HWs = [], []
    C, HH, WW = C0, H0, W0
    for _ in range(n_stages):
        Cs.append(C)
        HWs.append(HH * WW)
        C, HH, WW = C * 4, HH // 2, WW // 2
    Hf, Wf = H0 >> n_sq, W0 >> n_sq
    HWf = Hf * Wf
    D = C0 * H0 * W0                    # elements per sample == prod(final_shape)

    # Pad batch so the LAST-stage lane count (B_pad*HWf) is a multiple of 128:
    # full lane occupancy at every stage + 128-aligned in-kernel squeeze slices.
    unit = 128 // math.gcd(HWf, 128)
    B_pad = max(unit, ((B + unit - 1) // unit) * unit)
    if B_pad > B:
        Fx = jnp.pad(Fx, ((0, B_pad - B), (0, 0), (0, 0), (0, 0)))

    x_packed = pack_group_major(Fx, n_sq).astype(jnp.float32)   # (C0, N0)
    n_cols = tuple(B_pad * HWf * (4 ** (n_sq - s)) for s in range(n_stages))

    # --- pack parameters into per-stage slabs (bf16 weights, f32 biases) ---
    flat_inputs = [x_packed]
    conv_logdet = jnp.float32(0.0)      # parameter-only 1x1-conv log-dets
    for s, sp in enumerate(stage_params):
        Cstage = Cs[s]
        ch = Cstage // 2
        wca, wcb, w1s, w2s, bs = [], [], [], [], []
        first_blocks = None
        for k, (wc, w1, b1, w2, b2) in enumerate(sp):
            _, lad = jnp.linalg.slogdet(wc.astype(jnp.float32))
            conv_logdet = conv_logdet + HWs[s] * lad
            if s > 0 and k == 0:
                # Permute columns so this wc accepts the group-major channel
                # layout produced by the in-kernel squeeze, then pre-split it
                # into the 8 column blocks matching the kernel's block list.
                cp = Cs[s - 1]
                gm = np.arange(Cstage)
                perm = (gm % cp) * 4 + gm // cp
                wc_p = wc[:, perm].astype(jnp.bfloat16)
                cpb = cp // 2
                first_blocks = jnp.stack(
                    [wc_p[:, j * cpb:(j + 1) * cpb] for j in range(8)])
            wca.append(wc[:, :ch].astype(jnp.bfloat16))
            wcb.append(wc[:, ch:].astype(jnp.bfloat16))
            w1s.append(w1.astype(jnp.bfloat16))
            w2s.append(w2.astype(jnp.bfloat16))
            bs.append(jnp.concatenate([b1, b2], axis=0).astype(jnp.float32))
        if s > 0:
            flat_inputs.append(first_blocks)                   # (8, C, C/8) bf16
        flat_inputs += [jnp.stack(wca), jnp.stack(wcb),        # (K, C, ch) bf16
                        jnp.stack(w1s), jnp.stack(w2s),        # bf16
                        jnp.stack(bs)]                         # (K, hid+C, 1) f32

    kernel = build_glow_kernel(tuple(len(sp) for sp in stage_params),
                               tuple(Cs), n_cols, hiddens)

    outs = pl.pallas_call(
        kernel,
        out_shape=tuple(jax.ShapeDtypeStruct((1, n_cols[s]), jnp.float32)
                        for s in range(n_stages)),
        in_specs=[pl.BlockSpec(memory_space=pltpu.MemorySpace.VMEM)]
        * len(flat_inputs),
        out_specs=tuple(pl.BlockSpec(memory_space=pltpu.MemorySpace.VMEM)
                        for _ in range(n_stages)),
        compiler_params=pltpu.CompilerParams(
            vmem_limit_bytes=32 * 1024 * 1024),
    )(*flat_inputs)

    # Per-sample segment sums of the tiny per-column accumulators (wrapper glue).
    per_sample = jnp.zeros((B_pad,), jnp.float32)
    for s in range(n_stages):
        cols = outs[s].reshape(4 ** (n_sq - s), B_pad, HWf)
        per_sample = per_sample + jnp.sum(cols, axis=(0, 2))
    per_sample = per_sample[:B]

    prior_const = -0.5 * D * float(np.log(2.0 * np.pi))
    logpk = per_sample + conv_logdet + prior_const
    return logpk / float(D)


# ----------------------------------------------------------------------------
# Pure-JAX reference (mirrors the PyTorch module semantics) for validation
# ----------------------------------------------------------------------------

def glow2d_forward_ref(x, stage_params):
    b = x.shape[0]
    Fx = squeeze2d(x, 2)
    logpk = jnp.zeros((b,), jnp.float32)
    for step_params in stage_params:
        for (wc, w1, b1, w2, b2) in step_params:
            B_, C, H, W = Fx.shape
            xf = Fx.reshape(B_, C, H * W)
            y = jnp.einsum('ij,bjn->bin', wc, xf)
            ch = C // 2
            xa, xb = y[:, :ch], y[:, ch:]
            hdn = jnp.maximum(jnp.einsum('ij,bjn->bin', w1, xa) + b1, 0.0)
            st = jnp.einsum('ij,bjn->bin', w2, hdn) + b2
            raw = st[:, :ch] + 2.0
            t = st[:, ch:]
            s = jax.nn.sigmoid(raw)
            yb = (xb + t) * s
            Fx = jnp.concatenate([xa, yb], axis=1).reshape(B_, C, H, W)
            _, lad = jnp.linalg.slogdet(wc)
            logpk = logpk + H * W * lad + jnp.sum(jax.nn.log_sigmoid(raw), axis=(1, 2))
        Fx = squeeze2d(Fx, 2)
    z = Fx.reshape(b, -1)
    dim = z.shape[1]
    logpk = logpk - 0.5 * jnp.sum(z * z, axis=1) - 0.5 * dim * jnp.log(2.0 * jnp.pi)
    return logpk / float(dim)


# ----------------------------------------------------------------------------
# Parameter init (deterministic)
# ----------------------------------------------------------------------------

def init_revnet_params(key, c, hidden):
    k1, k2, k3, k4, k5 = jax.random.split(key, 5)
    q, _ = jnp.linalg.qr(jax.random.normal(k1, (c, c), jnp.float32))
    wc = q                                    # orthogonal init (standard Glow)
    ch = c // 2
    w1 = 0.1 * jax.random.normal(k2, (hidden, ch), jnp.float32)
    b1 = 0.1 * jax.random.normal(k3, (hidden, 1), jnp.float32)
    w2 = 0.1 * jax.random.normal(k4, (c, hidden), jnp.float32)
    b2 = 0.1 * jax.random.normal(k5, (c, 1), jnp.float32)
    return (wc, w1, b1, w2, b2)


def init_glow2d_params(key, input_shape, stages, steps, hidden=32):
    c, h, w = input_shape
    c *= 4                                    # init squeeze factor 2 -> channels x4
    stage_params = []
    for i in range(stages):
        step_params = []
        for _ in range(steps[i]):
            key, sub = jax.random.split(key)
            step_params.append(init_revnet_params(sub, c, hidden))
        stage_params.append(step_params)
        c *= 4
    return stage_params


# ----------------------------------------------------------------------------
# main
# ----------------------------------------------------------------------------

if __name__ == "__main__":
    key = jax.random.PRNGKey(0)
    k_x, k_p = jax.random.split(key)

    # x: (B, C, H, W) = (2, 4, 16, 16), NCHW like the PyTorch module
    x = jax.random.normal(k_x, (2, 4, 16, 16), jnp.float32)

    stages = 2
    steps = [2, 2]
    params = init_glow2d_params(k_p, (4, 16, 16), stages, steps, hidden=32)

    fwd = jax.jit(glow2d_forward)
    logpk = fwd(x, params)
    jax.block_until_ready(logpk)

    # Validate against the pure-JAX f32 reference of the same module.
    logpk_ref = glow2d_forward_ref(x, params)
    np.testing.assert_allclose(np.asarray(logpk), np.asarray(logpk_ref),
                               rtol=5e-2, atol=5e-2)

    assert logpk.shape == (2,)
    assert bool(jnp.all(jnp.isfinite(logpk)))
    print("KERNEL_OK")
</pallas_src>

<mosaic_0001>
module attributes {stable_mosaic.version = 11 : i64} {
  func.func @kernel(%arg0: memref<16x512xf32, #tpu.memory_space<vmem>>, %arg1: memref<2x16x8xbf16, #tpu.memory_space<vmem>>, %arg2: memref<2x16x8xbf16, #tpu.memory_space<vmem>>, %arg3: memref<2x32x8xbf16, #tpu.memory_space<vmem>>, %arg4: memref<2x16x32xbf16, #tpu.memory_space<vmem>>, %arg5: memref<2x48x1xf32, #tpu.memory_space<vmem>>, %arg6: memref<8x64x8xbf16, #tpu.memory_space<vmem>>, %arg7: memref<2x64x32xbf16, #tpu.memory_space<vmem>>, %arg8: memref<2x64x32xbf16, #tpu.memory_space<vmem>>, %arg9: memref<2x32x32xbf16, #tpu.memory_space<vmem>>, %arg10: memref<2x64x32xbf16, #tpu.memory_space<vmem>>, %arg11: memref<2x96x1xf32, #tpu.memory_space<vmem>>, %arg12: memref<1x512xf32, #tpu.memory_space<vmem>>, %arg13: memref<1x128xf32, #tpu.memory_space<vmem>>) attributes {dimension_semantics = [], scalar_prefetch = 0 : i64, scratch_operands = 0 : i64, tpu.core_type = #tpu.core_type<tc>} {
    %c0 = arith.constant 0 : index
    %c0_0 = arith.constant 0 : index
    %0 = vector.load %arg0[%c0, %c0_0] : memref<16x512xf32, #tpu.memory_space<vmem>>, vector<16x512xf32>
    %1 = vector.extract_strided_slice %0 {offsets = [0, 0], sizes = [8, 512], strides = [1, 1]} : vector<16x512xf32> to vector<8x512xf32>
    %2 = vector.extract_strided_slice %0 {offsets = [8, 0], sizes = [8, 512], strides = [1, 1]} : vector<16x512xf32> to vector<8x512xf32>
    %c0_1 = arith.constant 0 : index
    %c0_2 = arith.constant 0 : index
    %c0_3 = arith.constant 0 : index
    %3 = vector.load %arg1[%c0_1, %c0_2, %c0_3] : memref<2x16x8xbf16, #tpu.memory_space<vmem>>, vector<1x16x8xbf16>
    %4 = vector.shape_cast %3 : vector<1x16x8xbf16> to vector<16x8xbf16>
    %5 = arith.truncf %1 : vector<8x512xf32> to vector<8x512xbf16>
    %cst = arith.constant dense<0.000000e+00> : vector<16x512xf32>
    %6 = tpu.matmul %4, %5, %cst {dimension_numbers = #tpu.dot_dimension_numbers<[1], [0], [0], [1], [0, 0, 1, 1], [], []>} : vector<16x8xbf16>, vector<8x512xbf16>, vector<16x512xf32> -> vector<16x512xf32>
    %c0_4 = arith.constant 0 : index
    %c0_5 = arith.constant 0 : index
    %c0_6 = arith.constant 0 : index
    %7 = vector.load %arg2[%c0_4, %c0_5, %c0_6] : memref<2x16x8xbf16, #tpu.memory_space<vmem>>, vector<1x16x8xbf16>
    %8 = vector.shape_cast %7 : vector<1x16x8xbf16> to vector<16x8xbf16>
    %9 = arith.truncf %2 : vector<8x512xf32> to vector<8x512xbf16>
    %cst_7 = arith.constant dense<0.000000e+00> : vector<16x512xf32>
    %10 = tpu.matmul %8, %9, %cst_7 {dimension_numbers = #tpu.dot_dimension_numbers<[1], [0], [0], [1], [0, 0, 1, 1], [], []>} : vector<16x8xbf16>, vector<8x512xbf16>, vector<16x512xf32> -> vector<16x512xf32>
    %11 = arith.addf %6, %10 : vector<16x512xf32>
    %c0_8 = arith.constant 0 : index
    %c0_9 = arith.constant 0 : index
    %c0_10 = arith.constant 0 : index
    %12 = vector.load %arg3[%c0_8, %c0_9, %c0_10] : memref<2x32x8xbf16, #tpu.memory_space<vmem>>, vector<1x32x8xbf16>
    %13 = vector.shape_cast %12 : vector<1x32x8xbf16> to vector<32x8xbf16>
    %c0_11 = arith.constant 0 : index
    %c0_12 = arith.constant 0 : index
    %c0_13 = arith.constant 0 : index
    %14 = vector.load %arg4[%c0_11, %c0_12, %c0_13] : memref<2x16x32xbf16, #tpu.memory_space<vmem>>, vector<1x16x32xbf16>
    %15 = vector.shape_cast %14 : vector<1x16x32xbf16> to vector<16x32xbf16>
    %c0_14 = arith.constant 0 : index
    %c0_15 = arith.constant 0 : index
    %c0_16 = arith.constant 0 : index
    %16 = vector.load %arg5[%c0_14, %c0_15, %c0_16] : memref<2x48x1xf32, #tpu.memory_space<vmem>>, vector<1x48x1xf32>
    %17 = vector.shape_cast %16 : vector<1x48x1xf32> to vector<48x1xf32>
    %18 = vector.extract_strided_slice %11 {offsets = [0, 0], sizes = [8, 512], strides = [1, 1]} : vector<16x512xf32> to vector<8x512xf32>
    %19 = vector.extract_strided_slice %11 {offsets = [8, 0], sizes = [8, 512], strides = [1, 1]} : vector<16x512xf32> to vector<8x512xf32>
    %20 = vector.extract_strided_slice %17 {offsets = [0, 0], sizes = [32, 1], strides = [1, 1]} : vector<48x1xf32> to vector<32x1xf32>
    %21 = vector.extract_strided_slice %17 {offsets = [32, 0], sizes = [16, 1], strides = [1, 1]} : vector<48x1xf32> to vector<16x1xf32>
    %22 = arith.truncf %18 : vector<8x512xf32> to vector<8x512xbf16>
    %cst_17 = arith.constant dense<0.000000e+00> : vector<32x512xf32>
    %23 = tpu.matmul %13, %22, %cst_17 {dimension_numbers = #tpu.dot_dimension_numbers<[1], [0], [0], [1], [0, 0, 1, 1], [], []>} : vector<32x8xbf16>, vector<8x512xbf16>, vector<32x512xf32> -> vector<32x512xf32>
    %24 = vector.broadcast %20 : vector<32x1xf32> to vector<32x512xf32>
    %25 = arith.addf %23, %24 : vector<32x512xf32>
    %cst_18 = arith.constant 0.000000e+00 : f32
    %26 = vector.broadcast %cst_18 : f32 to vector<32x512xf32>
    %27 = arith.maximumf %25, %26 : vector<32x512xf32>
    %28 = arith.truncf %27 : vector<32x512xf32> to vector<32x512xbf16>
    %cst_19 = arith.constant dense<0.000000e+00> : vector<16x512xf32>
    %29 = tpu.matmul %15, %28, %cst_19 {dimension_numbers = #tpu.dot_dimension_numbers<[1], [0], [0], [1], [0, 0, 1, 1], [], []>} : vector<16x32xbf16>, vector<32x512xbf16>, vector<16x512xf32> -> vector<16x512xf32>
    %30 = vector.broadcast %21 : vector<16x1xf32> to vector<16x512xf32>
    %31 = arith.addf %29, %30 : vector<16x512xf32>
    %32 = vector.extract_strided_slice %31 {offsets = [0, 0], sizes = [8, 512], strides = [1, 1]} : vector<16x512xf32> to vector<8x512xf32>
    %cst_20 = arith.constant 2.000000e+00 : f32
    %33 = vector.broadcast %cst_20 : f32 to vector<8x512xf32>
    %34 = arith.addf %32, %33 : vector<8x512xf32>
    %35 = vector.extract_strided_slice %31 {offsets = [8, 0], sizes = [8, 512], strides = [1, 1]} : vector<16x512xf32> to vector<8x512xf32>
    %36 = math.absf %34 : vector<8x512xf32>
    %cst_21 = arith.constant 0.000000e+00 : f32
    %37 = vector.broadcast %cst_21 : f32 to vector<8x512xf32>
    %38 = arith.subf %37, %36 : vector<8x512xf32>
    %39 = math.exp %38 : vector<8x512xf32>
    %cst_22 = arith.constant 0.000000e+00 : f32
    %40 = vector.broadcast %cst_22 : f32 to vector<8x512xf32>
    %41 = arith.minimumf %34, %40 : vector<8x512xf32>
    %cst_23 = arith.constant 1.000000e+00 : f32
    %42 = vector.broadcast %cst_23 : f32 to vector<8x512xf32>
    %43 = arith.addf %42, %39 : vector<8x512xf32>
    %cst_24 = arith.constant 1.000000e+00 : f32
    %44 = vector.broadcast %cst_24 : f32 to vector<8x512xf32>
    %45 = arith.subf %43, %44 : vector<8x512xf32>
    %cst_25 = arith.constant 0.000000e+00 : f32
    %46 = vector.broadcast %cst_25 : f32 to vector<8x512xf32>
    %47 = arith.cmpf oeq, %45, %46 : vector<8x512xf32>
    %cst_26 = arith.constant 1.000000e+00 : f32
    %48 = vector.broadcast %cst_26 : f32 to vector<8x512xf32>
    %49 = arith.select %47, %48, %45 : vector<8x512xi1>, vector<8x512xf32>
    %cst_27 = arith.constant 0.000000e+00 : f32
    %50 = vector.broadcast %cst_27 : f32 to vector<8x512xf32>
    %51 = arith.cmpf oeq, %45, %50 : vector<8x512xf32>
    %52 = math.log %43 : vector<8x512xf32>
    %53 = arith.divf %39, %49 : vector<8x512xf32>
    %54 = arith.mulf %52, %53 : vector<8x512xf32>
    %55 = arith.select %51, %39, %54 : vector<8x512xi1>, vector<8x512xf32>
    %56 = arith.subf %41, %55 : vector<8x512xf32>
    %cst_28 = arith.constant 0.000000e+00 : f32
    %57 = vector.broadcast %cst_28 : f32 to vector<8x512xf32>
    %58 = arith.cmpf oge, %34, %57 : vector<8x512xf32>
    %cst_29 = arith.constant 1.000000e+00 : f32
    %59 = vector.broadcast %cst_29 : f32 to vector<8x512xf32>
    %60 = arith.select %58, %59, %39 : vector<8x512xi1>, vector<8x512xf32>
    %cst_30 = arith.constant 1.000000e+00 : f32
    %61 = vector.broadcast %cst_30 : f32 to vector<8x512xf32>
    %62 = arith.addf %61, %39 : vector<8x512xf32>
    %63 = tpu.reciprocal %62 {approx = true} : vector<8x512xf32> -> vector<8x512xf32>
    %64 = arith.mulf %60, %63 : vector<8x512xf32>
    %65 = arith.addf %19, %35 : vector<8x512xf32>
    %66 = arith.mulf %65, %64 : vector<8x512xf32>
    %cst_31 = arith.constant dense<0.000000e+00> : vector<512xf32>
    %67 = vector.multi_reduction <add>, %56, %cst_31 [0] : vector<8x512xf32> to vector<512xf32>
    %68 = vector.shape_cast %67 : vector<512xf32> to vector<1x512xf32>
    %c1_i32 = arith.constant 1 : i32
    %69 = arith.index_cast %c1_i32 : i32 to index
    %c0_32 = arith.constant 0 : index
    %c0_33 = arith.constant 0 : index
    %70 = vector.load %arg1[%69, %c0_32, %c0_33] : memref<2x16x8xbf16, #tpu.memory_space<vmem>>, vector<1x16x8xbf16>
    %71 = vector.shape_cast %70 : vector<1x16x8xbf16> to vector<16x8xbf16>
    %72 = arith.truncf %18 : vector<8x512xf32> to vector<8x512xbf16>
    %cst_34 = arith.constant dense<0.000000e+00> : vector<16x512xf32>
    %73 = tpu.matmul %71, %72, %cst_34 {dimension_numbers = #tpu.dot_dimension_numbers<[1], [0], [0], [1], [0, 0, 1, 1], [], []>} : vector<16x8xbf16>, vector<8x512xbf16>, vector<16x512xf32> -> vector<16x512xf32>
    %74 = arith.index_cast %c1_i32 : i32 to index
    %c0_35 = arith.constant 0 : index
    %c0_36 = arith.constant 0 : index
    %75 = vector.load %arg2[%74, %c0_35, %c0_36] : memref<2x16x8xbf16, #tpu.memory_space<vmem>>, vector<1x16x8xbf16>
    %76 = vector.shape_cast %75 : vector<1x16x8xbf16> to vector<16x8xbf16>
    %77 = arith.truncf %66 : vector<8x512xf32> to vector<8x512xbf16>
    %cst_37 = arith.constant dense<0.000000e+00> : vector<16x512xf32>
    %78 = tpu.matmul %76, %77, %cst_37 {dimension_numbers = #tpu.dot_dimension_numbers<[1], [0], [0], [1], [0, 0, 1, 1], [], []>} : vector<16x8xbf16>, vector<8x512xbf16>, vector<16x512xf32> -> vector<16x512xf32>
    %79 = arith.addf %73, %78 : vector<16x512xf32>
    %80 = arith.index_cast %c1_i32 : i32 to index
    %c0_38 = arith.constant 0 : index
    %c0_39 = arith.constant 0 : index
    %81 = vector.load %arg3[%80, %c0_38, %c0_39] : memref<2x32x8xbf16, #tpu.memory_space<vmem>>, vector<1x32x8xbf16>
    %82 = vector.shape_cast %81 : vector<1x32x8xbf16> to vector<32x8xbf16>
    %83 = arith.index_cast %c1_i32 : i32 to index
    %c0_40 = arith.constant 0 : index
    %c0_41 = arith.constant 0 : index
    %84 = vector.load %arg4[%83, %c0_40, %c0_41] : memref<2x16x32xbf16, #tpu.memory_space<vmem>>, vector<1x16x32xbf16>
    %85 = vector.shape_cast %84 : vector<1x16x32xbf16> to vector<16x32xbf16>
    %86 = arith.index_cast %c1_i32 : i32 to index
    %c0_42 = arith.constant 0 : index
    %c0_43 = arith.constant 0 : index
    %87 = vector.load %arg5[%86, %c0_42, %c0_43] : memref<2x48x1xf32, #tpu.memory_space<vmem>>, vector<1x48x1xf32>
    %88 = vector.shape_cast %87 : vector<1x48x1xf32> to vector<48x1xf32>
    %89 = vector.extract_strided_slice %79 {offsets = [0, 0], sizes = [8, 512], strides = [1, 1]} : vector<16x512xf32> to vector<8x512xf32>
    %90 = vector.extract_strided_slice %79 {offsets = [8, 0], sizes = [8, 512], strides = [1, 1]} : vector<16x512xf32> to vector<8x512xf32>
    %91 = vector.extract_strided_slice %88 {offsets = [0, 0], sizes = [32, 1], strides = [1, 1]} : vector<48x1xf32> to vector<32x1xf32>
    %92 = vector.extract_strided_slice %88 {offsets = [32, 0], sizes = [16, 1], strides = [1, 1]} : vector<48x1xf32> to vector<16x1xf32>
    %93 = arith.truncf %89 : vector<8x512xf32> to vector<8x512xbf16>
    %cst_44 = arith.constant dense<0.000000e+00> : vector<32x512xf32>
    %94 = tpu.matmul %82, %93, %cst_44 {dimension_numbers = #tpu.dot_dimension_numbers<[1], [0], [0], [1], [0, 0, 1, 1], [], []>} : vector<32x8xbf16>, vector<8x512xbf16>, vector<32x512xf32> -> vector<32x512xf32>
    %95 = vector.broadcast %91 : vector<32x1xf32> to vector<32x512xf32>
    %96 = arith.addf %94, %95 : vector<32x512xf32>
    %cst_45 = arith.constant 0.000000e+00 : f32
    %97 = vector.broadcast %cst_45 : f32 to vector<32x512xf32>
    %98 = arith.maximumf %96, %97 : vector<32x512xf32>
    %99 = arith.truncf %98 : vector<32x512xf32> to vector<32x512xbf16>
    %cst_46 = arith.constant dense<0.000000e+00> : vector<16x512xf32>
    %100 = tpu.matmul %85, %99, %cst_46 {dimension_numbers = #tpu.dot_dimension_numbers<[1], [0], [0], [1], [0, 0, 1, 1], [], []>} : vector<16x32xbf16>, vector<32x512xbf16>, vector<16x512xf32> -> vector<16x512xf32>
    %101 = vector.broadcast %92 : vector<16x1xf32> to vector<16x512xf32>
    %102 = arith.addf %100, %101 : vector<16x512xf32>
    %103 = vector.extract_strided_slice %102 {offsets = [0, 0], sizes = [8, 512], strides = [1, 1]} : vector<16x512xf32> to vector<8x512xf32>
    %cst_47 = arith.constant 2.000000e+00 : f32
    %104 = vector.broadcast %cst_47 : f32 to vector<8x512xf32>
    %105 = arith.addf %103, %104 : vector<8x512xf32>
    %106 = vector.extract_strided_slice %102 {offsets = [8, 0], sizes = [8, 512], strides = [1, 1]} : vector<16x512xf32> to vector<8x512xf32>
    %107 = math.absf %105 : vector<8x512xf32>
    %cst_48 = arith.constant 0.000000e+00 : f32
    %108 = vector.broadcast %cst_48 : f32 to vector<8x512xf32>
    %109 = arith.subf %108, %107 : vector<8x512xf32>
    %110 = math.exp %109 : vector<8x512xf32>
    %cst_49 = arith.constant 0.000000e+00 : f32
    %111 = vector.broadcast %cst_49 : f32 to vector<8x512xf32>
    %112 = arith.minimumf %105, %111 : vector<8x512xf32>
    %cst_50 = arith.constant 1.000000e+00 : f32
    %113 = vector.broadcast %cst_50 : f32 to vector<8x512xf32>
    %114 = arith.addf %113, %110 : vector<8x512xf32>
    %cst_51 = arith.constant 1.000000e+00 : f32
    %115 = vector.broadcast %cst_51 : f32 to vector<8x512xf32>
    %116 = arith.subf %114, %115 : vector<8x512xf32>
    %cst_52 = arith.constant 0.000000e+00 : f32
    %117 = vector.broadcast %cst_52 : f32 to vector<8x512xf32>
    %118 = arith.cmpf oeq, %116, %117 : vector<8x512xf32>
    %cst_53 = arith.constant 1.000000e+00 : f32
    %119 = vector.broadcast %cst_53 : f32 to vector<8x512xf32>
    %120 = arith.select %118, %119, %116 : vector<8x512xi1>, vector<8x512xf32>
    %cst_54 = arith.constant 0.000000e+00 : f32
    %121 = vector.broadcast %cst_54 : f32 to vector<8x512xf32>
    %122 = arith.cmpf oeq, %116, %121 : vector<8x512xf32>
    %123 = math.log %114 : vector<8x512xf32>
    %124 = arith.divf %110, %120 : vector<8x512xf32>
    %125 = arith.mulf %123, %124 : vector<8x512xf32>
    %126 = arith.select %122, %110, %125 : vector<8x512xi1>, vector<8x512xf32>
    %127 = arith.subf %112, %126 : vector<8x512xf32>
    %cst_55 = arith.constant 0.000000e+00 : f32
    %128 = vector.broadcast %cst_55 : f32 to vector<8x512xf32>
    %129 = arith.cmpf oge, %105, %128 : vector<8x512xf32>
    %cst_56 = arith.constant 1.000000e+00 : f32
    %130 = vector.broadcast %cst_56 : f32 to vector<8x512xf32>
    %131 = arith.select %129, %130, %110 : vector<8x512xi1>, vector<8x512xf32>
    %cst_57 = arith.constant 1.000000e+00 : f32
    %132 = vector.broadcast %cst_57 : f32 to vector<8x512xf32>
    %133 = arith.addf %132, %110 : vector<8x512xf32>
    %134 = tpu.reciprocal %133 {approx = true} : vector<8x512xf32> -> vector<8x512xf32>
    %135 = arith.mulf %131, %134 : vector<8x512xf32>
    %136 = arith.addf %90, %106 : vector<8x512xf32>
    %137 = arith.mulf %136, %135 : vector<8x512xf32>
    %cst_58 = arith.constant dense<0.000000e+00> : vector<512xf32>
    %138 = vector.multi_reduction <add>, %127, %cst_58 [0] : vector<8x512xf32> to vector<512xf32>
    %139 = vector.shape_cast %138 : vector<512xf32> to vector<1x512xf32>
    %140 = arith.addf %68, %139 : vector<1x512xf32>
    %c1_i32_59 = arith.constant 1 : i32
    %c0_60 = arith.constant 0 : index
    %c0_61 = arith.constant 0 : index
    %141 = vector.load %arg12[%c0_60, %c0_61] : memref<1x512xf32, #tpu.memory_space<vmem>>, vector<1x512xf32>
    tpu.vector_store %arg12[%c0_60, %c0_61], %140 {strides = array<i32>} : memref<1x512xf32, #tpu.memory_space<vmem>>, vector<1x512xf32>,
    %142 = vector.extract_strided_slice %89 {offsets = [0, 0], sizes = [8, 128], strides = [1, 1]} : vector<8x512xf32> to vector<8x128xf32>
    %143 = vector.extract_strided_slice %137 {offsets = [0, 0], sizes = [8, 128], strides = [1, 1]} : vector<8x512xf32> to vector<8x128xf32>
    %144 = vector.extract_strided_slice %89 {offsets = [0, 128], sizes = [8, 128], strides = [1, 1]} : vector<8x512xf32> to vector<8x128xf32>
    %145 = vector.extract_strided_slice %137 {offsets = [0, 128], sizes = [8, 128], strides = [1, 1]} : vector<8x512xf32> to vector<8x128xf32>
    %146 = vector.extract_strided_slice %89 {offsets = [0, 256], sizes = [8, 128], strides = [1, 1]} : vector<8x512xf32> to vector<8x128xf32>
    %147 = vector.extract_strided_slice %137 {offsets = [0, 256], sizes = [8, 128], strides = [1, 1]} : vector<8x512xf32> to vector<8x128xf32>
    %148 = vector.extract_strided_slice %89 {offsets = [0, 384], sizes = [8, 128], strides = [1, 1]} : vector<8x512xf32> to vector<8x128xf32>
    %149 = vector.extract_strided_slice %137 {offsets = [0, 384], sizes = [8, 128], strides = [1, 1]} : vector<8x512xf32> to vector<8x128xf32>
    %c0_62 = arith.constant 0 : index
    %c0_63 = arith.constant 0 : index
    %c0_64 = arith.constant 0 : index
    %150 = vector.load %arg6[%c0_62, %c0_63, %c0_64] : memref<8x64x8xbf16, #tpu.memory_space<vmem>>, vector<1x64x8xbf16>
    %151 = vector.shape_cast %150 : vector<1x64x8xbf16> to vector<64x8xbf16>
    %152 = arith.truncf %142 : vector<8x128xf32> to vector<8x128xbf16>
    %cst_65 = arith.constant dense<0.000000e+00> : vector<64x128xf32>
    %153 = tpu.matmul %151, %152, %cst_65 {dimension_numbers = #tpu.dot_dimension_numbers<[1], [0], [0], [1], [0, 0, 1, 1], [], []>} : vector<64x8xbf16>, vector<8x128xbf16>, vector<64x128xf32> -> vector<64x128xf32>
    %c1 = arith.constant 1 : index
    %c0_66 = arith.constant 0 : index
    %c0_67 = arith.constant 0 : index
    %154 = vector.load %arg6[%c1, %c0_66, %c0_67] : memref<8x64x8xbf16, #tpu.memory_space<vmem>>, vector<1x64x8xbf16>
    %155 = vector.shape_cast %154 : vector<1x64x8xbf16> to vector<64x8xbf16>
    %156 = arith.truncf %143 : vector<8x128xf32> to vector<8x128xbf16>
    %cst_68 = arith.constant dense<0.000000e+00> : vector<64x128xf32>
    %157 = tpu.matmul %155, %156, %cst_68 {dimension_numbers = #tpu.dot_dimension_numbers<[1], [0], [0], [1], [0, 0, 1, 1], [], []>} : vector<64x8xbf16>, vector<8x128xbf16>, vector<64x128xf32> -> vector<64x128xf32>
    %158 = arith.addf %153, %157 : vector<64x128xf32>
    %c2 = arith.constant 2 : index
    %c0_69 = arith.constant 0 : index
    %c0_70 = arith.constant 0 : index
    %159 = vector.load %arg6[%c2, %c0_69, %c0_70] : memref<8x64x8xbf16, #tpu.memory_space<vmem>>, vector<1x64x8xbf16>
    %160 = vector.shape_cast %159 : vector<1x64x8xbf16> to vector<64x8xbf16>
    %161 = arith.truncf %144 : vector<8x128xf32> to vector<8x128xbf16>
    %cst_71 = arith.constant dense<0.000000e+00> : vector<64x128xf32>
    %162 = tpu.matmul %160, %161, %cst_71 {dimension_numbers = #tpu.dot_dimension_numbers<[1], [0], [0], [1], [0, 0, 1, 1], [], []>} : vector<64x8xbf16>, vector<8x128xbf16>, vector<64x128xf32> -> vector<64x128xf32>
    %163 = arith.addf %158, %162 : vector<64x128xf32>
    %c3 = arith.constant 3 : index
    %c0_72 = arith.constant 0 : index
    %c0_73 = arith.constant 0 : index
    %164 = vector.load %arg6[%c3, %c0_72, %c0_73] : memref<8x64x8xbf16, #tpu.memory_space<vmem>>, vector<1x64x8xbf16>
    %165 = vector.shape_cast %164 : vector<1x64x8xbf16> to vector<64x8xbf16>
    %166 = arith.truncf %145 : vector<8x128xf32> to vector<8x128xbf16>
    %cst_74 = arith.constant dense<0.000000e+00> : vector<64x128xf32>
    %167 = tpu.matmul %165, %166, %cst_74 {dimension_numbers = #tpu.dot_dimension_numbers<[1], [0], [0], [1], [0, 0, 1, 1], [], []>} : vector<64x8xbf16>, vector<8x128xbf16>, vector<64x128xf32> -> vector<64x128xf32>
    %168 = arith.addf %163, %167 : vector<64x128xf32>
    %c4 = arith.constant 4 : index
    %c0_75 = arith.constant 0 : index
    %c0_76 = arith.constant 0 : index
    %169 = vector.load %arg6[%c4, %c0_75, %c0_76] : memref<8x64x8xbf16, #tpu.memory_space<vmem>>, vector<1x64x8xbf16>
    %170 = vector.shape_cast %169 : vector<1x64x8xbf16> to vector<64x8xbf16>
    %171 = arith.truncf %146 : vector<8x128xf32> to vector<8x128xbf16>
    %cst_77 = arith.constant dense<0.000000e+00> : vector<64x128xf32>
    %172 = tpu.matmul %170, %171, %cst_77 {dimension_numbers = #tpu.dot_dimension_numbers<[1], [0], [0], [1], [0, 0, 1, 1], [], []>} : vector<64x8xbf16>, vector<8x128xbf16>, vector<64x128xf32> -> vector<64x128xf32>
    %173 = arith.addf %168, %172 : vector<64x128xf32>
    %c5 = arith.constant 5 : index
    %c0_78 = arith.constant 0 : index
    %c0_79 = arith.constant 0 : index
    %174 = vector.load %arg6[%c5, %c0_78, %c0_79] : memref<8x64x8xbf16, #tpu.memory_space<vmem>>, vector<1x64x8xbf16>
    %175 = vector.shape_cast %174 : vector<1x64x8xbf16> to vector<64x8xbf16>
    %176 = arith.truncf %147 : vector<8x128xf32> to vector<8x128xbf16>
    %cst_80 = arith.constant dense<0.000000e+00> : vector<64x128xf32>
    %177 = tpu.matmul %175, %176, %cst_80 {dimension_numbers = #tpu.dot_dimension_numbers<[1], [0], [0], [1], [0, 0, 1, 1], [], []>} : vector<64x8xbf16>, vector<8x128xbf16>, vector<64x128xf32> -> vector<64x128xf32>
    %178 = arith.addf %173, %177 : vector<64x128xf32>
    %c6 = arith.constant 6 : index
    %c0_81 = arith.constant 0 : index
    %c0_82 = arith.constant 0 : index
    %179 = vector.load %arg6[%c6, %c0_81, %c0_82] : memref<8x64x8xbf16, #tpu.memory_space<vmem>>, vector<1x64x8xbf16>
    %180 = vector.shape_cast %179 : vector<1x64x8xbf16> to vector<64x8xbf16>
    %181 = arith.truncf %148 : vector<8x128xf32> to vector<8x128xbf16>
    %cst_83 = arith.constant dense<0.000000e+00> : vector<64x128xf32>
    %182 = tpu.matmul %180, %181, %cst_83 {dimension_numbers = #tpu.dot_dimension_numbers<[1], [0], [0], [1], [0, 0, 1, 1], [], []>} : vector<64x8xbf16>, vector<8x128xbf16>, vector<64x128xf32> -> vector<64x128xf32>
    %183 = arith.addf %178, %182 : vector<64x128xf32>
    %c7 = arith.constant 7 : index
    %c0_84 = arith.constant 0 : index
    %c0_85 = arith.constant 0 : index
    %184 = vector.load %arg6[%c7, %c0_84, %c0_85] : memref<8x64x8xbf16, #tpu.memory_space<vmem>>, vector<1x64x8xbf16>
    %185 = vector.shape_cast %184 : vector<1x64x8xbf16> to vector<64x8xbf16>
    %186 = arith.truncf %149 : vector<8x128xf32> to vector<8x128xbf16>
    %cst_86 = arith.constant dense<0.000000e+00> : vector<64x128xf32>
    %187 = tpu.matmul %185, %186, %cst_86 {dimension_numbers = #tpu.dot_dimension_numbers<[1], [0], [0], [1], [0, 0, 1, 1], [], []>} : vector<64x8xbf16>, vector<8x128xbf16>, vector<64x128xf32> -> vector<64x128xf32>
    %188 = arith.addf %183, %187 : vector<64x128xf32>
    %c0_87 = arith.constant 0 : index
    %c0_88 = arith.constant 0 : index
    %c0_89 = arith.constant 0 : index
    %189 = vector.load %arg9[%c0_87, %c0_88, %c0_89] : memref<2x32x32xbf16, #tpu.memory_space<vmem>>, vector<1x32x32xbf16>
    %190 = vector.shape_cast %189 : vector<1x32x32xbf16> to vector<32x32xbf16>
    %c0_90 = arith.constant 0 : index
    %c0_91 = arith.constant 0 : index
    %c0_92 = arith.constant 0 : index
    %191 = vector.load %arg10[%c0_90, %c0_91, %c0_92] : memref<2x64x32xbf16, #tpu.memory_space<vmem>>, vector<1x64x32xbf16>
    %192 = vector.shape_cast %191 : vector<1x64x32xbf16> to vector<64x32xbf16>
    %c0_93 = arith.constant 0 : index
    %c0_94 = arith.constant 0 : index
    %c0_95 = arith.constant 0 : index
    %193 = vector.load %arg11[%c0_93, %c0_94, %c0_95] : memref<2x96x1xf32, #tpu.memory_space<vmem>>, vector<1x96x1xf32>
    %194 = vector.shape_cast %193 : vector<1x96x1xf32> to vector<96x1xf32>
    %195 = vector.extract_strided_slice %188 {offsets = [0, 0], sizes = [32, 128], strides = [1, 1]} : vector<64x128xf32> to vector<32x128xf32>
    %196 = vector.extract_strided_slice %188 {offsets = [32, 0], sizes = [32, 128], strides = [1, 1]} : vector<64x128xf32> to vector<32x128xf32>
    %197 = vector.extract_strided_slice %194 {offsets = [0, 0], sizes = [32, 1], strides = [1, 1]} : vector<96x1xf32> to vector<32x1xf32>
    %198 = vector.extract_strided_slice %194 {offsets = [32, 0], sizes = [64, 1], strides = [1, 1]} : vector<96x1xf32> to vector<64x1xf32>
    %199 = arith.truncf %195 : vector<32x128xf32> to vector<32x128xbf16>
    %cst_96 = arith.constant dense<0.000000e+00> : vector<32x128xf32>
    %200 = tpu.matmul %190, %199, %cst_96 {dimension_numbers = #tpu.dot_dimension_numbers<[1], [0], [0], [1], [0, 0, 1, 1], [], []>} : vector<32x32xbf16>, vector<32x128xbf16>, vector<32x128xf32> -> vector<32x128xf32>
    %201 = vector.broadcast %197 : vector<32x1xf32> to vector<32x128xf32>
    %202 = arith.addf %200, %201 : vector<32x128xf32>
    %cst_97 = arith.constant 0.000000e+00 : f32
    %203 = vector.broadcast %cst_97 : f32 to vector<32x128xf32>
    %204 = arith.maximumf %202, %203 : vector<32x128xf32>
    %205 = arith.truncf %204 : vector<32x128xf32> to vector<32x128xbf16>
    %cst_98 = arith.constant dense<0.000000e+00> : vector<64x128xf32>
    %206 = tpu.matmul %192, %205, %cst_98 {dimension_numbers = #tpu.dot_dimension_numbers<[1], [0], [0], [1], [0, 0, 1, 1], [], []>} : vector<64x32xbf16>, vector<32x128xbf16>, vector<64x128xf32> -> vector<64x128xf32>
    %207 = vector.broadcast %198 : vector<64x1xf32> to vector<64x128xf32>
    %208 = arith.addf %206, %207 : vector<64x128xf32>
    %209 = vector.extract_strided_slice %208 {offsets = [0, 0], sizes = [32, 128], strides = [1, 1]} : vector<64x128xf32> to vector<32x128xf32>
    %cst_99 = arith.constant 2.000000e+00 : f32
    %210 = vector.broadcast %cst_99 : f32 to vector<32x128xf32>
    %211 = arith.addf %209, %210 : vector<32x128xf32>
    %212 = vector.extract_strided_slice %208 {offsets = [32, 0], sizes = [32, 128], strides = [1, 1]} : vector<64x128xf32> to vector<32x128xf32>
    %213 = math.absf %211 : vector<32x128xf32>
    %cst_100 = arith.constant 0.000000e+00 : f32
    %214 = vector.broadcast %cst_100 : f32 to vector<32x128xf32>
    %215 = arith.subf %214, %213 : vector<32x128xf32>
    %216 = math.exp %215 : vector<32x128xf32>
    %cst_101 = arith.constant 0.000000e+00 : f32
    %217 = vector.broadcast %cst_101 : f32 to vector<32x128xf32>
    %218 = arith.minimumf %211, %217 : vector<32x128xf32>
    %cst_102 = arith.constant 1.000000e+00 : f32
    %219 = vector.broadcast %cst_102 : f32 to vector<32x128xf32>
    %220 = arith.addf %219, %216 : vector<32x128xf32>
    %cst_103 = arith.constant 1.000000e+00 : f32
    %221 = vector.broadcast %cst_103 : f32 to vector<32x128xf32>
    %222 = arith.subf %220, %221 : vector<32x128xf32>
    %cst_104 = arith.constant 0.000000e+00 : f32
    %223 = vector.broadcast %cst_104 : f32 to vector<32x128xf32>
    %224 = arith.cmpf oeq, %222, %223 : vector<32x128xf32>
    %cst_105 = arith.constant 1.000000e+00 : f32
    %225 = vector.broadcast %cst_105 : f32 to vector<32x128xf32>
    %226 = arith.select %224, %225, %222 : vector<32x128xi1>, vector<32x128xf32>
    %cst_106 = arith.constant 0.000000e+00 : f32
    %227 = vector.broadcast %cst_106 : f32 to vector<32x128xf32>
    %228 = arith.cmpf oeq, %222, %227 : vector<32x128xf32>
    %229 = math.log %220 : vector<32x128xf32>
    %230 = arith.divf %216, %226 : vector<32x128xf32>
    %231 = arith.mulf %229, %230 : vector<32x128xf32>
    %232 = arith.select %228, %216, %231 : vector<32x128xi1>, vector<32x128xf32>
    %233 = arith.subf %218, %232 : vector<32x128xf32>
    %cst_107 = arith.constant 0.000000e+00 : f32
    %234 = vector.broadcast %cst_107 : f32 to vector<32x128xf32>
    %235 = arith.cmpf oge, %211, %234 : vector<32x128xf32>
    %cst_108 = arith.constant 1.000000e+00 : f32
    %236 = vector.broadcast %cst_108 : f32 to vector<32x128xf32>
    %237 = arith.select %235, %236, %216 : vector<32x128xi1>, vector<32x128xf32>
    %cst_109 = arith.constant 1.000000e+00 : f32
    %238 = vector.broadcast %cst_109 : f32 to vector<32x128xf32>
    %239 = arith.addf %238, %216 : vector<32x128xf32>
    %240 = tpu.reciprocal %239 {approx = true} : vector<32x128xf32> -> vector<32x128xf32>
    %241 = arith.mulf %237, %240 : vector<32x128xf32>
    %242 = arith.addf %196, %212 : vector<32x128xf32>
    %243 = arith.mulf %242, %241 : vector<32x128xf32>
    %cst_110 = arith.constant dense<0.000000e+00> : vector<128xf32>
    %244 = vector.multi_reduction <add>, %233, %cst_110 [0] : vector<32x128xf32> to vector<128xf32>
    %245 = vector.shape_cast %244 : vector<128xf32> to vector<1x128xf32>
    %c1_i32_111 = arith.constant 1 : i32
    %246 = arith.index_cast %c1_i32_111 : i32 to index
    %c0_112 = arith.constant 0 : index
    %c0_113 = arith.constant 0 : index
    %247 = vector.load %arg7[%246, %c0_112, %c0_113] : memref<2x64x32xbf16, #tpu.memory_space<vmem>>, vector<1x64x32xbf16>
    %248 = vector.shape_cast %247 : vector<1x64x32xbf16> to vector<64x32xbf16>
    %249 = arith.truncf %195 : vector<32x128xf32> to vector<32x128xbf16>
    %cst_114 = arith.constant dense<0.000000e+00> : vector<64x128xf32>
    %250 = tpu.matmul %248, %249, %cst_114 {dimension_numbers = #tpu.dot_dimension_numbers<[1], [0], [0], [1], [0, 0, 1, 1], [], []>} : vector<64x32xbf16>, vector<32x128xbf16>, vector<64x128xf32> -> vector<64x128xf32>
    %251 = arith.index_cast %c1_i32_111 : i32 to index
    %c0_115 = arith.constant 0 : index
    %c0_116 = arith.constant 0 : index
    %252 = vector.load %arg8[%251, %c0_115, %c0_116] : memref<2x64x32xbf16, #tpu.memory_space<vmem>>, vector<1x64x32xbf16>
    %253 = vector.shape_cast %252 : vector<1x64x32xbf16> to vector<64x32xbf16>
    %254 = arith.truncf %243 : vector<32x128xf32> to vector<32x128xbf16>
    %cst_117 = arith.constant dense<0.000000e+00> : vector<64x128xf32>
    %255 = tpu.matmul %253, %254, %cst_117 {dimension_numbers = #tpu.dot_dimension_numbers<[1], [0], [0], [1], [0, 0, 1, 1], [], []>} : vector<64x32xbf16>, vector<32x128xbf16>, vector<64x128xf32> -> vector<64x128xf32>
    %256 = arith.addf %250, %255 : vector<64x128xf32>
    %257 = arith.index_cast %c1_i32_111 : i32 to index
    %c0_118 = arith.constant 0 : index
    %c0_119 = arith.constant 0 : index
    %258 = vector.load %arg9[%257, %c0_118, %c0_119] : memref<2x32x32xbf16, #tpu.memory_space<vmem>>, vector<1x32x32xbf16>
    %259 = vector.shape_cast %258 : vector<1x32x32xbf16> to vector<32x32xbf16>
    %260 = arith.index_cast %c1_i32_111 : i32 to index
    %c0_120 = arith.constant 0 : index
    %c0_121 = arith.constant 0 : index
    %261 = vector.load %arg10[%260, %c0_120, %c0_121] : memref<2x64x32xbf16, #tpu.memory_space<vmem>>, vector<1x64x32xbf16>
    %262 = vector.shape_cast %261 : vector<1x64x32xbf16> to vector<64x32xbf16>
    %263 = arith.index_cast %c1_i32_111 : i32 to index
    %c0_122 = arith.constant 0 : index
    %c0_123 = arith.constant 0 : index
    %264 = vector.load %arg11[%263, %c0_122, %c0_123] : memref<2x96x1xf32, #tpu.memory_space<vmem>>, vector<1x96x1xf32>
    %265 = vector.shape_cast %264 : vector<1x96x1xf32> to vector<96x1xf32>
    %266 = vector.extract_strided_slice %256 {offsets = [0, 0], sizes = [32, 128], strides = [1, 1]} : vector<64x128xf32> to vector<32x128xf32>
    %267 = vector.extract_strided_slice %256 {offsets = [32, 0], sizes = [32, 128], strides = [1, 1]} : vector<64x128xf32> to vector<32x128xf32>
    %268 = vector.extract_strided_slice %265 {offsets = [0, 0], sizes = [32, 1], strides = [1, 1]} : vector<96x1xf32> to vector<32x1xf32>
    %269 = vector.extract_strided_slice %265 {offsets = [32, 0], sizes = [64, 1], strides = [1, 1]} : vector<96x1xf32> to vector<64x1xf32>
    %270 = arith.truncf %266 : vector<32x128xf32> to vector<32x128xbf16>
    %cst_124 = arith.constant dense<0.000000e+00> : vector<32x128xf32>
    %271 = tpu.matmul %259, %270, %cst_124 {dimension_numbers = #tpu.dot_dimension_numbers<[1], [0], [0], [1], [0, 0, 1, 1], [], []>} : vector<32x32xbf16>, vector<32x128xbf16>, vector<32x128xf32> -> vector<32x128xf32>
    %272 = vector.broadcast %268 : vector<32x1xf32> to vector<32x128xf32>
    %273 = arith.addf %271, %272 : vector<32x128xf32>
    %cst_125 = arith.constant 0.000000e+00 : f32
    %274 = vector.broadcast %cst_125 : f32 to vector<32x128xf32>
    %275 = arith.maximumf %273, %274 : vector<32x128xf32>
    %276 = arith.truncf %275 : vector<32x128xf32> to vector<32x128xbf16>
    %cst_126 = arith.constant dense<0.000000e+00> : vector<64x128xf32>
    %277 = tpu.matmul %262, %276, %cst_126 {dimension_numbers = #tpu.dot_dimension_numbers<[1], [0], [0], [1], [0, 0, 1, 1], [], []>} : vector<64x32xbf16>, vector<32x128xbf16>, vector<64x128xf32> -> vector<64x128xf32>
    %278 = vector.broadcast %269 : vector<64x1xf32> to vector<64x128xf32>
    %279 = arith.addf %277, %278 : vector<64x128xf32>
    %280 = vector.extract_strided_slice %279 {offsets = [0, 0], sizes = [32, 128], strides = [1, 1]} : vector<64x128xf32> to vector<32x128xf32>
    %cst_127 = arith.constant 2.000000e+00 : f32
    %281 = vector.broadcast %cst_127 : f32 to vector<32x128xf32>
    %282 = arith.addf %280, %281 : vector<32x128xf32>
    %283 = vector.extract_strided_slice %279 {offsets = [32, 0], sizes = [32, 128], strides = [1, 1]} : vector<64x128xf32> to vector<32x128xf32>
    %284 = math.absf %282 : vector<32x128xf32>
    %cst_128 = arith.constant 0.000000e+00 : f32
    %285 = vector.broadcast %cst_128 : f32 to vector<32x128xf32>
    %286 = arith.subf %285, %284 : vector<32x128xf32>
    %287 = math.exp %286 : vector<32x128xf32>
    %cst_129 = arith.constant 0.000000e+00 : f32
    %288 = vector.broadcast %cst_129 : f32 to vector<32x128xf32>
    %289 = arith.minimumf %282, %288 : vector<32x128xf32>
    %cst_130 = arith.constant 1.000000e+00 : f32
    %290 = vector.broadcast %cst_130 : f32 to vector<32x128xf32>
    %291 = arith.addf %290, %287 : vector<32x128xf32>
    %cst_131 = arith.constant 1.000000e+00 : f32
    %292 = vector.broadcast %cst_131 : f32 to vector<32x128xf32>
    %293 = arith.subf %291, %292 : vector<32x128xf32>
    %cst_132 = arith.constant 0.000000e+00 : f32
    %294 = vector.broadcast %cst_132 : f32 to vector<32x128xf32>
    %295 = arith.cmpf oeq, %293, %294 : vector<32x128xf32>
    %cst_133 = arith.constant 1.000000e+00 : f32
    %296 = vector.broadcast %cst_133 : f32 to vector<32x128xf32>
    %297 = arith.select %295, %296, %293 : vector<32x128xi1>, vector<32x128xf32>
    %cst_134 = arith.constant 0.000000e+00 : f32
    %298 = vector.broadcast %cst_134 : f32 to vector<32x128xf32>
    %299 = arith.cmpf oeq, %293, %298 : vector<32x128xf32>
    %300 = math.log %291 : vector<32x128xf32>
    %301 = arith.divf %287, %297 : vector<32x128xf32>
    %302 = arith.mulf %300, %301 : vector<32x128xf32>
    %303 = arith.select %299, %287, %302 : vector<32x128xi1>, vector<32x128xf32>
    %304 = arith.subf %289, %303 : vector<32x128xf32>
    %cst_135 = arith.constant 0.000000e+00 : f32
    %305 = vector.broadcast %cst_135 : f32 to vector<32x128xf32>
    %306 = arith.cmpf oge, %282, %305 : vector<32x128xf32>
    %cst_136 = arith.constant 1.000000e+00 : f32
    %307 = vector.broadcast %cst_136 : f32 to vector<32x128xf32>
    %308 = arith.select %306, %307, %287 : vector<32x128xi1>, vector<32x128xf32>
    %cst_137 = arith.constant 1.000000e+00 : f32
    %309 = vector.broadcast %cst_137 : f32 to vector<32x128xf32>
    %310 = arith.addf %309, %287 : vector<32x128xf32>
    %311 = tpu.reciprocal %310 {approx = true} : vector<32x128xf32> -> vector<32x128xf32>
    %312 = arith.mulf %308, %311 : vector<32x128xf32>
    %313 = arith.addf %267, %283 : vector<32x128xf32>
    %314 = arith.mulf %313, %312 : vector<32x128xf32>
    %cst_138 = arith.constant dense<0.000000e+00> : vector<128xf32>
    %315 = vector.multi_reduction <add>, %304, %cst_138 [0] : vector<32x128xf32> to vector<128xf32>
    %316 = vector.shape_cast %315 : vector<128xf32> to vector<1x128xf32>
    %317 = arith.addf %245, %316 : vector<1x128xf32>
    %c1_i32_139 = arith.constant 1 : i32
    %318 = arith.mulf %266, %266 : vector<32x128xf32>
    %cst_140 = arith.constant dense<0.000000e+00> : vector<128xf32>
    %319 = vector.multi_reduction <add>, %318, %cst_140 [0] : vector<32x128xf32> to vector<128xf32>
    %320 = vector.shape_cast %319 : vector<128xf32> to vector<1x128xf32>
    %321 = arith.mulf %314, %314 : vector<32x128xf32>
    %cst_141 = arith.constant dense<0.000000e+00> : vector<128xf32>
    %322 = vector.multi_reduction <add>, %321, %cst_141 [0] : vector<32x128xf32> to vector<128xf32>
    %323 = vector.shape_cast %322 : vector<128xf32> to vector<1x128xf32>
    %324 = arith.addf %320, %323 : vector<1x128xf32>
    %cst_142 = arith.constant 5.000000e-01 : f32
    %325 = vector.broadcast %cst_142 : f32 to vector<1x128xf32>
    %326 = arith.mulf %325, %324 : vector<1x128xf32>
    %327 = arith.subf %317, %326 : vector<1x128xf32>
    %c0_143 = arith.constant 0 : index
    %c0_144 = arith.constant 0 : index
    %328 = vector.load %arg13[%c0_143, %c0_144] : memref<1x128xf32, #tpu.memory_space<vmem>>, vector<1x128xf32>
    tpu.vector_store %arg13[%c0_143, %c0_144], %327 {strides = array<i32>} : memref<1x128xf32, #tpu.memory_space<vmem>>, vector<1x128xf32>,
    return
  }
}

</mosaic_0001>

<bundles_post_ra>
// kernel: custom-call.14
= control target key start
LH: loop header
LB: loop body
LE: loop exit
PB: predicated region body
PF: predicated region fallthrough
CT: control target
= control target key end

     0   :  { %5 = vsyncpa [#allocation4], 0  ;;  %s834_s0 = inlined_call_operand.vmem [shape: f32[16,16], index: 0, kind: input, shape index: {}]   ;;  %s835_s1 = inlined_call_operand.vmem [shape: f32[16,16], index: 1, kind: output, shape index: {0}]   ;;  %s836_s2 = inlined_call_operand.hbm [shape: s32[16], index: 2, kind: output, shape index: {1}]   ;;  %s837_s3 = inlined_call_operand.hbm [shape: s32[16], index: 3, kind: output, shape index: {2}]  }
   0x1   :  { %6 = vsyncpa [#allocation7], 0  ;;  %s20_s14 = scalar_lea.vmem %s834_s0, 8 }
   0x2   :  { %p399_p0 = scmp.gt.s32.totalorder %s834_s0, %s20_s14 }
   0x3   :  { %s694_s17 = smov (!%p399_p0), [#allocation0]   ;;  %s698_s20 = smov (!%p399_p0), %s834_s0  }
   0x4   :  { %400 = sbr.rel (%p399_p0) target bundleno = 21 (0x15), region = 128 }
   0xb LB: > { %v54_v0 = vld [vmem:[%s700_s20] sm:$0xff]  ;;  %s56_s20 = scalar_lea.vmem %s700_s20, 8   ;;  %s700_s20 = sphi %s698_s20, %s56_s20   ;;  %s696_s17 = sphi %s694_s17, %s57_s17  }
   0xc   : > { %55 = vst [vmem:[%s696_s17] sm:$0xff] %v54_v0  ;;  %s57_s17 = scalar_lea.vmem %s696_s17, 8   ;;  %p51_p1 = scmp.gt.s32.totalorder %s56_s20, %s20_s14 }
   0xe   :  { %53 = sbr.rel (!%p51_p1) target bundleno = 11 (0xb), region = 134 }
  0x15 PF:  { %v69_v1 = vld [vmem:[#allocation0] sm:$0xff]  ;;  %v73_v2 = vld [vmem:[#allocation0 + $0x8] sm:$0xff]  ;;  %v76_v3 = vlaneseq  ;;  %v718_v4 = vmov 0   ;;  %s702_s0 = smov 0  }
  0x16   :  { %70 = vst [vmem:[#allocation1] sm:$0xff] %v69_v1  ;;  %74 = vst [vmem:[#allocation1 + $0x8] sm:$0xff] %v73_v2 }
  0x17   :  { %75 = vst [vmem:[#allocation2] sm:$0x1] %v718_v4  ;;  %v751_v5 = vshrl.u32 %v76_v3, 7 }
  0x18 LB: > { %s437_s21 = sshll.u32 %s704_s0, 3  ;;  %s84_s0 = sadd.s32 1, %s704_s0   ;;  %s704_s0 = sphi %s702_s0, %s84_s0  }
  0x19   : > { %v88_v6 = vstv %s437_s21  ;;  %s86_s22 = scalar_lea.vmem [#allocation8], %s437_s21  ;;  %p81_p2 = scmp.ge.s32.totalorder %s84_s0, 2  }
  0x1a   : > { %v89_v7 = vadd.s32 %v88_v6, %v751_v5  ;;  %s754_s23 = smov (%p81_p2), 0  }
  0x1b   :  { %83 = sbr.rel (!%p81_p2) target bundleno = 24 (0x18), region = 145 }
  0x1c   : > { %90 = vst [vmem:[%s86_s22] sm:$0xff] %v89_v7 }
  0x22 LB: > { %v101_v8 = vld [vmem:[#allocation1] sm:$0xff]  ;;  %v113_v9 = vld [vmem:[#allocation1 + $0x8] sm:$0xff]  ;;  %v760_v10 = vadd.s32 8, %v751_v5  ;;  %v763_v12 = vstv %s708_s23  ;;  %s159_s24 = ssub.s32 128, %s708_s23  ;;  %v165_v45 = vand.u32 127, %v76_v3  ;;  %s171_s25 = scalar_lea.vmem [#allocation1], %s708_s23  ;;  %s708_s23 = sphi %s754_s23, %s96_s23  }
  0x23   : > { %v102_v11 = vand.u32 2147483647, %v101_v8  ;;  %v114_v13 = vand.u32 2147483647, %v113_v9  ;;  %vm105_vm0 = vcmp.ge.s32.totalorder %v751_v5, %v763_v12  ;;  %v168_v48 = vld [vmem:[#allocation2] ss:$0 sm:$0xff] }
  0x24   : > { %vm117_vm3 = vcmp.ge.s32.totalorder %v760_v10, %v763_v12  ;;  %vm189_vm13 = vcmp.gt.s32.totalorder %v165_v45, %v763_v12  ;;  %vm212_vm14 = vcmp.gt.s32.totalorder %v760_v10, %v763_v12  ;;  %vm166_vm15 = vcmp.eq.s32.totalorder %v165_v45, %v763_v12  ;;  %v173_v49 = vld [vmem:[%s171_s25] ss:$0 sm:$0xff]  ;;  %s177_s27 = scalar_lea.vmem [#allocation8], %s708_s23  ;;  %s96_s23 = sadd.s32 1, %s708_s23  }
  0x25   : > { %vm439_vm1 = vcmp.gt.f32.partialorder %v102_v11, -inf  ;;  %v179_v50 = vld [vmem:[%s177_s27] ss:$0 sm:$0xff]  ;;  %p93_p3 = scmp.ge.s32.totalorder %s96_s23, 16  }
  0x26   : > { %vm109_vm2 = vmand %vm105_vm0, %vm439_vm1  ;;  %s710_s5 = smov (%p93_p3), %s835_s1   ;;  %s714_s6 = smov (%p93_p3), [#allocation1]  }
  0x27   : > { %v110_v14 = vsel %vm109_vm2, %v751_v5, %v763_v12  ;;  %v111_v15 = vsel %vm109_vm2, %v102_v11, -inf  ;;  %vm783_vm0 = vmand %vm212_vm14, %vm166_vm15  ;;  %vm197_vm2 = vcmp.gt.s32.totalorder %v751_v5, %v763_v12 }
  0x28   : > { %vm120_vm4 = vcmp.lt.f32.partialorder %v111_v15, %v114_v13 }
  0x29   : > { %vm121_vm5 = vmand %vm117_vm3, %vm120_vm4 }
  0x2a   : > { %v122_v16 = vsel %vm121_vm5, %v760_v10, %v110_v14  ;;  %v123_v17 = vsel %vm121_vm5, %v114_v13, %v111_v15  ;;  %vm201_vm4 = vmand %vm197_vm2, %vm166_vm15 }
  0x2b   : > { %v124_v18 = vrot.slane %v123_v17, 1  ;;  %v125_v19 = vrot.slane %v122_v16, 1 }
  0x2d   : > { %vm126_vm6 = vcmp.ge.f32.partialorder %v124_v18, %v123_v17  ;;  %v129_v20 = vrot.slane %v124_v18, 1  ;;  %v130_v21 = vrot.slane %v125_v19, 1 }
  0x2e   : > { %v127_v22 = vsel %vm126_vm6, %v124_v18, %v123_v17  ;;  %v128_v23 = vsel %vm126_vm6, %v125_v19, %v122_v16 }
  0x2f   : > { %vm131_vm7 = vcmp.ge.f32.partialorder %v129_v20, %v127_v22  ;;  %v134_v24 = vrot.slane %v129_v20, 1  ;;  %v135_v25 = vrot.slane %v130_v21, 1 }
  0x30   : > { %v132_v26 = vsel %vm131_vm7, %v129_v20, %v127_v22  ;;  %v133_v27 = vsel %vm131_vm7, %v130_v21, %v128_v23 }
  0x31   : > { %vm136_vm8 = vcmp.ge.f32.partialorder %v134_v24, %v132_v26  ;;  %v139_v28 = vrot.slane %v134_v24, 1  ;;  %v140_v29 = vrot.slane %v135_v25, 1 }
  0x32   : > { %v137_v30 = vsel %vm136_vm8, %v134_v24, %v132_v26  ;;  %v138_v31 = vsel %vm136_vm8, %v135_v25, %v133_v27 }
  0x33   : > { %vm141_vm9 = vcmp.ge.f32.partialorder %v139_v28, %v137_v30  ;;  %v144_v32 = vrot.slane %v139_v28, 1  ;;  %v145_v33 = vrot.slane %v140_v29, 1 }
  0x34   : > { %v142_v34 = vsel %vm141_vm9, %v139_v28, %v137_v30  ;;  %v143_v35 = vsel %vm141_vm9, %v140_v29, %v138_v31 }
  0x35   : > { %vm146_vm10 = vcmp.ge.f32.partialorder %v144_v32, %v142_v34  ;;  %v149_v36 = vrot.slane %v144_v32, 1  ;;  %v150_v37 = vrot.slane %v145_v33, 1 }
  0x36   : > { %v147_v38 = vsel %vm146_vm10, %v144_v32, %v142_v34  ;;  %v148_v39 = vsel %vm146_vm10, %v145_v33, %v143_v35 }
  0x37   : > { %vm151_vm11 = vcmp.ge.f32.partialorder %v149_v36, %v147_v38  ;;  %v154_v40 = vrot.slane %v149_v36, 1  ;;  %v155_v41 = vrot.slane %v150_v37, 1 }
  0x38   : > { %v152_v42 = vsel %vm151_vm11, %v149_v36, %v147_v38  ;;  %v153_v43 = vsel %vm151_vm11, %v150_v37, %v148_v39 }
  0x39   : > { %vm156_vm12 = vcmp.ge.f32.partialorder %v154_v40, %v152_v42 }
  0x3a   : > { %v158_v44 = vsel %vm156_vm12, %v155_v41, %v153_v43 }
  0x3b   : > { %160 = vrot.lane.b32.xlu0 %v158_v44, %s159_s24 }
  0xad   : > { %v161_v47 = vpop.permute.xlu0 %160 }
  0xae   : > { %444 = vpush %v161_v47 }
  0xdf   : > { %s445_s26 = spop %444 }
  0xe0   : > { %v167_v51 = vstv %s445_s26  ;;  %s172_s28 = scalar_lea.vmem [#allocation1], %s445_s26  ;;  %s178_s29 = scalar_lea.vmem [#allocation8], %s445_s26 }
  0xe1   : > { %v169_v52 = vsel %vm166_vm15, %v167_v51, %v168_v48  ;;  %v174_v53 = vld [vmem:[%s172_s28] ss:$0 sm:$0xff] }
  0xe2   : > { %v180_v54 = vld [vmem:[%s178_s29] ss:$0 sm:$0xff]  ;;  %170 = vst [vmem:[#allocation2] sm:$0x1] %v169_v52  ;;  %175 = vst [vmem:[%s172_s28] sm:$0x1] %v173_v49  ;;  %vm183_vm1 = vcmp.ne.f32.partialorder %v174_v53, 0.0 }
  0xe3   : > { %181 = vst [vmem:[%s178_s29] sm:$0x1] %v179_v50  ;;  %176 = vst [vmem:[%s171_s25] sm:$0x1] %v174_v53  ;;  %v190_v2 = vsel %vm189_vm13, %v174_v53, 0.0 }
  0xe4   : > { %182 = vst [vmem:[%s177_s27] sm:$0x1] %v180_v54  ;;  %vm184_vm3 = vmand %vm166_vm15, %vm183_vm1 }
  0xe5   : > { %v185_v55 = vsel %vm184_vm3, %v174_v53, 1.0 }
  0xe6   : > { %v213_v56 = vsel %vm212_vm14, %v185_v55, 1.0  ;;  %v198_v57 = vsel %vm197_vm2, %v185_v55, 1.0 }
  0xe7   : > { %578 = vrcp.f32 %v213_v56 }
  0xe8   : > { %580 = vrcp.f32 %v198_v57 }
  0xe9   :  { %v276_v12 = vld [vmem:[#allocation2] sm:$0x1] (%p93_p3) }
  0xea   : > { %v209_v59 = vld [vmem:[#allocation1 + $0x8] sm:$0xff]  ;;  %v194_v62 = vld [vmem:[#allocation1] sm:$0xff]  ;;  %278 = vst [vmem:[#allocation3] sm:$0x1] (%p93_p3), %v276_v12 }
  0xeb   :  { %v223_v11 = vld [vmem:[#allocation8] sm:$0xff] (%p93_p3)  ;;  %v225_v13 = vld [vmem:[#allocation8 + $0x8] sm:$0xff] (%p93_p3) }
  0xf1   : > { %v579_v58 = vpop.eup %578 }
  0xf2   : > { %v581_v60 = vpop.eup %580  ;;  %v215_v61 = vmul.f32 %v579_v58, %v209_v59 }
  0xf3   : > { %v200_v63 = vmul.f32 %v581_v60, %v194_v62 }
  0xf4   : > { %v217_v0 = vsel %vm783_vm0, %v215_v61, 0.0 }
  0xf5   : > { %218 = vadd.xlane.f32.xlu1 %v217_v0  ;;  %v202_v1 = vsel %vm201_vm4, %v200_v63, 0.0 }
  0xf6   : > { %203 = vadd.xlane.f32.xlu0 %v202_v1 }
 0x123   :  { %240 = vxpose.xlu0.b32.start [1/2] (short) (narrow) (%p93_p3), %v223_v11, 8 }
 0x127   :  { %241 = vxpose.xlu0.b32.end [2/2] (short) (narrow) (%p93_p3), %v225_v13, 8 }
 0x182   : > { %v219_v4 = vpop.xlane.xlu1 %218  ;;  %95 = sbr.rel (!%p93_p3) target bundleno = 34 (0x22), region = 156 }
 0x183   : > { %v220_v6 = vmul.f32 %v219_v4, %v190_v2  ;;  %v204_v7 = vpop.xlane.xlu0 %203 }
 0x184   : > { %v205_v8 = vmul.f32 %v204_v7, %v190_v2 }
 0x185   : > { %v221_v9 = vsub.f32 %v215_v61, %v220_v6 }
 0x186   : > { %v206_v10 = vsub.f32 %v200_v63, %v205_v8 }
 0x187   : > { %222 = vst [vmem:[#allocation1 + $0x8] sm:$0xff] %v221_v9 }
 0x188   : > { %207 = vst [vmem:[#allocation1] sm:$0xff] %v206_v10 }
 0x1a3   :  { %v256_v14 = vpop.trf.xlu0 }
 0x1a4   :  { %272 = vst [vmem:[#allocation5] sm:$0x1] %v256_v14 }
 0x1ab   :  { %v282_v15 = vld [vmem:[#allocation5] sm:$0x1] }
 0x1ac   :  { %284 = vst [vmem:[#allocation6] sm:$0x1] %v282_v15 }
 0x1ad LB: > { %v332_v16 = vld [vmem:[%s716_s6] sm:$0xff]  ;;  %s334_s6 = scalar_lea.vmem %s716_s6, 8   ;;  %s716_s6 = sphi %s714_s6, %s334_s6   ;;  %s712_s5 = sphi %s710_s5, %s335_s5  }
 0x1ae   : > { %333 = vst [vmem:[%s712_s5] sm:$0xff] %v332_v16  ;;  %s335_s5 = scalar_lea.vmem %s712_s5, 8   ;;  %p329_p4 = scmp.gt.s32.totalorder %s334_s6, [#allocation1 + $0x8] }
 0x1af   :  { %s719_s7 = smov (%p329_p4), [#allocation3]   ;;  %s720_s9 = smov (%p329_p4), [#allocation6]  }
 0x1b0   :  { %331 = sbr.rel (!%p329_p4) target bundleno = 429 (0x1ad), region = 178  ;;  %s352_s8 = sshll.u32 (%p329_p4), %s719_s7, 4  ;;  %s353_s8 = int_to_ptr.vmem [resolvable:$true] %s352_s8 }
 0x1b1   :  { %s361_s10 = sshll.u32 (%p329_p4), %s720_s9, 4  ;;  %s582_s1 = scalar_lea.vmem (%p329_p4), %s353_s8, 16  ;;  %s362_s10 = int_to_ptr.vmem [resolvable:$true] %s361_s10 }
 0x1b2   :  { %p583_p5 = scmp.ne.s32.totalorder (%p329_p4), %s353_s8, %s582_s1  ;;  %s586_s11 = scalar_lea.vmem (%p329_p4), %s353_s8, 32 }
 0x1b3   :  { %p587_p6 = scmp.lt.s32.totalorder (%p329_p4), %s353_s8, %s353_s8  ;;  %p588_p7 = scmp.lt.s32.totalorder (%p329_p4), %s586_s11, %s582_s1 }
 0x1b5   :  { %p589_p8 = por (%p329_p4), %p588_p7, %p587_p6 }
 0x1b7   :  { %p590_p9 = pnand %p589_p8, %p583_p5 }
 0x1b9   :  { %593 = shalt.err (!%p590_p9)
}
 0x1ba   :  { %s594_s14 = scalar_lea.hbm %s836_s2, 16 }
 0x1bb   :  { %p595_p10 = scmp.ne.s32.totalorder %s836_s2, %s594_s14  ;;  %p598_p11 = scmp.lt.u32.totalorder %s594_s14, %s836_s2 }
 0x1bd   :  { %p600_p12 = pnand %p598_p11, %p595_p10 }
 0x1bf   :  { %603 = shalt.err (!%p600_p12)
}
 0x1c0   :  { %355 = dma.vmem_to_hbm [thread:$0]  %s353_s8, 16, %s836_s2, [#allocation4]  }
 0x1c1   :  { %s604_s0 = scalar_lea.vmem %s362_s10, 16  ;;  %s608_s21 = scalar_lea.vmem %s362_s10, 32 }
 0x1c2   :  { %p605_p13 = scmp.ne.s32.totalorder %s362_s10, %s604_s0  ;;  %p609_p0 = scmp.lt.s32.totalorder %s362_s10, %s362_s10 }
 0x1c3   :  { %p610_p1 = scmp.lt.s32.totalorder %s608_s21, %s604_s0 }
 0x1c5   :  { %p611_p2 = por %p610_p1, %p609_p0 }
 0x1c7   :  { %p612_p3 = pnand %p611_p2, %p605_p13 }
 0x1c9   :  { %615 = shalt.err (!%p612_p3)
}
 0x1ca   :  { %s616_s24 = scalar_lea.hbm %s837_s3, 16 }
 0x1cb   :  { %p617_p4 = scmp.ne.s32.totalorder %s837_s3, %s616_s24  ;;  %p620_p5 = scmp.lt.u32.totalorder %s616_s24, %s837_s3 }
 0x1cd   :  { %p622_p6 = pnand %p620_p5, %p617_p4 }
 0x1cf   :  { %625 = shalt.err (!%p622_p6)
}
 0x1d0   :  { %364 = dma.vmem_to_hbm [thread:$0]  %s362_s10, 16, %s837_s3, [#allocation7]  }
 0x1d1   :  { %690 = dma.done.wait [#allocation4], 16  }
 0x1d2   :  { %691 = vsyncadd [#allocation4], 4294967280 }
 0x1d3   :  { %692 = dma.done.wait [#allocation7], 16  }
 0x1d4   :  { %693 = vsyncadd [#allocation7], 4294967280 }
 0x1d5   :  { %371 = vsyncpa [#allocation4], 1 }
 0x1d6   :  { %372 = vsyncpa [#allocation7], 1 }

// kernel: custom-call.18
= control target key start
LH: loop header
LB: loop body
LE: loop exit
PB: predicated region body
PF: predicated region fallthrough
CT: control target
= control target key end

     0   :  { %5 = vsyncpa [#allocation4], 0  ;;  %s1146_s0 = inlined_call_operand.vmem [shape: f32[64,64], index: 0, kind: input, shape index: {}]   ;;  %s1147_s1 = inlined_call_operand.vmem [shape: f32[64,64], index: 1, kind: output, shape index: {0}]   ;;  %s1148_s2 = inlined_call_operand.hbm [shape: s32[64], index: 2, kind: output, shape index: {1}]   ;;  %s1149_s3 = inlined_call_operand.hbm [shape: s32[64], index: 3, kind: output, shape index: {2}]  }
   0x1   :  { %6 = vsyncpa [#allocation7], 0  ;;  %s20_s14 = scalar_lea.vmem %s1146_s0, 56 }
   0x2   :  { %p591_p0 = scmp.gt.s32.totalorder %s1146_s0, %s20_s14 }
   0x3   :  { %s898_s17 = smov (!%p591_p0), [#allocation0]   ;;  %s902_s20 = smov (!%p591_p0), %s1146_s0  }
   0x4   :  { %592 = sbr.rel (%p591_p0) target bundleno = 21 (0x15), region = 152 }
   0xb LB: > { %v54_v0 = vld [vmem:[%s904_s20] sm:$0xff]  ;;  %s56_s20 = scalar_lea.vmem %s904_s20, 8   ;;  %s904_s20 = sphi %s902_s20, %s56_s20   ;;  %s900_s17 = sphi %s898_s17, %s57_s17  }
   0xc   : > { %55 = vst [vmem:[%s900_s17] sm:$0xff] %v54_v0  ;;  %s57_s17 = scalar_lea.vmem %s900_s17, 8   ;;  %p51_p1 = scmp.gt.s32.totalorder %s56_s20, %s20_s14 }
   0xe   :  { %53 = sbr.rel (!%p51_p1) target bundleno = 11 (0xb), region = 158 }
  0x15 PF:  { %v69_v1 = vld [vmem:[#allocation0] sm:$0xff]  ;;  %v73_v2 = vld [vmem:[#allocation0 + $0x8] sm:$0xff]  ;;  %v77_v3 = vld [vmem:[#allocation0 + $0x10] sm:$0xff]  ;;  %v100_v4 = vlaneseq  ;;  %v922_v8 = vmov 0   ;;  %s906_s0 = smov 0  }
  0x16   :  { %70 = vst [vmem:[#allocation1] sm:$0xff] %v69_v1  ;;  %74 = vst [vmem:[#allocation1 + $0x8] sm:$0xff] %v73_v2  ;;  %v81_v5 = vld [vmem:[#allocation0 + $0x18] sm:$0xff]  ;;  %v85_v6 = vld [vmem:[#allocation0 + $0x20] sm:$0xff] }
  0x17   :  { %78 = vst [vmem:[#allocation1 + $0x10] sm:$0xff] %v77_v3  ;;  %v89_v7 = vld [vmem:[#allocation0 + $0x28] sm:$0xff]  ;;  %99 = vst [vmem:[#allocation2] sm:$0x1] %v922_v8  ;;  %v93_v9 = vld [vmem:[#allocation0 + $0x30] sm:$0xff]  ;;  %v955_v11 = vshrl.u32 %v100_v4, 7 }
  0x18   :  { %82 = vst [vmem:[#allocation1 + $0x18] sm:$0xff] %v81_v5  ;;  %86 = vst [vmem:[#allocation1 + $0x20] sm:$0xff] %v85_v6  ;;  %v97_v10 = vld [vmem:[#allocation0 + $0x38] sm:$0xff] }
  0x19   :  { %90 = vst [vmem:[#allocation1 + $0x28] sm:$0xff] %v89_v7  ;;  %94 = vst [vmem:[#allocation1 + $0x30] sm:$0xff] %v93_v9 }
  0x1a   :  { %98 = vst [vmem:[#allocation1 + $0x38] sm:$0xff] %v97_v10 }
  0x1b LB: > { %s629_s21 = sshll.u32 %s908_s0, 3  ;;  %s108_s0 = sadd.s32 1, %s908_s0   ;;  %s908_s0 = sphi %s906_s0, %s108_s0  }
  0x1c   : > { %v112_v12 = vstv %s629_s21  ;;  %s110_s22 = scalar_lea.vmem [#allocation8], %s629_s21  ;;  %p105_p2 = scmp.ge.s32.totalorder %s108_s0, 8  }
  0x1d   : > { %v113_v13 = vadd.s32 %v112_v12, %v955_v11  ;;  %s958_s23 = smov (%p105_p2), 0  }
  0x1e   :  { %107 = sbr.rel (!%p105_p2) target bundleno = 27 (0x1b), region = 169 }
  0x1f   : > { %114 = vst [vmem:[%s110_s22] sm:$0xff] %v113_v13 }
  0x25 LB: > { %v125_v14 = vld [vmem:[#allocation1] sm:$0xff]  ;;  %v137_v15 = vld [vmem:[#allocation1 + $0x8] sm:$0xff]  ;;  %v964_v16 = vadd.s32 8, %v955_v11  ;;  %v967_v18 = vstv %s912_s23  ;;  %v149_v20 = vld [vmem:[#allocation1 + $0x10] sm:$0xff]  ;;  %v972_v21 = vadd.s32 16, %v955_v11  ;;  %v979_v26 = vadd.s32 24, %v955_v11  ;;  %s912_s23 = sphi %s958_s23, %s120_s23  }
  0x26   : > { %v126_v17 = vand.u32 2147483647, %v125_v14  ;;  %v138_v19 = vand.u32 2147483647, %v137_v15  ;;  %vm129_vm0 = vcmp.ge.s32.totalorder %v955_v11, %v967_v18  ;;  %v150_v24 = vand.u32 2147483647, %v149_v20 }
  0x27   : > { %vm141_vm3 = vcmp.ge.s32.totalorder %v964_v16, %v967_v18  ;;  %v161_v25 = vld [vmem:[#allocation1 + $0x18] sm:$0xff]  ;;  %vm153_vm6 = vcmp.ge.s32.totalorder %v972_v21, %v967_v18  ;;  %v173_v30 = vld [vmem:[#allocation1 + $0x20] sm:$0xff]  ;;  %v985_v31 = vadd.s32 32, %v955_v11  ;;  %vm165_vm9 = vcmp.ge.s32.totalorder %v979_v26, %v967_v18  ;;  %v185_v35 = vld [vmem:[#allocation1 + $0x28] sm:$0xff]  ;;  %s255_s24 = ssub.s32 128, %s912_s23  ;;  %s267_s25 = scalar_lea.vmem [#allocation1], %s912_s23 }
  0x28   : > { %vm631_vm1 = vcmp.gt.f32.partialorder %v126_v17, -inf  ;;  %v162_v29 = vand.u32 2147483647, %v161_v25  ;;  %v174_v34 = vand.u32 2147483647, %v173_v30  ;;  %v991_v36 = vadd.s32 40, %v955_v11 }
  0x29   : > { %vm133_vm2 = vmand %vm129_vm0, %vm631_vm1  ;;  %vm177_vm12 = vcmp.ge.s32.totalorder %v985_v31, %v967_v18  ;;  %v186_v39 = vand.u32 2147483647, %v185_v35  ;;  %v197_v40 = vld [vmem:[#allocation1 + $0x30] sm:$0xff]  ;;  %v997_v41 = vadd.s32 48, %v955_v11  ;;  %v209_v45 = vld [vmem:[#allocation1 + $0x38] sm:$0xff]  ;;  %v1003_v46 = vadd.s32 56, %v955_v11 }
  0x2a   : > { %v134_v22 = vsel %vm133_vm2, %v955_v11, %v967_v18  ;;  %v135_v23 = vsel %vm133_vm2, %v126_v17, -inf  ;;  %vm189_vm15 = vcmp.ge.s32.totalorder %v991_v36, %v967_v18  ;;  %v198_v44 = vand.u32 2147483647, %v197_v40  ;;  %v264_v25 = vld [vmem:[#allocation2] ss:$0 sm:$0xff]  ;;  %s273_s27 = scalar_lea.vmem [#allocation8], %s912_s23 }
  0x2b   : > { %vm144_vm4 = vcmp.lt.f32.partialorder %v135_v23, %v138_v19  ;;  %vm201_vm2 = vcmp.ge.s32.totalorder %v997_v41, %v967_v18  ;;  %v210_v49 = vand.u32 2147483647, %v209_v45  ;;  %s120_s23 = sadd.s32 1, %s912_s23  }
  0x2c   : > { %vm145_vm5 = vmand %vm141_vm3, %vm144_vm4  ;;  %p117_p3 = scmp.ge.s32.totalorder %s120_s23, 64  }
  0x2d   : > { %v146_v27 = vsel %vm145_vm5, %v964_v16, %v134_v22  ;;  %v147_v28 = vsel %vm145_vm5, %v138_v19, %v135_v23  ;;  %vm213_vm5 = vcmp.ge.s32.totalorder %v1003_v46, %v967_v18  ;;  %v1014_v23 = vand.u32 127, %v100_v4  ;;  %s914_s5 = smov (%p117_p3), %s1147_s1   ;;  %s918_s6 = smov (%p117_p3), [#allocation1]  }
  0x2e   : > { %vm156_vm7 = vcmp.lt.f32.partialorder %v147_v28, %v150_v24 }
  0x2f   : > { %vm157_vm8 = vmand %vm153_vm6, %vm156_vm7 }
  0x30   : > { %v158_v32 = vsel %vm157_vm8, %v972_v21, %v146_v27  ;;  %v159_v33 = vsel %vm157_vm8, %v150_v24, %v147_v28  ;;  %v269_v27 = vld [vmem:[%s267_s25] ss:$0 sm:$0xff] }
  0x31   : > { %vm168_vm10 = vcmp.lt.f32.partialorder %v159_v33, %v162_v29  ;;  %v275_v28 = vld [vmem:[%s273_s27] ss:$0 sm:$0xff] }
  0x32   : > { %vm169_vm11 = vmand %vm165_vm9, %vm168_vm10 }
  0x33   : > { %v170_v37 = vsel %vm169_vm11, %v979_v26, %v158_v32  ;;  %v171_v38 = vsel %vm169_vm11, %v162_v29, %v159_v33 }
  0x34   : > { %vm180_vm13 = vcmp.lt.f32.partialorder %v171_v38, %v174_v34 }
  0x35   : > { %vm181_vm14 = vmand %vm177_vm12, %vm180_vm13 }
  0x36   : > { %v182_v42 = vsel %vm181_vm14, %v985_v31, %v170_v37  ;;  %v183_v43 = vsel %vm181_vm14, %v174_v34, %v171_v38 }
  0x37   : > { %vm192_vm0 = vcmp.lt.f32.partialorder %v183_v43, %v186_v39 }
  0x38   : > { %vm193_vm1 = vmand %vm189_vm15, %vm192_vm0  ;;  %vm1018_vm15 = vcmp.eq.s32.totalorder %v1014_v23, %v967_v18 }
  0x39   : > { %v194_v47 = vsel %vm193_vm1, %v991_v36, %v182_v42  ;;  %v195_v48 = vsel %vm193_vm1, %v186_v39, %v183_v43  ;;  %vm308_vm1 = vcmp.gt.s32.totalorder %v964_v16, %v967_v18 }
  0x3a   : > { %vm204_vm3 = vcmp.lt.f32.partialorder %v195_v48, %v198_v44 }
  0x3b   : > { %vm205_vm4 = vmand %vm201_vm2, %vm204_vm3  ;;  %vm293_vm2 = vcmp.gt.s32.totalorder %v955_v11, %v967_v18  ;;  %vm323_vm3 = vcmp.gt.s32.totalorder %v972_v21, %v967_v18 }
  0x3c   : > { %v206_v50 = vsel %vm205_vm4, %v997_v41, %v194_v47  ;;  %v207_v51 = vsel %vm205_vm4, %v198_v44, %v195_v48 }
  0x3d   : > { %vm216_vm6 = vcmp.lt.f32.partialorder %v207_v51, %v210_v49 }
  0x3e   : > { %vm217_vm7 = vmand %vm213_vm5, %vm216_vm6  ;;  %vm338_vm5 = vcmp.gt.s32.totalorder %v979_v26, %v967_v18  ;;  %vm353_vm6 = vcmp.gt.s32.totalorder %v985_v31, %v967_v18 }
  0x3f   : > { %v218_v52 = vsel %vm217_vm7, %v1003_v46, %v206_v50  ;;  %v219_v53 = vsel %vm217_vm7, %v210_v49, %v207_v51  ;;  %vm368_vm7 = vcmp.gt.s32.totalorder %v991_v36, %v967_v18 }
  0x40   : > { %v220_v54 = vrot.slane %v219_v53, 1  ;;  %v221_v55 = vrot.slane %v218_v52, 1 }
  0x42   : > { %vm222_vm8 = vcmp.ge.f32.partialorder %v220_v54, %v219_v53  ;;  %v225_v56 = vrot.slane %v220_v54, 1  ;;  %v226_v57 = vrot.slane %v221_v55, 1 }
  0x43   : > { %v223_v58 = vsel %vm222_vm8, %v220_v54, %v219_v53  ;;  %v224_v59 = vsel %vm222_vm8, %v221_v55, %v218_v52  ;;  %vm312_vm8 = vmand %vm308_vm1, %vm1018_vm15 }
  0x44   : > { %vm227_vm9 = vcmp.ge.f32.partialorder %v225_v56, %v223_v58  ;;  %v230_v60 = vrot.slane %v225_v56, 1  ;;  %v231_v61 = vrot.slane %v226_v57, 1 }
  0x45   : > { %v228_v62 = vsel %vm227_vm9, %v225_v56, %v223_v58  ;;  %v229_v63 = vsel %vm227_vm9, %v226_v57, %v224_v59  ;;  %vm383_vm9 = vcmp.gt.s32.totalorder %v997_v41, %v967_v18 }
  0x46   : > { %vm232_vm10 = vcmp.ge.f32.partialorder %v230_v60, %v228_v62  ;;  %v235_v0 = vrot.slane %v230_v60, 1  ;;  %v236_v1 = vrot.slane %v231_v61, 1 }
  0x47   : > { %v233_v2 = vsel %vm232_vm10, %v230_v60, %v228_v62  ;;  %v234_v3 = vsel %vm232_vm10, %v231_v61, %v229_v63  ;;  %vm297_vm10 = vmand %vm293_vm2, %vm1018_vm15 }
  0x48   : > { %vm237_vm11 = vcmp.ge.f32.partialorder %v235_v0, %v233_v2  ;;  %v240_v5 = vrot.slane %v235_v0, 1  ;;  %v241_v6 = vrot.slane %v236_v1, 1 }
  0x49   : > { %v238_v7 = vsel %vm237_vm11, %v235_v0, %v233_v2  ;;  %v239_v8 = vsel %vm237_vm11, %v236_v1, %v234_v3  ;;  %vm327_vm11 = vmand %vm323_vm3, %vm1018_vm15 }
  0x4a   : > { %vm242_vm12 = vcmp.ge.f32.partialorder %v240_v5, %v238_v7  ;;  %v245_v9 = vrot.slane %v240_v5, 1  ;;  %v246_v10 = vrot.slane %v241_v6, 1 }
  0x4b   : > { %v243_v12 = vsel %vm242_vm12, %v240_v5, %v238_v7  ;;  %v244_v13 = vsel %vm242_vm12, %v241_v6, %v239_v8  ;;  %vm398_vm12 = vcmp.gt.s32.totalorder %v1003_v46, %v967_v18 }
  0x4c   : > { %vm247_vm13 = vcmp.ge.f32.partialorder %v245_v9, %v243_v12  ;;  %v250_v14 = vrot.slane %v245_v9, 1  ;;  %v251_v15 = vrot.slane %v246_v10, 1 }
  0x4d   : > { %v248_v17 = vsel %vm247_vm13, %v245_v9, %v243_v12  ;;  %v249_v19 = vsel %vm247_vm13, %v246_v10, %v244_v13  ;;  %vm342_vm13 = vmand %vm338_vm5, %vm1018_vm15 }
  0x4e   : > { %vm252_vm14 = vcmp.ge.f32.partialorder %v250_v14, %v248_v17 }
  0x4f   : > { %v254_v20 = vsel %vm252_vm14, %v251_v15, %v249_v19  ;;  %vm357_vm14 = vmand %vm353_vm6, %vm1018_vm15 }
  0x50   : > { %256 = vrot.lane.b32.xlu0 %v254_v20, %s255_s24 }
  0xc2   : > { %v257_v22 = vpop.permute.xlu0 %256 }
  0xc3   : > { %636 = vpush %v257_v22 }
  0xf4   : > { %s637_s26 = spop %636 }
  0xf5   : > { %v263_v29 = vstv %s637_s26  ;;  %s268_s28 = scalar_lea.vmem [#allocation1], %s637_s26  ;;  %s274_s29 = scalar_lea.vmem [#allocation8], %s637_s26 }
  0xf6   : > { %v265_v30 = vsel %vm1018_vm15, %v263_v29, %v264_v25  ;;  %v1026_v32 = vld [vmem:[%s268_s28] ss:$0 sm:$0xff] }
  0xf7   : > { %v276_v33 = vld [vmem:[%s274_s29] ss:$0 sm:$0xff]  ;;  %266 = vst [vmem:[#allocation2] sm:$0x1] %v265_v30  ;;  %271 = vst [vmem:[%s268_s28] sm:$0x1] %v269_v27  ;;  %vm279_vm0 = vcmp.ne.f32.partialorder %v1026_v32, 0.0 }
  0xf8   : > { %277 = vst [vmem:[%s274_s29] sm:$0x1] %v275_v28  ;;  %272 = vst [vmem:[%s267_s25] sm:$0x1] %v1026_v32 }
  0xf9   : > { %278 = vst [vmem:[%s273_s27] sm:$0x1] %v276_v33  ;;  %vm280_vm4 = vmand %vm1018_vm15, %vm279_vm0 }
  0xfa   : > { %v281_v34 = vsel %vm280_vm4, %v1026_v32, 1.0  ;;  %vm372_vm0 = vmand %vm368_vm7, %vm1018_vm15 }
  0xfb   : > { %v309_v35 = vsel %vm308_vm1, %v281_v34, 1.0  ;;  %v294_v37 = vsel %vm293_vm2, %v281_v34, 1.0  ;;  %v324_v38 = vsel %vm323_vm3, %v281_v34, 1.0  ;;  %v339_v39 = vsel %vm338_vm5, %v281_v34, 1.0  ;;  %vm387_vm1 = vmand %vm383_vm9, %vm1018_vm15 }
  0xfc   : > { %770 = vrcp.f32 %v309_v35  ;;  %v354_v40 = vsel %vm353_vm6, %v281_v34, 1.0  ;;  %v369_v42 = vsel %vm368_vm7, %v281_v34, 1.0  ;;  %v384_v16 = vsel %vm383_vm9, %v281_v34, 1.0  ;;  %vm402_vm2 = vmand %vm398_vm12, %vm1018_vm15 }
  0xfd   : > { %772 = vrcp.f32 %v294_v37  ;;  %v399_v59 = vsel %vm398_vm12, %v281_v34, 1.0  ;;  %vm285_vm3 = vcmp.gt.s32.totalorder %v1014_v23, %v967_v18 }
  0xfe   : > { %774 = vrcp.f32 %v324_v38  ;;  %v286_v10 = vsel %vm285_vm3, %v1026_v32, 0.0 }
  0xff   : > { %776 = vrcp.f32 %v339_v39  ;;  %v305_v44 = vld [vmem:[#allocation1 + $0x8] sm:$0xff]  ;;  %v290_v48 = vld [vmem:[#allocation1] sm:$0xff]  ;;  %v320_v51 = vld [vmem:[#allocation1 + $0x10] sm:$0xff] }
 0x100   : > { %778 = vrcp.f32 %v354_v40  ;;  %v335_v56 = vld [vmem:[#allocation1 + $0x18] sm:$0xff]  ;;  %v350_v21 = vld [vmem:[#allocation1 + $0x20] sm:$0xff]  ;;  %v365_v0 = vld [vmem:[#allocation1 + $0x28] sm:$0xff] }
 0x101   : > { %780 = vrcp.f32 %v369_v42  ;;  %v380_v26 = vld [vmem:[#allocation1 + $0x30] sm:$0xff]  ;;  %v395_v31 = vld [vmem:[#allocation1 + $0x38] sm:$0xff]  ;;  %v413_v42 = vld [vmem:[#allocation8 + $0x10] sm:$0xff] (%p117_p3) }
 0x102   : > { %782 = vrcp.f32 %v384_v16  ;;  %v409_v39 = vld [vmem:[#allocation8] sm:$0xff] (%p117_p3)  ;;  %v411_v40 = vld [vmem:[#allocation8 + $0x8] sm:$0xff] (%p117_p3) }
 0x103   : > { %784 = vrcp.f32 %v399_v59 }
 0x106   : > { %v771_v43 = vpop.eup %770 }
 0x107   : > { %v773_v45 = vpop.eup %772  ;;  %v311_v47 = vmul.f32 %v771_v43, %v305_v44  ;;  %v468_v43 = vld [vmem:[#allocation2] sm:$0x1] (%p117_p3)  ;;  %v415_v44 = vld [vmem:[#allocation8 + $0x18] sm:$0xff] (%p117_p3) }
 0x108   : > { %v775_v49 = vpop.eup %774  ;;  %v296_v50 = vmul.f32 %v773_v45, %v290_v48  ;;  %470 = vst [vmem:[#allocation3] sm:$0x1] (%p117_p3), %v468_v43  ;;  %v417_v45 = vld [vmem:[#allocation8 + $0x20] sm:$0xff] (%p117_p3)  ;;  %v421_v48 = vld [vmem:[#allocation8 + $0x30] sm:$0xff] (%p117_p3) }
 0x109   : > { %v313_v52 = vsel %vm312_vm8, %v311_v47, 0.0  ;;  %v326_v53 = vmul.f32 %v775_v49, %v320_v51  ;;  %v777_v54 = vpop.eup %776  ;;  %v423_v49 = vld [vmem:[#allocation8 + $0x38] sm:$0xff] (%p117_p3) }
 0x10a   : > { %314 = vadd.xlane.f32.xlu1 %v313_v52  ;;  %v298_v55 = vsel %vm297_vm10, %v296_v50, 0.0  ;;  %v341_v58 = vmul.f32 %v777_v54, %v335_v56  ;;  %v779_v60 = vpop.eup %778 }
 0x10b   : > { %299 = vadd.xlane.f32.xlu0 %v298_v55  ;;  %v328_v57 = vsel %vm327_vm11, %v326_v53, 0.0  ;;  %v356_v62 = vmul.f32 %v779_v60, %v350_v21  ;;  %v781_v63 = vpop.eup %780 }
 0x10c   : > { %v343_v61 = vsel %vm342_vm13, %v341_v58, 0.0  ;;  %v371_v2 = vmul.f32 %v781_v63, %v365_v0  ;;  %v783_v3 = vpop.eup %782 }
 0x10d   : > { %v358_v1 = vsel %vm357_vm14, %v356_v62, 0.0  ;;  %v386_v6 = vmul.f32 %v783_v3, %v380_v26  ;;  %v785_v7 = vpop.eup %784 }
 0x10e   : > { %329 = vadd.xlane.f32.xlu1 %v328_v57  ;;  %v373_v5 = vsel %vm372_vm0, %v371_v2, 0.0  ;;  %v401_v9 = vmul.f32 %v785_v7, %v395_v31 }
 0x10f   : > { %v388_v8 = vsel %vm387_vm1, %v386_v6, 0.0 }
 0x110   : > { %v403_v36 = vsel %vm402_vm2, %v401_v9, 0.0 }
 0x112   : > { %344 = vadd.xlane.f32.xlu1 %v343_v61 }
 0x116   : > { %359 = vadd.xlane.f32.xlu1 %v358_v1 }
 0x11a   : > { %374 = vadd.xlane.f32.xlu1 %v373_v5 }
 0x11e   : > { %389 = vadd.xlane.f32.xlu1 %v388_v8 }
 0x122   : > { %404 = vadd.xlane.f32.xlu1 %v403_v36 }
 0x138   :  { %432 = vxpose.xlu0.b32.start [1/8] (short) (narrow) (%p117_p3), %v409_v39, 8 }
 0x13c   :  { %433 = vxpose.xlu0.b32.cont [2/8] (short) (narrow) (%p117_p3), %v411_v40, 8 }
 0x140   :  { %434 = vxpose.xlu0.b32.cont [3/8] (short) (narrow) (%p117_p3), %v413_v42, 8 }
 0x144   :  { %435 = vxpose.xlu0.b32.cont [4/8] (short) (narrow) (%p117_p3), %v415_v44, 8 }
 0x148   :  { %436 = vxpose.xlu0.b32.cont [5/8] (short) (narrow) (%p117_p3), %v417_v45, 8 }
 0x197   : > { %v315_v12 = vpop.xlane.xlu1 %314 }
 0x198   : > { %v316_v41 = vmul.f32 %v315_v12, %v286_v10  ;;  %v300_v13 = vpop.xlane.xlu0 %299 }
 0x199   : > { %v301_v14 = vmul.f32 %v300_v13, %v286_v10 }
 0x19a   : > { %v317_v15 = vsub.f32 %v311_v47, %v316_v41  ;;  %v419_v47 = vld [vmem:[#allocation8 + $0x28] sm:$0xff] (%p117_p3) }
 0x19b   : > { %v302_v17 = vsub.f32 %v296_v50, %v301_v14  ;;  %v330_v19 = vpop.xlane.xlu1 %329  ;;  %437 = vxpose.xlu0.b32.cont [6/8] (short) (narrow) (%p117_p3), %v419_v47, 8 }
 0x19c   : > { %318 = vst [vmem:[#allocation1 + $0x8] sm:$0xff] %v317_v15  ;;  %v331_v20 = vmul.f32 %v330_v19, %v286_v10 }
 0x19d   : > { %303 = vst [vmem:[#allocation1] sm:$0xff] %v302_v17 }
 0x19e   : > { %v332_v22 = vsub.f32 %v326_v53, %v331_v20 }
 0x19f   : > { %v345_v46 = vpop.xlane.xlu1 %344  ;;  %438 = vxpose.xlu0.b32.cont [7/8] (short) (narrow) (%p117_p3), %v421_v48, 8 }
 0x1a0   : > { %333 = vst [vmem:[#allocation1 + $0x10] sm:$0xff] %v332_v22  ;;  %v346_v24 = vmul.f32 %v345_v46, %v286_v10 }
 0x1a2   : > { %v347_v25 = vsub.f32 %v341_v58, %v346_v24 }
 0x1a3   : > { %v360_v27 = vpop.xlane.xlu1 %359  ;;  %439 = vxpose.xlu0.b32.end [8/8] (short) (narrow) (%p117_p3), %v423_v49, 8 }
 0x1a4   : > { %348 = vst [vmem:[#allocation1 + $0x18] sm:$0xff] %v347_v25  ;;  %v361_v18 = vmul.f32 %v360_v27, %v286_v10 }
 0x1a6   : > { %v362_v23 = vsub.f32 %v356_v62, %v361_v18 }
 0x1a7   : > { %v375_v28 = vpop.xlane.xlu1 %374 }
 0x1a8   : > { %363 = vst [vmem:[#allocation1 + $0x20] sm:$0xff] %v362_v23  ;;  %v376_v29 = vmul.f32 %v375_v28, %v286_v10 }
 0x1aa   : > { %v377_v30 = vsub.f32 %v371_v2, %v376_v29 }
 0x1ab   : > { %v390_v32 = vpop.xlane.xlu1 %389 }
 0x1ac   : > { %378 = vst [vmem:[#allocation1 + $0x28] sm:$0xff] %v377_v30  ;;  %v391_v33 = vmul.f32 %v390_v32, %v286_v10 }
 0x1ae   : > { %v392_v34 = vsub.f32 %v386_v6, %v391_v33 }
 0x1af   : > { %v405_v35 = vpop.xlane.xlu1 %404  ;;  %119 = sbr.rel (!%p117_p3) target bundleno = 37 (0x25), region = 180 }
 0x1b0   : > { %393 = vst [vmem:[#allocation1 + $0x30] sm:$0xff] %v392_v34  ;;  %v406_v37 = vmul.f32 %v405_v35, %v286_v10 }
 0x1b2   : > { %v407_v38 = vsub.f32 %v401_v9, %v406_v37 }
 0x1b4   : > { %408 = vst [vmem:[#allocation1 + $0x38] sm:$0xff] %v407_v38 }
 0x207   :  { %v448_v50 = vpop.trf.xlu0 }
 0x208   :  { %464 = vst [vmem:[#allocation5] sm:$0x1] %v448_v50 }
 0x20f   :  { %v474_v4 = vld [vmem:[#allocation5] sm:$0x1] }
 0x210   :  { %476 = vst [vmem:[#allocation6] sm:$0x1] %v474_v4 }
 0x211 LB: > { %v524_v11 = vld [vmem:[%s920_s6] sm:$0xff]  ;;  %s526_s6 = scalar_lea.vmem %s920_s6, 8   ;;  %s920_s6 = sphi %s918_s6, %s526_s6   ;;  %s916_s5 = sphi %s914_s5, %s527_s5  }
 0x212   : > { %525 = vst [vmem:[%s916_s5] sm:$0xff] %v524_v11  ;;  %s527_s5 = scalar_lea.vmem %s916_s5, 8   ;;  %p521_p4 = scmp.gt.s32.totalorder %s526_s6, [#allocation1 + $0x38] }
 0x213   :  { %s923_s7 = smov (%p521_p4), [#allocation3]   ;;  %s924_s9 = smov (%p521_p4), [#allocation6]  }
 0x214   :  { %523 = sbr.rel (!%p521_p4) target bundleno = 529 (0x211), region = 202  ;;  %s544_s8 = sshll.u32 (%p521_p4), %s923_s7, 4  ;;  %s545_s8 = int_to_ptr.vmem [resolvable:$true] %s544_s8 }
 0x215   :  { %s553_s10 = sshll.u32 (%p521_p4), %s924_s9, 4  ;;  %s786_s1 = scalar_lea.vmem (%p521_p4), %s545_s8, 16  ;;  %s554_s10 = int_to_ptr.vmem [resolvable:$true] %s553_s10 }
 0x216   :  { %p787_p5 = scmp.ne.s32.totalorder (%p521_p4), %s545_s8, %s786_s1  ;;  %s790_s11 = scalar_lea.vmem (%p521_p4), %s545_s8, 32 }
 0x217   :  { %p791_p6 = scmp.lt.s32.totalorder (%p521_p4), %s545_s8, %s545_s8  ;;  %p792_p7 = scmp.lt.s32.totalorder (%p521_p4), %s790_s11, %s786_s1 }
 0x219   :  { %p793_p8 = por (%p521_p4), %p792_p7, %p791_p6 }
 0x21b   :  { %p794_p9 = pnand %p793_p8, %p787_p5 }
 0x21d   :  { %797 = shalt.err (!%p794_p9)
}
 0x21e   :  { %s798_s14 = scalar_lea.hbm %s1148_s2, 16 }
 0x21f   :  { %p799_p10 = scmp.ne.s32.totalorder %s1148_s2, %s798_s14  ;;  %p802_p11 = scmp.lt.u32.totalorder %s798_s14, %s1148_s2 }
 0x221   :  { %p804_p12 = pnand %p802_p11, %p799_p10 }
 0x223   :  { %807 = shalt.err (!%p804_p12)
}
 0x224   :  { %547 = dma.vmem_to_hbm [thread:$0]  %s545_s8, 16, %s1148_s2, [#allocation4]  }
 0x225   :  { %s808_s0 = scalar_lea.vmem %s554_s10, 16  ;;  %s812_s21 = scalar_lea.vmem %s554_s10, 32 }
 0x226   :  { %p809_p13 = scmp.ne.s32.totalorder %s554_s10, %s808_s0  ;;  %p813_p0 = scmp.lt.s32.totalorder %s554_s10, %s554_s10 }
 0x227   :  { %p814_p1 = scmp.lt.s32.totalorder %s812_s21, %s808_s0 }
 0x229   :  { %p815_p2 = por %p814_p1, %p813_p0 }
 0x22b   :  { %p816_p3 = pnand %p815_p2, %p809_p13 }
 0x22d   :  { %819 = shalt.err (!%p816_p3)
}
 0x22e   :  { %s820_s24 = scalar_lea.hbm %s1149_s3, 16 }
 0x22f   :  { %p821_p4 = scmp.ne.s32.totalorder %s1149_s3, %s820_s24  ;;  %p824_p5 = scmp.lt.u32.totalorder %s820_s24, %s1149_s3 }
 0x231   :  { %p826_p6 = pnand %p824_p5, %p821_p4 }
 0x233   :  { %829 = shalt.err (!%p826_p6)
}
 0x234   :  { %556 = dma.vmem_to_hbm [thread:$0]  %s554_s10, 16, %s1149_s3, [#allocation7]  }
 0x235   :  { %894 = dma.done.wait [#allocation4], 16  }
 0x236   :  { %895 = vsyncadd [#allocation4], 4294967280 }
 0x237   :  { %896 = dma.done.wait [#allocation7], 16  }
 0x238   :  { %897 = vsyncadd [#allocation7], 4294967280 }
 0x239   :  { %563 = vsyncpa [#allocation4], 1 }
 0x23a   :  { %564 = vsyncpa [#allocation7], 1 }

// kernel: glow2d_forward.1
= control target key start
LH: loop header
LB: loop body
LE: loop exit
PB: predicated region body
PF: predicated region fallthrough
CT: control target
= control target key end

     0   :  { %vm73_vm0 = vcmask 1043456   ;;  %v4023_v3 = vmov 0   ;;  %vm69_vm1 = vcmask 64512   ;;  %vm487_vm2 = vcmask 261120   ;;  %s4986_s0 = inlined_call_operand.vmem [shape: f32[16,512], index: 0, kind: input, shape index: {}]   ;;  %s4987_s2 = inlined_call_operand.vmem [shape: bf16[2,16,8], index: 2, kind: input, shape index: {}]   ;;  %s4988_s1 = inlined_call_operand.vmem [shape: bf16[2,16,8], index: 1, kind: input, shape index: {}]   ;;  %s4989_s3 = inlined_call_operand.vmem [shape: bf16[2,32,8], index: 3, kind: input, shape index: {}]   ;;  %s4990_s5 = inlined_call_operand.vmem [shape: f32[2,48,1], index: 5, kind: input, shape index: {}]   ;;  %s4991_s11 = inlined_call_operand.vmem [shape: f32[2,96,1], index: 11, kind: input, shape index: {}]   ;;  %s4992_s4 = inlined_call_operand.vmem [shape: bf16[2,16,32], index: 4, kind: input, shape index: {}]   ;;  %s4993_s6 = inlined_call_operand.vmem [shape: bf16[8,64,8], index: 6, kind: input, shape index: {}]   ;;  %s4994_s12 = inlined_call_operand.vmem [shape: f32[1,512], index: 12, kind: output, shape index: {0}]   ;;  %s4995_s9 = inlined_call_operand.vmem [shape: bf16[2,32,32], index: 9, kind: input, shape index: {}]   ;;  %s4996_s10 = inlined_call_operand.vmem [shape: bf16[2,64,32], index: 10, kind: input, shape index: {}]   ;;  %s4997_s8 = inlined_call_operand.vmem [shape: bf16[2,64,32], index: 8, kind: input, shape index: {}]   ;;  %s4998_s7 = inlined_call_operand.vmem [shape: bf16[2,64,32], index: 7, kind: input, shape index: {}]   ;;  %s4999_s13 = inlined_call_operand.vmem [shape: f32[1,128], index: 13, kind: output, shape index: {1}]  }
   0x1   :  { %v49_v0 = vld [vmem:[%s4986_s0 + $0x28] sm:$0xff]  ;;  %v48_v2 = vld [vmem:[%s4986_s0 + $0x20] sm:$0xff]  ;;  %118 = vmatprep.mubr.bf16.mxu1 %v4023_v3  ;;  %224 = vmatprep.mubr.bf16.mxu0 %v4023_v3  ;;  %v51_v11 = vld [vmem:[%s4986_s0 + $0x38] sm:$0xff] }
   0x2   :  { %v45_v1 = vld [vmem:[%s4986_s0 + $0x8] sm:$0xff]  ;;  %v61_v4 = vpack.c.bf16 %v49_v0, %v49_v0  ;;  %v60_v6 = vpack.c.bf16 %v48_v2, %v48_v2  ;;  %v44_v7 = vld [vmem:[%s4986_s0] sm:$0xff]  ;;  %3831 = vset.pattern.permute.xlu0 %v4023_v3  ;;  %3832 = vset.pattern.permute.xlu1 %v4023_v3  ;;  %v50_v12 = vld [vmem:[%s4986_s0 + $0x30] sm:$0xff]  ;;  %v63_v15 = vpack.c.bf16 %v51_v11, %v51_v11 }
   0x3   :  { %v55_v5 = vpack.c.bf16 %v45_v1, %v45_v1  ;;  %v54_v8 = vpack.c.bf16 %v44_v7, %v44_v7  ;;  %v3833_v10 = vld [vmem:[%s4987_s2] sm:$0xff]   ;;  %v62_v16 = vpack.c.bf16 %v50_v12, %v50_v12  ;;  %v47_v17 = vld [vmem:[%s4986_s0 + $0x18] sm:$0xff]  ;;  %v46_v20 = vld [vmem:[%s4986_s0 + $0x10] sm:$0xff] }
   0x4   :  { %3236 = vmatprep.subr.msk.bf16.mxu1 %vm73_vm0, %v61_v4  ;;  %v75_v9 = vsel %vm73_vm0, %v60_v6, 0  ;;  %v3834_v14 = vld [vmem:[%s4988_s1] sm:$0xff]   ;;  %v57_v18 = vpack.c.bf16 %v47_v17, %v47_v17  ;;  %v56_v21 = vpack.c.bf16 %v46_v20, %v46_v20  ;;  %v286_v24 = vld [vmem:[%s4990_s5 + $0x10] sm:$0xff]  ;;  %v285_v25 = vld [vmem:[%s4990_s5 + $0x8] sm:$0xff] }
   0x5   :  { %3241 = vmatprep.subr.msk.bf16.mxu0 %vm73_vm0, %v55_v5  ;;  %87 = vmatpush1.bf16.msra.mxu1 %v75_v9  ;;  %v181_v13 = vsel %vm73_vm0, %v54_v8, 0  ;;  %v81_v19 = vsel %vm73_vm0, %v62_v16, 0  ;;  %v284_v23 = vld [vmem:[%s4990_s5] sm:$0xff]  ;;  %v287_v26 = vld [vmem:[%s4990_s5 + $0x18] sm:$0xff]  ;;  %v289_v28 = vld [vmem:[%s4990_s5 + $0x28] sm:$0xff] }
   0x6   :  { %193 = vmatpush1.bf16.msra.mxu0 %v181_v13  ;;  %3238 = vmatprep.subr.msk.bf16.mxu1 %vm73_vm0, %v63_v15  ;;  %v187_v22 = vsel %vm73_vm0, %v56_v21, 0  ;;  %v288_v27 = vld [vmem:[%s4990_s5 + $0x20] sm:$0xff]  ;;  %v3280_v29 = vld [vmem:[%s4990_s5 + $0x30] sm:$0xff]  ;;  %v3281_v30 = vld [vmem:[%s4990_s5 + $0x38] sm:$0xff] }
   0x7   :  { %296 = vperm.xlu0 %3831, %v284_v23   ;;  %306 = vperm.xlu1 %3832, %v286_v24   ;;  %v3282_v31 = vld [vmem:[%s4990_s5 + $0x40] sm:$0xff]  ;;  %v3283_v32 = vld [vmem:[%s4990_s5 + $0x48] sm:$0xff]  ;;  %v3284_v33 = vld [vmem:[%s4990_s5 + $0x50] sm:$0xff] }
   0x8   :  { %3237 = vmatmul.mubr.msk.bf16.vlgmr.msra.gmra.mrb[0].mxu1 %vm69_vm1, %v3833_v10  ;;  %v3285_v34 = vld [vmem:[%s4990_s5 + $0x58] sm:$0xff]  ;;  %v2281_v35 = vld [vmem:[%s4991_s11] sm:$0xff]  ;;  %v2282_v36 = vld [vmem:[%s4991_s11 + $0x8] sm:$0xff] }
   0x9   :  { %3242 = vmatmul.mubr.msk.bf16.vlgmr.msra.gmra.mrb[0].mxu0 %vm69_vm1, %v3834_v14  ;;  %130 = vmatpush1.bf16.msra.mxu1 %v81_v19  ;;  %v2283_v37 = vld [vmem:[%s4991_s11 + $0x10] sm:$0xff]  ;;  %v2284_v38 = vld [vmem:[%s4991_s11 + $0x18] sm:$0xff]  ;;  %v2285_v39 = vld [vmem:[%s4991_s11 + $0x20] sm:$0xff] }
   0xa   :  { %161 = vmatprep.mubr.bf16.mxu1 %v4023_v3  ;;  %3243 = vmatprep.subr.msk.bf16.mxu1 %vm73_vm0, %v57_v18  ;;  %v2286_v40 = vld [vmem:[%s4991_s11 + $0x28] sm:$0xff]  ;;  %v2287_v41 = vld [vmem:[%s4991_s11 + $0x30] sm:$0xff]  ;;  %v2288_v42 = vld [vmem:[%s4991_s11 + $0x38] sm:$0xff] }
   0xb   :  { %523 = vmatprep.mubr.bf16.mxu0 %v4023_v3  ;;  %301 = vperm.xlu0 %3831, %v285_v25   ;;  %v2289_v43 = vld [vmem:[%s4991_s11 + $0x40] sm:$0xff]  ;;  %v2290_v44 = vld [vmem:[%s4991_s11 + $0x48] sm:$0xff]  ;;  %v2291_v45 = vld [vmem:[%s4991_s11 + $0x50] sm:$0xff] }
   0xc   :  { %311 = vperm.xlu1 %3832, %v287_v26   ;;  %v2292_v46 = vld [vmem:[%s4991_s11 + $0x58] sm:$0xff]  ;;  %v3481_v47 = vld [vmem:[%s4991_s11 + $0x60] sm:$0xff]  ;;  %v3482_v48 = vld [vmem:[%s4991_s11 + $0x68] sm:$0xff] }
   0xd   :  { %v3483_v49 = vld [vmem:[%s4991_s11 + $0x70] sm:$0xff]  ;;  %v3484_v50 = vld [vmem:[%s4991_s11 + $0x78] sm:$0xff]  ;;  %v3485_v51 = vld [vmem:[%s4991_s11 + $0x80] sm:$0xff] }
   0xe   :  { %v3486_v52 = vld [vmem:[%s4991_s11 + $0x88] sm:$0xff]  ;;  %v3487_v53 = vld [vmem:[%s4991_s11 + $0x90] sm:$0xff]  ;;  %v3488_v54 = vld [vmem:[%s4991_s11 + $0x98] sm:$0xff] }
   0xf   :  { %474 = vperm.xlu0 %3831, %v288_v27   ;;  %v3489_v55 = vld [vmem:[%s4991_s11 + $0xa0] sm:$0xff]  ;;  %v3490_v56 = vld [vmem:[%s4991_s11 + $0xa8] sm:$0xff]  ;;  %v3491_v57 = vld [vmem:[%s4991_s11 + $0xb0] sm:$0xff] }
  0x10   :  { %3239 = vmatmul.mubr.msk.bf16.vlgmr.msra.gmra.mrb[4].mxu1 %vm69_vm1, %v3833_v10  ;;  %479 = vperm.xlu1 %3832, %v289_v28   ;;  %v3492_v58 = vld [vmem:[%s4991_s11 + $0xb8] sm:$0xff]  ;;  %v3835_v11 = vld [vmem:[%s4989_s3] sm:$0xff]   ;;  %v3836_v12 = vld [vmem:[%s4989_s3 + $0x8] sm:$0xff]  }
  0x11   :  { %236 = vmatpush1.bf16.msra.mxu1 %v187_v22  ;;  %267 = vmatprep.mubr.bf16.mxu1 %v4023_v3 }
  0x13   :  { %924 = vperm.xlu0 %3831, %v3280_v29  }
  0x14   :  { %929 = vperm.xlu1 %3832, %v3281_v30  }
  0x17   :  { %934 = vperm.xlu0 %3831, %v3282_v31  }
  0x18   :  { %939 = vperm.xlu1 %3832, %v3283_v32  }
  0x1b   :  { %1102 = vperm.xlu0 %3831, %v3284_v33  }
  0x1c   :  { %3244 = vmatmul.mubr.msk.bf16.vlgmr.msra.gmra.mrb[4].mxu1 %vm69_vm1, %v3834_v14  ;;  %1107 = vperm.xlu1 %3832, %v3285_v34  }
  0x1d   :  { %374 = vmatprep.mubr.bf16.mxu1 %v4023_v3 }
  0x1f   :  { %2297 = vperm.xlu0 %3831, %v2281_v35  }
  0x20   :  { %2302 = vperm.xlu1 %3832, %v2282_v36  }
  0x23   :  { %2307 = vperm.xlu0 %3831, %v2283_v37  }
  0x24   :  { %2312 = vperm.xlu1 %3832, %v2284_v38  }
  0x27   :  { %2388 = vperm.xlu0 %3831, %v2285_v39  }
  0x28   :  { %2393 = vperm.xlu1 %3832, %v2286_v40  }
  0x2b   :  { %2398 = vperm.xlu0 %3831, %v2287_v41  }
  0x2c   :  { %2403 = vperm.xlu1 %3832, %v2288_v42  }
  0x2f   :  { %2408 = vperm.xlu0 %3831, %v2289_v43  }
  0x30   :  { %2413 = vperm.xlu1 %3832, %v2290_v44  }
  0x33   :  { %2418 = vperm.xlu0 %3831, %v2291_v45  }
  0x34   :  { %2423 = vperm.xlu1 %3832, %v2292_v46  }
  0x37   :  { %2869 = vperm.xlu0 %3831, %v3481_v47  }
  0x38   :  { %2874 = vperm.xlu1 %3832, %v3482_v48  }
  0x3b   :  { %2879 = vperm.xlu0 %3831, %v3483_v49  }
  0x3c   :  { %2884 = vperm.xlu1 %3832, %v3484_v50  }
  0x3f   :  { %2960 = vperm.xlu0 %3831, %v3485_v51  }
  0x40   :  { %2965 = vperm.xlu1 %3832, %v3486_v52  }
  0x43   :  { %2970 = vperm.xlu0 %3831, %v3487_v53  }
  0x44   :  { %2975 = vperm.xlu1 %3832, %v3488_v54  }
  0x47   :  { %2980 = vperm.xlu0 %3831, %v3489_v55   ;;  %v3837_v55 = vld [vmem:[%s4992_s4] sm:$0xff]  }
  0x48   :  { %2985 = vperm.xlu1 %3832, %v3490_v56  }
  0x4b   :  { %2990 = vperm.xlu0 %3831, %v3491_v57  }
  0x4c   :  { %2995 = vperm.xlu1 %3832, %v3492_v58  }
  0x86   :  { %v297_v20 = vpop.permute.xlu0 %296  ;;  %v307_v29 = vpop.permute.xlu1 %306 }
  0x8a   :  { %v302_v24 = vpop.permute.xlu0 %301 }
  0x8b   :  { %v312_v40 = vpop.permute.xlu1 %311 }
  0xdb   :  { %v120_v59 = vpop.f32.mrb[0].mxu1 }
  0xdc   :  { %v226_v60 = vpop.f32.mrb[0].mxu0  ;;  %v122_v61 = vpop.f32.mrb[1].mxu1 }
  0xdd   :  { %v227_v62 = vadd.f32 %v226_v60, %v120_v59  ;;  %v228_v63 = vpop.f32.mrb[1].mxu0  ;;  %v124_v0 = vpop.f32.mrb[2].mxu1 }
  0xde   :  { %v229_v1 = vadd.f32 %v228_v63, %v122_v61  ;;  %v230_v2 = vpop.f32.mrb[2].mxu0  ;;  %v126_v4 = vpop.f32.mrb[3].mxu1 }
  0xdf   :  { %v290_v5 = vpack.c.bf16 %v227_v62, %v227_v62  ;;  %v4253_v6 = vadd.f32 %v230_v2, %v124_v0  ;;  %v232_v7 = vpop.f32.mrb[3].mxu0 }
  0xe0   :  { %v4255_v8 = vpack.c.bf16 %v229_v1, %v229_v1  ;;  %v4257_v9 = vadd.f32 %v232_v7, %v126_v4 }
  0xe1   :  { %v4260_v10 = vsel %vm73_vm0, %v290_v5, 0 }
  0xe2   :  { %3247 = vmatprep.subr.msk.bf16.mxu1 %vm73_vm0, %v4255_v8 }
  0xe3   :  { %343 = vmatpush1.bf16.msra.mxu1 %v4260_v10 }
  0xe6   :  { %3248 = vmatmul.mubr.msk.bf16.vlgmr.msra.gmra.mrb[8].mxu1 %vm69_vm1, %v3835_v11 }
  0xe7   :  { %384 = vmatprep.mubr.bf16.mxu1 %v4023_v3 }
  0xee   :  { %3249 = vmatmul.mubr.msk.bf16.gmra.mrb[12].mxu1 %vm69_vm1, %v3836_v12 }
  0xef   :  { %v269_v13 = vpop.f32.mrb[4].mxu1  ;;  %427 = vmatprep.mubr.bf16.mxu1 %v4023_v3 }
  0xf0   :  { %v292_v14 = vpack.c.bf16 %v269_v13, %v269_v13  ;;  %v271_v15 = vpop.f32.mrb[5].mxu1 }
  0xf1   :  { %v4275_v16 = vpack.c.bf16 %v271_v15, %v271_v15  ;;  %v4277_v17 = vpop.f32.mrb[6].mxu1 }
  0xf2   :  { %v4280_v18 = vsel %vm73_vm0, %v292_v14, 0  ;;  %v4282_v19 = vpop.f32.mrb[7].mxu1 }
  0xf3   :  { %3250 = vmatprep.subr.msk.bf16.mxu1 %vm73_vm0, %v4275_v16 }
  0xf4   :  { %396 = vmatpush1.bf16.msra.mxu1 %v4280_v18 }
  0xf7   :  { %3251 = vmatmul.mubr.msk.bf16.vlgmr.msra.gmra.mrb[16].mxu1 %vm69_vm1, %v3835_v11 }
  0xf8   :  { %437 = vmatprep.mubr.bf16.mxu1 %v4023_v3 }
  0xff   :  { %3252 = vmatmul.mubr.msk.bf16.gmra.mrb[20].mxu1 %vm69_vm1, %v3836_v12 }
 0x100   :  { %566 = vmatprep.mubr.bf16.mxu1 %v4023_v3 }
 0x1b9   :  { %v376_v21 = vpop.f32.mrb[8].mxu1 }
 0x1ba   :  { %v377_v22 = vadd.f32 %v376_v21, %v297_v20  ;;  %v378_v23 = vpop.f32.mrb[9].mxu1 }
 0x1bb   :  { %v379_v25 = vadd.f32 %v378_v23, %v297_v20  ;;  %v380_v26 = vpop.f32.mrb[10].mxu1 }
 0x1bc   :  { %v381_v27 = vadd.f32 %v380_v26, %v302_v24  ;;  %v382_v28 = vpop.f32.mrb[11].mxu1  ;;  %v448_v31 = vmax.f32 %v377_v22, 0.0  ;;  %v475_v26 = vpop.permute.xlu0 %474 }
 0x1bd   :  { %v383_v30 = vadd.f32 %v382_v28, %v302_v24  ;;  %v449_v33 = vmax.f32 %v379_v25, 0.0 }
 0x1be   :  { %v452_v32 = vmax.f32 %v381_v27, 0.0 }
 0x1bf   :  { %v453_v34 = vmax.f32 %v383_v30, 0.0  ;;  %v480_v30 = vpop.permute.xlu1 %479 }
 0x1c0   :  { %v464_v35 = vpack.c.bf16 %v452_v32, %v448_v31 }
 0x1c1   :  { %v465_v36 = vpack.c.bf16 %v453_v34, %v449_v33  ;;  %v386_v37 = vpop.f32.mrb[12].mxu1 }
 0x1c2   :  { %v387_v38 = vadd.f32 %v386_v37, %v307_v29  ;;  %v388_v39 = vpop.f32.mrb[13].mxu1 }
 0x1c3   :  { %v389_v41 = vadd.f32 %v388_v39, %v307_v29  ;;  %v390_v42 = vpop.f32.mrb[14].mxu1  ;;  %491 = vmatprep.subr.bf16.mxu0 %v465_v36 }
 0x1c4   :  { %v391_v43 = vadd.f32 %v390_v42, %v312_v40  ;;  %v392_v44 = vpop.f32.mrb[15].mxu1  ;;  %492 = vmatpush1.bf16.msra.mxu0 %v464_v35  ;;  %v456_v46 = vmax.f32 %v387_v38, 0.0 }
 0x1c5   :  { %v393_v45 = vadd.f32 %v392_v44, %v312_v40  ;;  %v457_v48 = vmax.f32 %v389_v41, 0.0 }
 0x1c6   :  { %v460_v47 = vmax.f32 %v391_v43, 0.0 }
 0x1c7   :  { %v461_v49 = vmax.f32 %v393_v45, 0.0 }
 0x1c8   :  { %v468_v50 = vpack.c.bf16 %v460_v47, %v456_v46 }
 0x1c9   :  { %v469_v51 = vpack.c.bf16 %v461_v49, %v457_v48 }
 0x1ca   :  { %v429_v52 = vpop.f32.mrb[16].mxu1 }
 0x1cb   :  { %v430_v53 = vadd.f32 %v429_v52, %v297_v20  ;;  %493 = vmatprep.subr.bf16.mxu0 %v469_v51  ;;  %v431_v54 = vpop.f32.mrb[17].mxu1 }
 0x1cc   :  { %v432_v56 = vadd.f32 %v431_v54, %v297_v20  ;;  %494 = vmatpush1.bf16.msra.mxu0 %v468_v50  ;;  %v433_v57 = vpop.f32.mrb[18].mxu1 }
 0x1cd   :  { %v434_v58 = vadd.f32 %v433_v57, %v302_v24  ;;  %v435_v59 = vpop.f32.mrb[19].mxu1  ;;  %v450_v61 = vmax.f32 %v430_v53, 0.0 }
 0x1ce   :  { %v436_v60 = vadd.f32 %v435_v59, %v302_v24  ;;  %v451_v63 = vmax.f32 %v432_v56, 0.0 }
 0x1cf   :  { %v454_v62 = vmax.f32 %v434_v58, 0.0  ;;  %3254 = vmatmul.mubr.msk.bf16.vlgmr.msra.gmra.mrb[4].mxu0 %vm487_vm2, %v3837_v55 }
 0x1d0   :  { %v455_v0 = vmax.f32 %v436_v60, 0.0  ;;  %755 = vmatprep.mubr.bf16.mxu0 %v4023_v3 }
 0x1d1   :  { %v466_v1 = vpack.c.bf16 %v454_v62, %v450_v61 }
 0x1d2   :  { %v467_v2 = vpack.c.bf16 %v455_v0, %v451_v63  ;;  %v439_v4 = vpop.f32.mrb[20].mxu1 }
 0x1d3   :  { %v440_v5 = vadd.f32 %v439_v4, %v307_v29  ;;  %v441_v7 = vpop.f32.mrb[21].mxu1 }
 0x1d4   :  { %v442_v11 = vadd.f32 %v441_v7, %v307_v29  ;;  %v443_v12 = vpop.f32.mrb[22].mxu1  ;;  %534 = vmatprep.subr.bf16.mxu1 %v467_v2 }
 0x1d5   :  { %v444_v13 = vadd.f32 %v443_v12, %v312_v40  ;;  %v445_v14 = vpop.f32.mrb[23].mxu1  ;;  %535 = vmatpush1.bf16.msra.mxu1 %v466_v1  ;;  %v458_v20 = vmax.f32 %v440_v5, 0.0 }
 0x1d6   :  { %v446_v15 = vadd.f32 %v445_v14, %v312_v40  ;;  %v459_v22 = vmax.f32 %v442_v11, 0.0 }
 0x1d7   :  { %v462_v21 = vmax.f32 %v444_v13, 0.0 }
 0x1d8   :  { %v463_v23 = vmax.f32 %v446_v15, 0.0 }
 0x1d9   :  { %v470_v24 = vpack.c.bf16 %v462_v21, %v458_v20 }
 0x1da   :  { %v471_v25 = vpack.c.bf16 %v463_v23, %v459_v22 }
 0x1dc   :  { %536 = vmatprep.subr.bf16.mxu1 %v471_v25 }
 0x1dd   :  { %537 = vmatpush1.bf16.msra.mxu1 %v470_v24 }
 0x1e0   :  { %3255 = vmatmul.mubr.msk.bf16.vlgmr.msra.gmra.mrb[24].mxu1 %vm487_vm2, %v3837_v55 }
 0x1e1   :  { %798 = vmatprep.mubr.bf16.mxu1 %v4023_v3 }
 0x2a2   :  { %v525_v27 = vpop.f32.mrb[4].mxu0 }
 0x2a3   :  { %v526_v28 = vadd.f32 %v525_v27, %v475_v26  ;;  %v527_v29 = vpop.f32.mrb[5].mxu0 }
 0x2a4   :  { %v528_v31 = vadd.f32 %v527_v29, %v475_v26  ;;  %v529_v32 = vpop.f32.mrb[6].mxu0 }
 0x2a5   :  { %v4298_v33 = vadd.f32 2.0, %v526_v28  ;;  %v530_v34 = vadd.f32 %v529_v32, %v480_v30  ;;  %v531_v35 = vpop.f32.mrb[7].mxu0 }
 0x2a6   :  { %v4300_v36 = vadd.f32 2.0, %v528_v31  ;;  %v532_v37 = vadd.f32 %v531_v35, %v480_v30 }
 0x2a7   :  { %v581_v38 = vand.u32 2147483647, %v4298_v33  ;;  %v661_v39 = vadd.f32 %v530_v34, %v4253_v6  ;;  %vm645_vm5 = vcmp.ge.f32.partialorder %v4298_v33, 0.0  ;;  %v597_v31 = vmin.f32 %v4298_v33, 0.0 }
 0x2a8   :  { %v582_v40 = vand.u32 2147483647, %v4300_v36  ;;  %v662_v41 = vadd.f32 %v532_v37, %v4257_v9  ;;  %vm646_vm6 = vcmp.ge.f32.partialorder %v4300_v36, 0.0  ;;  %v598_v37 = vmin.f32 %v4300_v36, 0.0  ;;  %v3838_v36 = vld [vmem:[%s4987_s2 + $0x8] sm:$0xff]  }
 0x2a9   :  { %v585_v42 = vsub.f32 0.0, %v581_v38 }
 0x2aa   :  { %v586_v43 = vsub.f32 0.0, %v582_v40 }
 0x2ab   :  { %v589_v44 = vmul.f32 1.442695, %v585_v42 }
 0x2ac   :  { %v591_v45 = vmul.f32 1.442695, %v586_v43 }
 0x2ad   :  { %3895 = vpow2.f32 %v589_v44 }
 0x2ae   :  { %3897 = vpow2.f32 %v591_v45 }
 0x2b3   :  { %v568_v46 = vpop.f32.mrb[24].mxu1 }
 0x2b4   :  { %v569_v47 = vadd.f32 %v568_v46, %v475_v26  ;;  %v570_v48 = vpop.f32.mrb[25].mxu1 }
 0x2b5   :  { %v571_v49 = vadd.f32 %v570_v48, %v475_v26  ;;  %v572_v50 = vpop.f32.mrb[26].mxu1 }
 0x2b6   :  { %v4306_v51 = vadd.f32 2.0, %v569_v47  ;;  %v574_v52 = vpop.f32.mrb[27].mxu1  ;;  %v573_v56 = vadd.f32 %v572_v50, %v480_v30 }
 0x2b7   :  { %v3896_v53 = vpop.eup %3895  ;;  %v4308_v6 = vadd.f32 2.0, %v571_v49  ;;  %v575_v61 = vadd.f32 %v574_v52, %v480_v30 }
 0x2b8   :  { %v3898_v54 = vpop.eup %3897  ;;  %v601_v55 = vadd.f32 1.0, %v3896_v53  ;;  %v583_v9 = vand.u32 2147483647, %v4306_v51  ;;  %v4313_v1 = vadd.f32 %v573_v56, %v4277_v17  ;;  %v649_v13 = vsel %vm645_vm5, 1.0, %v3896_v53 }
 0x2b9   :  { %v602_v57 = vadd.f32 1.0, %v3898_v54  ;;  %v584_v58 = vand.u32 2147483647, %v4308_v6  ;;  %v4318_v7 = vadd.f32 %v575_v61, %v4282_v19  ;;  %v650_v15 = vsel %vm646_vm6, 1.0, %v3898_v54 }
 0x2ba   :  { %v3256_v59 = vadd.f32 -1.0, %v601_v55  ;;  %3899 = vlog2.f32 %v601_v55  ;;  %v587_v60 = vsub.f32 0.0, %v583_v9  ;;  %vm647_vm9 = vcmp.ge.f32.partialorder %v4306_v51, 0.0  ;;  %v3839_v9 = vld [vmem:[%s4988_s1 + $0x8] sm:$0xff]  }
 0x2bb   :  { %v3257_v62 = vadd.f32 -1.0, %v602_v57  ;;  %3901 = vlog2.f32 %v602_v57  ;;  %v588_v63 = vsub.f32 0.0, %v584_v58  ;;  %vm648_vm10 = vcmp.ge.f32.partialorder %v4308_v6, 0.0 }
 0x2bc   :  { %vm609_vm3 = vcmp.eq.f32.partialorder %v3256_v59, 0.0  ;;  %3903 = vrcp.f32 %v601_v55  ;;  %v593_v0 = vmul.f32 1.442695, %v587_v60 }
 0x2bd   :  { %v613_v2 = vsel %vm609_vm3, 1.0, %v3256_v59  ;;  %vm610_vm4 = vcmp.eq.f32.partialorder %v3257_v62, 0.0  ;;  %3905 = vrcp.f32 %v602_v57  ;;  %v595_v4 = vmul.f32 1.442695, %v588_v63 }
 0x2be   :  { %3907 = vrcp.f32 %v613_v2  ;;  %v614_v5 = vsel %vm610_vm4, 1.0, %v3257_v62 }
 0x2bf   :  { %3909 = vrcp.f32 %v614_v5 }
 0x2c0   :  { %3911 = vpow2.f32 %v593_v0 }
 0x2c1   :  { %3913 = vpow2.f32 %v595_v4  ;;  %v599_v4 = vmin.f32 %v4306_v51, 0.0 }
 0x2c4   :  { %v3900_v11 = vpop.eup %3899 }
 0x2c5   :  { %v3902_v12 = vpop.eup %3901  ;;  %v618_v24 = vmul.f32 0.6931472, %v3900_v11 }
 0x2c6   :  { %v3904_v17 = vpop.eup %3903  ;;  %v620_v27 = vmul.f32 0.6931472, %v3902_v12 }
 0x2c7   :  { %v3906_v14 = vpop.eup %3905  ;;  %v657_v20 = vmul.f32 %v3904_v17, %v649_v13 }
 0x2c8   :  { %v3908_v21 = vpop.eup %3907  ;;  %v658_v22 = vmul.f32 %v3906_v14, %v650_v15 }
 0x2c9   :  { %v3910_v23 = vpop.eup %3909  ;;  %v626_v19 = vmul.f32 %v3908_v21, %v3896_v53  ;;  %v665_v25 = vmul.f32 %v661_v39, %v657_v20 }
 0x2ca   :  { %v4322_v26 = vpop.eup %3911  ;;  %v628_v28 = vmul.f32 %v3910_v23, %v3898_v54  ;;  %v666_v29 = vmul.f32 %v662_v41, %v658_v22  ;;  %v3841_v23 = vld [vmem:[%s4989_s3 + $0x18] sm:$0xff]  }
 0x2cb   :  { %v4324_v30 = vpop.eup %3913  ;;  %v633_v32 = vmul.f32 %v626_v19, %v618_v24  ;;  %v699_v34 = vpack.c.bf16 %v665_v25, %v665_v25  ;;  %v603_v35 = vadd.f32 1.0, %v4322_v26 }
 0x2cc   :  { %v634_v38 = vmul.f32 %v628_v28, %v620_v27  ;;  %v700_v40 = vpack.c.bf16 %v666_v29, %v666_v29  ;;  %v604_v42 = vadd.f32 1.0, %v4324_v30 }
 0x2cd   :  { %v637_v39 = vsel %vm609_vm3, %v3896_v53, %v633_v32  ;;  %v3258_v43 = vadd.f32 -1.0, %v603_v35  ;;  %3915 = vlog2.f32 %v603_v35  ;;  %v712_v41 = vsel %vm73_vm0, %v699_v34, 0 }
 0x2ce   :  { %v4332_v44 = vsub.f32 %v597_v31, %v637_v39  ;;  %v638_v33 = vsel %vm610_vm4, %v3898_v54, %v634_v38  ;;  %v3259_v45 = vadd.f32 -1.0, %v604_v42  ;;  %3917 = vlog2.f32 %v604_v42  ;;  %3265 = vmatprep.subr.msk.bf16.mxu0 %vm73_vm0, %v700_v40 }
 0x2cf   :  { %v4339_v46 = vsub.f32 %v598_v37, %v638_v33  ;;  %vm611_vm7 = vcmp.eq.f32.partialorder %v3258_v43, 0.0  ;;  %3919 = vrcp.f32 %v603_v35  ;;  %724 = vmatpush1.bf16.msra.mxu0 %v712_v41  ;;  %v651_v53 = vsel %vm647_vm9, 1.0, %v4322_v26  ;;  %v930_v35 = vpop.permute.xlu1 %929 }
 0x2d0   :  { %v615_v47 = vsel %vm611_vm7, 1.0, %v3258_v43  ;;  %vm612_vm8 = vcmp.eq.f32.partialorder %v3259_v45, 0.0  ;;  %3921 = vrcp.f32 %v604_v42  ;;  %3270 = vmatprep.subr.msk.bf16.mxu0 %vm73_vm0, %v4255_v8  ;;  %v652_v54 = vsel %vm648_vm10, 1.0, %v4324_v30 }
 0x2d1   :  { %3923 = vrcp.f32 %v615_v47  ;;  %v616_v48 = vsel %vm612_vm8, 1.0, %v3259_v45 }
 0x2d2   :  { %3925 = vrcp.f32 %v616_v48  ;;  %3266 = vmatmul.mubr.msk.bf16.vlgmr.msra.gmra.mrb[8].mxu0 %vm69_vm1, %v3838_v36 }
 0x2d3   :  { %818 = vmatpush1.bf16.msra.mxu0 %v4260_v10  ;;  %849 = vmatprep.mubr.bf16.mxu0 %v4023_v3 }
 0x2d7   :  { %v3916_v49 = vpop.eup %3915 }
 0x2d8   :  { %v3918_v50 = vpop.eup %3917  ;;  %v622_v58 = vmul.f32 0.6931472, %v3916_v49 }
 0x2d9   :  { %v3920_v52 = vpop.eup %3919  ;;  %v624_v61 = vmul.f32 0.6931472, %v3918_v50 }
 0x2da   :  { %v3922_v8 = vpop.eup %3921  ;;  %v659_v55 = vmul.f32 %v3920_v52, %v651_v53  ;;  %v940_v52 = vpop.permute.xlu1 %939 }
 0x2db   :  { %v3924_v10 = vpop.eup %3923  ;;  %v660_v56 = vmul.f32 %v3922_v8, %v652_v54 }
 0x2dc   :  { %v3926_v57 = vpop.eup %3925  ;;  %v630_v59 = vmul.f32 %v3924_v10, %v4322_v26  ;;  %v667_v60 = vmul.f32 %v4313_v1, %v659_v55  ;;  %v600_v1 = vmin.f32 %v4308_v6, 0.0 }
 0x2dd   :  { %v632_v62 = vmul.f32 %v3926_v57, %v4324_v30  ;;  %v668_v63 = vmul.f32 %v4318_v7, %v660_v56 }
 0x2de   :  { %v635_v0 = vmul.f32 %v630_v59, %v622_v58  ;;  %v701_v2 = vpack.c.bf16 %v667_v60, %v667_v60  ;;  %3271 = vmatmul.mubr.msk.bf16.vlgmr.msra.gmra.mrb[8].mxu0 %vm69_vm1, %v3839_v9 }
 0x2df   :  { %v636_v5 = vmul.f32 %v632_v62, %v624_v61  ;;  %v702_v11 = vpack.c.bf16 %v668_v63, %v668_v63  ;;  %1150 = vmatprep.mubr.bf16.mxu0 %v4023_v3  ;;  %v3842_v61 = vld [vmem:[%s4992_s4 + $0x8] sm:$0xff]  }
 0x2e0   :  { %v639_v12 = vsel %vm611_vm7, %v4322_v26, %v635_v0  ;;  %v718_v17 = vsel %vm73_vm0, %v701_v2, 0 }
 0x2e1   :  { %v4366_v13 = vsub.f32 %v599_v4, %v639_v12  ;;  %v640_v7 = vsel %vm612_vm8, %v4324_v30, %v636_v5  ;;  %3267 = vmatprep.subr.msk.bf16.mxu1 %vm73_vm0, %v702_v11  ;;  %v925_v30 = vpop.permute.xlu0 %924 }
 0x2e2   :  { %v4371_v14 = vsub.f32 %v600_v1, %v640_v7  ;;  %767 = vmatpush1.bf16.msra.mxu1 %v718_v17 }
 0x2e3   :  { %3272 = vmatprep.subr.msk.bf16.mxu1 %vm73_vm0, %v4275_v16 }
 0x2e5   :  { %3268 = vmatmul.mubr.msk.bf16.vlgmr.msra.gmra.mrb[28].mxu1 %vm69_vm1, %v3838_v36  ;;  %v935_v47 = vpop.permute.xlu0 %934 }
 0x2e6   :  { %861 = vmatpush1.bf16.msra.mxu1 %v4280_v18  ;;  %892 = vmatprep.mubr.bf16.mxu1 %v4023_v3  ;;  %v3840_v18 = vld [vmem:[%s4989_s3 + $0x10] sm:$0xff]  }
 0x2f1   :  { %3273 = vmatmul.mubr.msk.bf16.vlgmr.msra.gmra.mrb[28].mxu1 %vm69_vm1, %v3839_v9 }
 0x2f2   :  { %1002 = vmatprep.mubr.bf16.mxu1 %v4023_v3 }
 0x3b1   :  { %v851_v51 = vpop.f32.mrb[8].mxu0 }
 0x3b2   :  { %v4380_v6 = vpack.c.bf16 %v851_v51, %v851_v51  ;;  %v853_v15 = vpop.f32.mrb[9].mxu0 }
 0x3b3   :  { %v4382_v20 = vpack.c.bf16 %v853_v15, %v853_v15  ;;  %v4384_v21 = vpop.f32.mrb[10].mxu0 }
 0x3b4   :  { %v4388_v16 = vsel %vm73_vm0, %v4380_v6, 0  ;;  %v4390_v22 = vpop.f32.mrb[11].mxu0 }
 0x3b5   :  { %3288 = vmatprep.subr.msk.bf16.mxu1 %vm73_vm0, %v4382_v20 }
 0x3b6   :  { %971 = vmatpush1.bf16.msra.mxu1 %v4388_v16 }
 0x3b9   :  { %3289 = vmatmul.mubr.msk.bf16.vlgmr.msra.gmra.mrb[32].mxu1 %vm69_vm1, %v3840_v18 }
 0x3ba   :  { %1012 = vmatprep.mubr.bf16.mxu1 %v4023_v3 }
 0x3c1   :  { %3290 = vmatmul.mubr.msk.bf16.gmra.mrb[36].mxu1 %vm69_vm1, %v3841_v23 }
 0x3c2   :  { %1055 = vmatprep.mubr.bf16.mxu1 %v4023_v3 }
 0x3c4   :  { %v894_v24 = vpop.f32.mrb[28].mxu1 }
 0x3c5   :  { %v4405_v19 = vpack.c.bf16 %v894_v24, %v894_v24  ;;  %v896_v25 = vpop.f32.mrb[29].mxu1 }
 0x3c6   :  { %v4407_v26 = vpack.c.bf16 %v896_v25, %v896_v25  ;;  %v4409_v27 = vpop.f32.mrb[30].mxu1 }
 0x3c7   :  { %v4413_v28 = vsel %vm73_vm0, %v4405_v19, 0  ;;  %v4415_v29 = vpop.f32.mrb[31].mxu1 }
 0x3c8   :  { %3291 = vmatprep.subr.msk.bf16.mxu1 %vm73_vm0, %v4407_v26 }
 0x3c9   :  { %1024 = vmatpush1.bf16.msra.mxu1 %v4413_v28 }
 0x3cc   :  { %3292 = vmatmul.mubr.msk.bf16.vlgmr.msra.gmra.mrb[40].mxu1 %vm69_vm1, %v3840_v18 }
 0x3cd   :  { %1065 = vmatprep.mubr.bf16.mxu1 %v4023_v3 }
 0x3d4   :  { %3293 = vmatmul.mubr.msk.bf16.gmra.mrb[44].mxu1 %vm69_vm1, %v3841_v23 }
 0x3d5   :  { %1193 = vmatprep.mubr.bf16.mxu1 %v4023_v3 }
 0x48c   :  { %v1004_v31 = vpop.f32.mrb[32].mxu1 }
 0x48d   :  { %v1005_v32 = vadd.f32 %v1004_v31, %v925_v30  ;;  %v1006_v34 = vpop.f32.mrb[33].mxu1 }
 0x48e   :  { %v1007_v37 = vadd.f32 %v1006_v34, %v925_v30  ;;  %v1008_v38 = vpop.f32.mrb[34].mxu1 }
 0x48f   :  { %v1009_v40 = vadd.f32 %v1008_v38, %v930_v35  ;;  %v1010_v42 = vpop.f32.mrb[35].mxu1  ;;  %v1076_v43 = vmax.f32 %v1005_v32, 0.0 }
 0x490   :  { %v1011_v39 = vadd.f32 %v1010_v42, %v930_v35  ;;  %v1077_v33 = vmax.f32 %v1007_v37, 0.0 }
 0x491   :  { %v1080_v41 = vmax.f32 %v1009_v40, 0.0 }
 0x492   :  { %v1081_v45 = vmax.f32 %v1011_v39, 0.0 }
 0x493   :  { %v1092_v36 = vpack.c.bf16 %v1080_v41, %v1076_v43  ;;  %v3843_v41 = vld [vmem:[%s4993_s6 + $0x20] sm:$0xff]  }
 0x494   :  { %v1093_v48 = vpack.c.bf16 %v1081_v45, %v1077_v33  ;;  %v1014_v49 = vpop.f32.mrb[36].mxu1  ;;  %v1103_v33 = vpop.permute.xlu0 %1102 }
 0x495   :  { %v1015_v50 = vadd.f32 %v1014_v49, %v935_v47  ;;  %v1016_v3 = vpop.f32.mrb[37].mxu1 }
 0x496   :  { %v1017_v53 = vadd.f32 %v1016_v3, %v935_v47  ;;  %v1018_v8 = vpop.f32.mrb[38].mxu1  ;;  %1118 = vmatprep.subr.bf16.mxu0 %v1093_v48  ;;  %v1108_v48 = vpop.permute.xlu1 %1107 }
 0x497   :  { %v1019_v54 = vadd.f32 %v1018_v8, %v940_v52  ;;  %v1020_v55 = vpop.f32.mrb[39].mxu1  ;;  %1119 = vmatpush1.bf16.msra.mxu0 %v1092_v36  ;;  %v1084_v10 = vmax.f32 %v1015_v50, 0.0 }
 0x498   :  { %v1021_v9 = vadd.f32 %v1020_v55, %v940_v52  ;;  %v1085_v57 = vmax.f32 %v1017_v53, 0.0 }
 0x499   :  { %v1088_v56 = vmax.f32 %v1019_v54, 0.0 }
 0x49a   :  { %v1089_v58 = vmax.f32 %v1021_v9, 0.0 }
 0x49b   :  { %v1096_v59 = vpack.c.bf16 %v1088_v56, %v1084_v10 }
 0x49c   :  { %v1097_v60 = vpack.c.bf16 %v1089_v58, %v1085_v57 }
 0x49e   :  { %1120 = vmatprep.subr.bf16.mxu0 %v1097_v60 }
 0x49f   :  { %v1057_v62 = vpop.f32.mrb[40].mxu1  ;;  %1121 = vmatpush1.bf16.msra.mxu0 %v1096_v59 }
 0x4a0   :  { %v1058_v63 = vadd.f32 %v1057_v62, %v925_v30  ;;  %v1059_v0 = vpop.f32.mrb[41].mxu1 }
 0x4a1   :  { %v1060_v2 = vadd.f32 %v1059_v0, %v925_v30  ;;  %v1061_v4 = vpop.f32.mrb[42].mxu1 }
 0x4a2   :  { %v1062_v5 = vadd.f32 %v1061_v4, %v930_v35  ;;  %v1063_v11 = vpop.f32.mrb[43].mxu1  ;;  %3295 = vmatmul.mubr.msk.bf16.vlgmr.msra.gmra.mrb[12].mxu0 %vm487_vm2, %v3842_v61  ;;  %v1078_v1 = vmax.f32 %v1058_v63, 0.0 }
 0x4a3   :  { %v1064_v12 = vadd.f32 %v1063_v11, %v930_v35  ;;  %v1079_v7 = vmax.f32 %v1060_v2, 0.0  ;;  %3583 = vmatprep.mubr.msk.bf16.mxu0 %vm69_vm1, %v3843_v41 }
 0x4a4   :  { %v1082_v17 = vmax.f32 %v1062_v5, 0.0 }
 0x4a5   :  { %v1083_v51 = vmax.f32 %v1064_v12, 0.0 }
 0x4a6   :  { %v1094_v15 = vpack.c.bf16 %v1082_v17, %v1078_v1 }
 0x4a7   :  { %v1095_v18 = vpack.c.bf16 %v1083_v51, %v1079_v7  ;;  %v1067_v23 = vpop.f32.mrb[44].mxu1 }
 0x4a8   :  { %v1068_v24 = vadd.f32 %v1067_v23, %v935_v47  ;;  %v1069_v25 = vpop.f32.mrb[45].mxu1 }
 0x4a9   :  { %v1070_v31 = vadd.f32 %v1069_v25, %v935_v47  ;;  %v1071_v32 = vpop.f32.mrb[46].mxu1  ;;  %1161 = vmatprep.subr.bf16.mxu1 %v1095_v18 }
 0x4aa   :  { %v1072_v34 = vadd.f32 %v1071_v32, %v940_v52  ;;  %v1073_v30 = vpop.f32.mrb[47].mxu1  ;;  %1162 = vmatpush1.bf16.msra.mxu1 %v1094_v15  ;;  %v1086_v38 = vmax.f32 %v1068_v24, 0.0 }
 0x4ab   :  { %v1074_v37 = vadd.f32 %v1073_v30, %v940_v52  ;;  %v1087_v42 = vmax.f32 %v1070_v31, 0.0 }
 0x4ac   :  { %v1090_v40 = vmax.f32 %v1072_v34, 0.0 }
 0x4ad   :  { %v1091_v35 = vmax.f32 %v1074_v37, 0.0 }
 0x4ae   :  { %v1098_v39 = vpack.c.bf16 %v1090_v40, %v1086_v38  ;;  %v669_v40 = vrot.slane %v4332_v44, 4 }
 0x4af   :  { %v1099_v43 = vpack.c.bf16 %v1091_v35, %v1087_v42 }
 0x4b0   :  { %v670_v35 = vadd.f32 %v669_v40, %v4332_v44 }
 0x4b1   :  { %1163 = vmatprep.subr.bf16.mxu1 %v1099_v43 }
 0x4b2   :  { %1164 = vmatpush1.bf16.msra.mxu1 %v1098_v39  ;;  %v675_v39 = vrot.slane %v4339_v46, 4 }
 0x4b5   :  { %3296 = vmatmul.mubr.msk.bf16.vlgmr.msra.gmra.mrb[48].mxu1 %vm487_vm2, %v3842_v61 }
 0x575   :  { %v1152_v45 = vpop.f32.mrb[12].mxu0 }
 0x576   :  { %v1153_v36 = vadd.f32 %v1152_v45, %v1103_v33  ;;  %v1154_v47 = vpop.f32.mrb[13].mxu0 }
 0x577   :  { %v1155_v49 = vadd.f32 %v1154_v47, %v1103_v33  ;;  %v1156_v50 = vpop.f32.mrb[14].mxu0  ;;  %v671_v47 = vrot.slane %v670_v35, 2 }
 0x578   :  { %v4433_v3 = vadd.f32 2.0, %v1153_v36  ;;  %v1157_v52 = vadd.f32 %v1156_v50, %v1108_v48  ;;  %v1158_v53 = vpop.f32.mrb[15].mxu0 }
 0x579   :  { %v4435_v8 = vadd.f32 2.0, %v1155_v49  ;;  %v1159_v54 = vadd.f32 %v1158_v53, %v1108_v48 }
 0x57a   :  { %v1208_v55 = vand.u32 2147483647, %v4433_v3  ;;  %v4439_v9 = vadd.f32 %v1157_v52, %v4384_v21  ;;  %vm1272_vm13 = vcmp.ge.f32.partialorder %v4433_v3, 0.0  ;;  %v1224_v44 = vmin.f32 %v4433_v3, 0.0 }
 0x57b   :  { %v1209_v10 = vand.u32 2147483647, %v4435_v8  ;;  %v4443_v56 = vadd.f32 %v1159_v54, %v4390_v22  ;;  %vm1273_vm14 = vcmp.ge.f32.partialorder %v4435_v8, 0.0 }
 0x57c   :  { %v1212_v57 = vsub.f32 0.0, %v1208_v55 }
 0x57d   :  { %v1213_v58 = vsub.f32 0.0, %v1209_v10 }
 0x57e   :  { %v1216_v59 = vmul.f32 1.442695, %v1212_v57 }
 0x57f   :  { %v1218_v60 = vmul.f32 1.442695, %v1213_v58 }
 0x580   :  { %3927 = vpow2.f32 %v1216_v59 }
 0x581   :  { %3929 = vpow2.f32 %v1218_v60 }
 0x588   :  { %v1195_v61 = vpop.f32.mrb[48].mxu1 }
 0x589   :  { %v1196_v62 = vadd.f32 %v1195_v61, %v1103_v33  ;;  %v1197_v63 = vpop.f32.mrb[49].mxu1  ;;  %v1225_v61 = vmin.f32 %v4435_v8, 0.0 }
 0x58a   :  { %v4445_v0 = vpop.eup %3927  ;;  %v1198_v2 = vadd.f32 %v1197_v63, %v1103_v33  ;;  %v1199_v4 = vpop.f32.mrb[50].mxu1 }
 0x58b   :  { %v4447_v21 = vpop.eup %3929  ;;  %v1228_v5 = vadd.f32 1.0, %v4445_v0  ;;  %v4450_v11 = vadd.f32 2.0, %v1196_v62  ;;  %v1201_v22 = vpop.f32.mrb[51].mxu1  ;;  %v1200_v51 = vadd.f32 %v1199_v4, %v1108_v48  ;;  %v1276_v33 = vsel %vm1272_vm13, 1.0, %v4445_v0 }
 0x58c   :  { %v1229_v12 = vadd.f32 1.0, %v4447_v21  ;;  %v4453_v1 = vadd.f32 2.0, %v1198_v2  ;;  %v1202_v23 = vadd.f32 %v1201_v22, %v1108_v48  ;;  %v676_v48 = vadd.f32 %v675_v39, %v4339_v46  ;;  %v3844_v22 = vld [vmem:[%s4993_s6 + $0x28] sm:$0xff]  }
 0x58d   :  { %v3297_v17 = vadd.f32 -1.0, %v1228_v5  ;;  %3931 = vlog2.f32 %v1228_v5  ;;  %v1210_v7 = vand.u32 2147483647, %v4450_v11  ;;  %v4465_v37 = vadd.f32 %v1200_v51, %v4409_v27 }
 0x58e   :  { %v4456_v15 = vadd.f32 -1.0, %v1229_v12  ;;  %3933 = vlog2.f32 %v1229_v12  ;;  %v1211_v18 = vand.u32 2147483647, %v4453_v1  ;;  %v4468_v38 = vadd.f32 %v1202_v23, %v4415_v29 }
 0x58f   :  { %vm1236_vm11 = vcmp.eq.f32.partialorder %v3297_v17, 0.0  ;;  %3935 = vrcp.f32 %v1228_v5  ;;  %v1214_v24 = vsub.f32 0.0, %v1210_v7  ;;  %v1277_v29 = vsel %vm1273_vm14, 1.0, %v4447_v21 }
 0x590   :  { %v1240_v25 = vsel %vm1236_vm11, 1.0, %v3297_v17  ;;  %vm1237_vm12 = vcmp.eq.f32.partialorder %v4456_v15, 0.0  ;;  %3937 = vrcp.f32 %v1229_v12  ;;  %v1215_v31 = vsub.f32 0.0, %v1211_v18 }
 0x591   :  { %3939 = vrcp.f32 %v1240_v25  ;;  %v1241_v32 = vsel %vm1237_vm12, 1.0, %v4456_v15  ;;  %v1220_v34 = vmul.f32 1.442695, %v1214_v24  ;;  %vm1274_vm15 = vcmp.ge.f32.partialorder %v4450_v11, 0.0 }
 0x592   :  { %3941 = vrcp.f32 %v1241_v32  ;;  %v1222_v30 = vmul.f32 1.442695, %v1215_v31  ;;  %vm1275_vm3 = vcmp.ge.f32.partialorder %v4453_v1, 0.0  ;;  %v677_v17 = vrot.slane %v676_v48, 2 }
 0x593   :  { %3943 = vpow2.f32 %v1220_v34  ;;  %v672_v24 = vadd.f32 %v671_v47, %v670_v35  ;;  %v3847_v35 = vld [vmem:[%s4993_s6] sm:$0xff]  }
 0x594   :  { %3945 = vpow2.f32 %v1222_v30  ;;  %v3846_v30 = vld [vmem:[%s4993_s6 + $0x38] sm:$0xff]  }
 0x595   :  { %v673_v40 = vrot.slane %v672_v24, 1 }
 0x597   :  { %v3932_v42 = vpop.eup %3931  ;;  %v674_v47 = vadd.f32 %v673_v40, %v672_v24 }
 0x598   :  { %v3934_v43 = vpop.eup %3933  ;;  %v1245_v52 = vmul.f32 0.6931472, %v3932_v42 }
 0x599   :  { %v3936_v41 = vpop.eup %3935  ;;  %v1247_v10 = vmul.f32 0.6931472, %v3934_v43  ;;  %v681_v43 = vrot.slane %v4366_v13, 4 }
 0x59a   :  { %v3938_v27 = vpop.eup %3937  ;;  %v1284_v45 = vmul.f32 %v3936_v41, %v1276_v33 }
 0x59b   :  { %v3940_v36 = vpop.eup %3939  ;;  %v1285_v49 = vmul.f32 %v3938_v27, %v1277_v29 }
 0x59c   :  { %v3942_v50 = vpop.eup %3941  ;;  %v1253_v53 = vmul.f32 %v3940_v36, %v4445_v0  ;;  %v1292_v54 = vmul.f32 %v4439_v9, %v1284_v45 }
 0x59d   :  { %v4482_v55 = vpop.eup %3943  ;;  %v1255_v57 = vmul.f32 %v3942_v50, %v4447_v21  ;;  %v4486_v58 = vmul.f32 %v4443_v56, %v1285_v49 }
 0x59e   :  { %v4489_v46 = vpop.eup %3945  ;;  %v1260_v3 = vmul.f32 %v1253_v53, %v1245_v52  ;;  %v1375_v59 = vpack.c.bf16 %v1292_v54, %v1292_v54  ;;  %v1230_v60 = vadd.f32 1.0, %v4482_v55  ;;  %v1278_v9 = vsel %vm1274_vm15, 1.0, %v4482_v55 }
 0x59f   :  { %v1261_v62 = vmul.f32 %v1255_v57, %v1247_v10  ;;  %v1231_v63 = vadd.f32 1.0, %v4489_v46  ;;  %v1279_v2 = vsel %vm1275_vm3, 1.0, %v4489_v46  ;;  %v682_v53 = vadd.f32 %v681_v43, %v4366_v13  ;;  %v3848_v13 = vld [vmem:[%s4993_s6 + $0x8] sm:$0xff]  }
 0x5a0   :  { %v1264_v56 = vsel %vm1236_vm11, %v4445_v0, %v1260_v3  ;;  %v4498_v4 = vadd.f32 -1.0, %v1230_v60  ;;  %3947 = vlog2.f32 %v1230_v60  ;;  %3821 = vmatprep.subr.msk.bf16.mxu0 %vm73_vm0, %v1375_v59  ;;  %v1409_v5 = vsel %vm73_vm0, %v1375_v59, 0  ;;  %v3845_v0 = vld [vmem:[%s4993_s6 + $0x30] sm:$0xff]  }
 0x5a1   :  { %v1268_v8 = vsub.f32 %v1224_v44, %v1264_v56  ;;  %v1265_v12 = vsel %vm1237_vm12, %v4447_v21, %v1261_v62  ;;  %v4508_v7 = vadd.f32 -1.0, %v1231_v63  ;;  %3949 = vlog2.f32 %v1231_v63  ;;  %3582 = vmatpush3.bf16.msra.mxu0 %v1409_v5 }
 0x5a2   :  { %v1269_v51 = vsub.f32 %v1225_v61, %v1265_v12  ;;  %vm1238_vm4 = vcmp.eq.f32.partialorder %v4498_v4, 0.0  ;;  %3951 = vrcp.f32 %v1230_v60  ;;  %3822 = vmatprep.subr.msk.bf16.mxu0 %vm73_vm0, %v4380_v6  ;;  %v678_v6 = vadd.f32 %v677_v17, %v676_v48 }
 0x5a3   :  { %v1296_v18 = vrot.slane %v1268_v8, 4  ;;  %v1242_v21 = vsel %vm1238_vm4, 1.0, %v4498_v4  ;;  %vm1239_vm5 = vcmp.eq.f32.partialorder %v4508_v7, 0.0  ;;  %3953 = vrcp.f32 %v1231_v63 }
 0x5a4   :  { %v1302_v15 = vrot.slane %v1269_v51, 4  ;;  %3955 = vrcp.f32 %v1242_v21  ;;  %v1243_v23 = vsel %vm1239_vm5, 1.0, %v4508_v7  ;;  %3584 = vmatmul.mubr.msk.bf16.vlgmr.msra.gmra.mrb[16].mxu0 %vm69_vm1, %v3844_v22  ;;  %v679_v39 = vrot.slane %v678_v6, 1 }
 0x5a5   :  { %v1297_v25 = vadd.f32 %v1296_v18, %v1268_v8  ;;  %3957 = vrcp.f32 %v1243_v23  ;;  %3592 = vmatpush3.bf16.msra.mxu0 %v4388_v16  ;;  %3587 = vmatprep.mubr.msk.bf16.mxu0 %vm69_vm1, %v3845_v0  ;;  %v687_v48 = vrot.slane %v4371_v14, 4  ;;  %v1226_v8 = vmin.f32 %v4450_v11, 0.0 }
 0x5a6   :  { %v1303_v31 = vadd.f32 %v1302_v15, %v1269_v51  ;;  %3823 = vmatprep.subr.msk.bf16.mxu0 %vm73_vm0, %v4382_v20  ;;  %v680_v52 = vadd.f32 %v679_v39, %v678_v6  ;;  %v683_v0 = vrot.slane %v682_v53, 2  ;;  %v1227_v17 = vmin.f32 %v4453_v1, 0.0 }
 0x5a7   :  { %v1298_v32 = vrot.slane %v1297_v25, 2  ;;  %v962_v11 = vsel %vm73_vm0, %v4382_v20, 0  ;;  %v3851_v20 = vld [vmem:[%s4993_s6 + $0x40] sm:$0xff]  }
 0x5a8   :  { %v1304_v34 = vrot.slane %v1303_v31, 2 }
 0x5a9   :  { %v1299_v42 = vadd.f32 %v1298_v32, %v1297_v25  ;;  %v4024_v25 = vmov 1966171168  }
 0x5aa   :  { %v3948_v16 = vpop.eup %3947  ;;  %v1305_v41 = vadd.f32 %v1304_v34, %v1303_v31  ;;  %v1331_v6 = vunpack.c.l.s4 %v4024_v25  ;;  %v1333_v31 = vlaneseq }
 0x5ab   :  { %v3950_v33 = vpop.eup %3949  ;;  %v1300_v27 = vrot.slane %v1299_v42, 1  ;;  %v1249_v59 = vmul.f32 0.6931472, %v3948_v16 }
 0x5ac   :  { %v3952_v29 = vpop.eup %3951  ;;  %v1306_v45 = vrot.slane %v1305_v41, 1  ;;  %3588 = vmatmul.mubr.msk.bf16.gmra.mrb[20].mxu0 %vm69_vm1, %v3846_v30  ;;  %v1332_v16 = vunpack.c.0.s8 %v1331_v6  ;;  %v1334_v39 = vshrl.u32 %v1333_v31, 7  ;;  %vm1355_vm6 = vcmp.lt.s32.totalorder %v1333_v31, 512 }
 0x5ad   :  { %v3954_v36 = vpop.eup %3953  ;;  %v1301_v44 = vadd.f32 %v1300_v27, %v1299_v42  ;;  %v1286_v49 = vmul.f32 %v3952_v29, %v1278_v9  ;;  %3593 = vmatprep.mubr.msk.bf16.mxu0 %vm69_vm1, %v3847_v35  ;;  %v1251_v9 = vmul.f32 0.6931472, %v3950_v33  ;;  %v3852_v27 = vld [vmem:[%s4993_s6 + $0x48] sm:$0xff]  }
 0x5ae   :  { %v3956_v50 = vpop.eup %3955  ;;  %v1307_v54 = vadd.f32 %v1306_v45, %v1305_v41  ;;  %v1287_v10 = vmul.f32 %v3954_v36, %v1279_v2  ;;  %v688_v2 = vadd.f32 %v687_v48, %v4371_v14  ;;  %v1696_v14 = vpack.c.bf16 %v4486_v58, %v4486_v58  ;;  %v3853_v36 = vld [vmem:[%s4993_s6 + $0x50] sm:$0xff]  }
 0x5af   :  { %v3958_v57 = vpop.eup %3957  ;;  %v4539_v3 = vadd.f32 %v1301_v44, %v674_v47  ;;  %v1257_v60 = vmul.f32 %v3956_v50, %v4482_v55  ;;  %v4543_v61 = vmul.f32 %v4465_v37, %v1286_v49  ;;  %v3849_v37 = vld [vmem:[%s4993_s6 + $0x10] sm:$0xff]   ;;  %v684_v58 = vadd.f32 %v683_v0, %v682_v53  ;;  %v3867_v0 = vld [vmem:[%s4993_s6 + $0xc0] sm:$0xff]  }
 0x5b0   :  { %v4545_v62 = vadd.f32 %v1307_v54, %v680_v52  ;;  %v1259_v63 = vmul.f32 %v3958_v57, %v4489_v46  ;;  %v4549_v56 = vmul.f32 %v4468_v38, %v1287_v10  ;;  %v689_v21 = vrot.slane %v688_v2, 2  ;;  %v3854_v54 = vld [vmem:[%s4993_s6 + $0x58] sm:$0xff]   ;;  %v3855_v57 = vld [vmem:[%s4993_s6 + $0x60] sm:$0xff]  }
 0x5b1   :  { %v1262_v5 = vmul.f32 %v1257_v60, %v1249_v59  ;;  %v685_v34 = vrot.slane %v684_v58, 1  ;;  %v1335_v48 = vsub.s32 %v1332_v16, %v1334_v39  ;;  %v1730_v49 = vsel %vm73_vm0, %v1696_v14, 0  ;;  %v3857_v59 = vld [vmem:[%s4993_s6 + $0x70] sm:$0xff]  }
 0x5b2   :  { %v1328_v22 = vcombine.low %v4539_v3, %v4545_v62  ;;  %v1263_v12 = vmul.f32 %v1259_v63, %v1251_v9  ;;  %v690_v7 = vadd.f32 %v689_v21, %v688_v2  ;;  %v1928_v60 = vpack.c.bf16 %v4543_v61, %v4543_v61  ;;  %v3858_v62 = vld [vmem:[%s4993_s6 + $0x78] sm:$0xff]   ;;  %v3859_v9 = vld [vmem:[%s4993_s6 + $0x80] sm:$0xff]   ;;  %v3861_v61 = vld [vmem:[%s4993_s6 + $0x90] sm:$0xff]  }
 0x5b3   :  { %v1266_v38 = vsel %vm1238_vm4, %v4482_v55, %v1262_v5  ;;  %v686_v41 = vadd.f32 %v685_v34, %v684_v58  ;;  %v3863_v2 = vld [vmem:[%s4993_s6 + $0xa0] sm:$0xff]   ;;  %v3864_v5 = vld [vmem:[%s4993_s6 + $0xa8] sm:$0xff]  }
 0x5b4   :  { %v1270_v51 = vsub.f32 %v1226_v8, %v1266_v38  ;;  %v1267_v18 = vsel %vm1239_vm5, %v4489_v46, %v1263_v12  ;;  %3594 = vmatmul.mubr.msk.bf16.vlgmr.msra.gmra.mrb[16].mxu0 %vm69_vm1, %v3848_v13  ;;  %v3850_v46 = vld [vmem:[%s4993_s6 + $0x18] sm:$0xff]   ;;  %v691_v40 = vrot.slane %v690_v7, 1  ;;  %v1336_v52 = vrot.slane %v1328_v22, %v1335_v48 }
 0x5b5   :  { %v1271_v15 = vsub.f32 %v1227_v17, %v1267_v18  ;;  %3602 = vmatpush3.bf16.msra.mxu0 %v962_v11  ;;  %3597 = vmatprep.mubr.msk.bf16.mxu0 %vm69_vm1, %v3849_v37  ;;  %v1962_v63 = vsel %vm73_vm0, %v1928_v60, 0  ;;  %v3862_v13 = vld [vmem:[%s4993_s6 + $0x98] sm:$0xff]   ;;  %v3865_v37 = vld [vmem:[%s4993_s6 + $0xb0] sm:$0xff]   ;;  %v2160_v22 = vpack.c.bf16 %v4549_v56, %v4549_v56  ;;  %v968_v8 = vsel %vm73_vm0, %v4407_v26, 0  ;;  %v3873_v18 = vld [vmem:[%s4995_s9] sm:$0xff]  }
 0x5b6   :  { %v1308_v55 = vrot.slane %v1270_v51, 4  ;;  %3824 = vmatprep.subr.msk.bf16.mxu0 %vm73_vm0, %v1696_v14  ;;  %v692_v29 = vadd.f32 %v691_v40, %v690_v7  ;;  %v3866_v12 = vld [vmem:[%s4993_s6 + $0xb8] sm:$0xff]   ;;  %v3869_v56 = vld [vmem:[%s4993_s6 + $0xd0] sm:$0xff]   ;;  %v3871_v14 = vld [vmem:[%s4993_s6 + $0xe0] sm:$0xff]   ;;  %3665 = vmatprep.mubr.msk.bf16.mxu1 %vm487_vm2, %v3873_v18 }
 0x5b7   :  { %v1314_v1 = vrot.slane %v1271_v15, 4  ;;  %v2194_v38 = vsel %vm73_vm0, %v2160_v22, 0  ;;  %v3870_v17 = vld [vmem:[%s4993_s6 + $0xd8] sm:$0xff]  }
 0x5b8   :  { %v1309_v4 = vadd.f32 %v1308_v55, %v1270_v51  ;;  %v3872_v51 = vld [vmem:[%s4993_s6 + $0xe8] sm:$0xff]   ;;  %v3876_v7 = vld [vmem:[%s4993_s6 + $0xf8] sm:$0xff]  }
 0x5b9   :  { %v1315_v23 = vadd.f32 %v1314_v1, %v1271_v15 }
 0x5ba   :  { %v1310_v24 = vrot.slane %v1309_v4, 2 }
 0x5bb   :  { %v1316_v32 = vrot.slane %v1315_v23, 2 }
 0x5bc   :  { %v1311_v30 = vadd.f32 %v1310_v24, %v1309_v4  ;;  %3598 = vmatmul.mubr.msk.bf16.gmra.mrb[20].mxu0 %vm69_vm1, %v3850_v46  ;;  %v3874_v4 = vld [vmem:[%s4995_s9 + $0x8] sm:$0xff]   ;;  %v3875_v46 = vld [vmem:[%s4993_s6 + $0xf0] sm:$0xff]   ;;  %v2303_v24 = vpop.permute.xlu1 %2302 }
 0x5bd   :  { %v1317_v42 = vadd.f32 %v1316_v32, %v1315_v23  ;;  %3603 = vmatprep.mubr.msk.bf16.mxu0 %vm69_vm1, %v3851_v20  ;;  %v3877_v23 = vld [vmem:[%s4996_s10] sm:$0xff]   ;;  %v2298_v20 = vpop.permute.xlu0 %2297 }
 0x5be   :  { %v1312_v35 = vrot.slane %v1311_v30, 1 }
 0x5bf   :  { %v1318_v43 = vrot.slane %v1317_v42, 1 }
 0x5c0   :  { %v1313_v33 = vadd.f32 %v1312_v35, %v1311_v30  ;;  %v2313_v34 = vpop.permute.xlu1 %2312 }
 0x5c1   :  { %v1319_v45 = vadd.f32 %v1318_v43, %v1317_v42  ;;  %v2308_v25 = vpop.permute.xlu0 %2307 }
 0x5c2   :  { %v1322_v47 = vadd.f32 %v1313_v33, %v686_v41 }
 0x5c3   :  { %v1323_v44 = vadd.f32 %v1319_v45, %v692_v29  ;;  %v3878_v45 = vld [vmem:[%s4996_s10 + $0x8] sm:$0xff]  }
 0x5c4   :  { %3604 = vmatmul.mubr.msk.bf16.vlgmr.msra.gmra.mrb[16].mxu0 %vm69_vm1, %v3852_v27 }
 0x5c5   :  { %v1329_v50 = vcombine.low %v1322_v47, %v1323_v44  ;;  %3612 = vmatpush3.bf16.msra.mxu0 %v1730_v49  ;;  %3607 = vmatprep.mubr.msk.bf16.mxu0 %vm69_vm1, %v3853_v36  ;;  %v3879_v36 = vld [vmem:[%s4996_s10 + $0x10] sm:$0xff]   ;;  %v3880_v47 = vld [vmem:[%s4996_s10 + $0x18] sm:$0xff]   ;;  %v2389_v44 = vpop.permute.xlu0 %2388  ;;  %v2394_v49 = vpop.permute.xlu1 %2393 }
 0x5c6   :  { %3825 = vmatprep.subr.msk.bf16.mxu0 %vm73_vm0, %v4405_v19  ;;  %v3856_v19 = vld [vmem:[%s4993_s6 + $0x68] sm:$0xff]  }
 0x5c7   :  { %v1343_v53 = vrot.slane %v1329_v50, %v1335_v48 }
 0x5c9   :  { %v1344_v10 = vcombine.low %v1336_v52, %v1343_v53  ;;  %v2399_v50 = vpop.permute.xlu0 %2398 }
 0x5cb   :  { %v1351_v3 = vrot.slane %v1344_v10, %v1335_v48  ;;  %v3881_v48 = vld [vmem:[%s4997_s8 + $0x20] sm:$0xff]   ;;  %v2404_v10 = vpop.permute.xlu1 %2403 }
 0x5cc   :  { %3608 = vmatmul.mubr.msk.bf16.gmra.mrb[20].mxu0 %vm69_vm1, %v3854_v54 }
 0x5cd   :  { %1357 = vst.msk [vmem:[%s4994_s12] sm:$0xf] %vm1355_vm6, %v1351_v3  ;;  %3613 = vmatprep.mubr.msk.bf16.mxu0 %vm69_vm1, %v3855_v57 }
 0x5d4   :  { %3614 = vmatmul.mubr.msk.bf16.vlgmr.msra.gmra.mrb[16].mxu0 %vm69_vm1, %v3856_v19 }
 0x5d5   :  { %3622 = vmatpush3.bf16.msra.mxu0 %v4413_v28  ;;  %3617 = vmatprep.mubr.msk.bf16.mxu0 %vm69_vm1, %v3857_v59  ;;  %v3860_v28 = vld [vmem:[%s4993_s6 + $0x88] sm:$0xff]  }
 0x5d6   :  { %3826 = vmatprep.subr.msk.bf16.mxu0 %vm73_vm0, %v1928_v60 }
 0x5dc   :  { %3618 = vmatmul.mubr.msk.bf16.gmra.mrb[20].mxu0 %vm69_vm1, %v3858_v62 }
 0x5dd   :  { %3623 = vmatprep.mubr.msk.bf16.mxu0 %vm69_vm1, %v3859_v9 }
 0x5e4   :  { %3624 = vmatmul.mubr.msk.bf16.vlgmr.msra.gmra.mrb[16].mxu0 %vm69_vm1, %v3860_v28 }
 0x5e5   :  { %3632 = vmatpush3.bf16.msra.mxu0 %v1962_v63  ;;  %3627 = vmatprep.mubr.msk.bf16.mxu0 %vm69_vm1, %v3861_v61 }
 0x5e6   :  { %3827 = vmatprep.subr.msk.bf16.mxu0 %vm73_vm0, %v4407_v26  ;;  %v3868_v26 = vld [vmem:[%s4993_s6 + $0xc8] sm:$0xff]  }
 0x5ec   :  { %3628 = vmatmul.mubr.msk.bf16.gmra.mrb[20].mxu0 %vm69_vm1, %v3862_v13 }
 0x5ed   :  { %3633 = vmatprep.mubr.msk.bf16.mxu0 %vm69_vm1, %v3863_v2 }
 0x5f4   :  { %3634 = vmatmul.mubr.msk.bf16.vlgmr.msra.gmra.mrb[16].mxu0 %vm69_vm1, %v3864_v5 }
 0x5f5   :  { %3642 = vmatpush3.bf16.msra.mxu0 %v968_v8  ;;  %3637 = vmatprep.mubr.msk.bf16.mxu0 %vm69_vm1, %v3865_v37 }
 0x5f6   :  { %3828 = vmatprep.subr.msk.bf16.mxu0 %vm73_vm0, %v2160_v22 }
 0x5fc   :  { %3638 = vmatmul.mubr.msk.bf16.gmra.mrb[20].mxu0 %vm69_vm1, %v3866_v12 }
 0x5fd   :  { %3643 = vmatprep.mubr.msk.bf16.mxu0 %vm69_vm1, %v3867_v0 }
 0x604   :  { %3644 = vmatmul.mubr.msk.bf16.vlgmr.msra.gmra.mrb[16].mxu0 %vm69_vm1, %v3868_v26 }
 0x605   :  { %3652 = vmatpush3.bf16.msra.mxu0 %v2194_v38  ;;  %3647 = vmatprep.mubr.msk.bf16.mxu0 %vm69_vm1, %v3869_v56 }
 0x60c   :  { %3648 = vmatmul.mubr.msk.bf16.gmra.mrb[20].mxu0 %vm69_vm1, %v3870_v17 }
 0x60d   :  { %3653 = vmatprep.mubr.msk.bf16.mxu0 %vm69_vm1, %v3871_v14 }
 0x614   :  { %3654 = vmatmul.mubr.msk.bf16.vlgmr.msra.gmra.mrb[16].mxu0 %vm69_vm1, %v3872_v51 }
 0x615   :  { %3657 = vmatprep.mubr.msk.bf16.mxu0 %vm69_vm1, %v3875_v46 }
 0x61c   :  { %3658 = vmatmul.mubr.msk.bf16.gmra.mrb[20].mxu0 %vm69_vm1, %v3876_v7 }
 0x61d   :  { %3673 = vmatprep.mubr.msk.bf16.mxu0 %vm487_vm2, %v3877_v23 }
 0x6e7   :  { %v3655_v11 = vpop.f32.mrb[16].mxu0 }
 0x6e8   :  { %v2230_v21 = vpop.f32.mrb[17].mxu0 }
 0x6e9   :  { %v3656_v15 = vpop.f32.mrb[18].mxu0 }
 0x6ea   :  { %v4690_v55 = vpack.c.bf16 %v3656_v15, %v3655_v11  ;;  %v2233_v1 = vpop.f32.mrb[19].mxu0 }
 0x6eb   :  { %v4692_v58 = vpack.c.bf16 %v2233_v1, %v2230_v21 }
 0x6ed   :  { %3661 = vmatprep.subr.bf16.mxu1 %v4692_v58 }
 0x6ee   :  { %3662 = vmatpush3.bf16.msra.mxu1 %v4692_v58 }
 0x6ef   :  { %3663 = vmatprep.subr.bf16.mxu1 %v4690_v55 }
 0x6f2   :  { %3664 = vmatpush3.bf16.msra.mxu1 %v4690_v55 }
 0x6f5   :  { %3666 = vmatmul.mubr.msk.bf16.vlgmr.msra.gmra.mrb[52].mxu1 %vm487_vm2, %v3874_v4 }
 0x6f6   :  { %3685 = vmatprep.mubr.msk.bf16.mxu1 %vm487_vm2, %v3881_v48 }
 0x7c8   :  { %v3667_v6 = vpop.f32.mrb[52].mxu1 }
 0x7c9   :  { %v2374_v31 = vadd.f32 %v3667_v6, %v2308_v25  ;;  %v2365_v32 = vpop.f32.mrb[53].mxu1 }
 0x7ca   :  { %v2366_v30 = vadd.f32 %v2365_v32, %v2298_v20  ;;  %v3668_v40 = vpop.f32.mrb[54].mxu1 }
 0x7cb   :  { %v2377_v42 = vadd.f32 %v3668_v40, %v2313_v34  ;;  %v2368_v35 = vpop.f32.mrb[55].mxu1  ;;  %v2382_v39 = vmax.f32 %v2374_v31, 0.0  ;;  %v2409_v40 = vpop.permute.xlu0 %2408 }
 0x7cc   :  { %v2369_v16 = vadd.f32 %v2368_v35, %v2303_v24  ;;  %v2380_v41 = vmax.f32 %v2366_v30, 0.0 }
 0x7cd   :  { %v2383_v43 = vmax.f32 %v2377_v42, 0.0  ;;  %v2414_v42 = vpop.permute.xlu1 %2413 }
 0x7ce   :  { %v2381_v33 = vmax.f32 %v2369_v16, 0.0 }
 0x7cf   :  { %v2385_v27 = vpack.c.bf16 %v2383_v43, %v2382_v39 }
 0x7d0   :  { %v2384_v29 = vpack.c.bf16 %v2381_v33, %v2380_v41  ;;  %v2419_v33 = vpop.permute.xlu0 %2418 }
 0x7d2   :  { %3669 = vmatprep.subr.bf16.mxu0 %v2384_v29 }
 0x7d3   :  { %3670 = vmatpush3.bf16.msra.mxu0 %v2384_v29 }
 0x7d4   :  { %3671 = vmatprep.subr.bf16.mxu0 %v2385_v27 }
 0x7d7   :  { %3672 = vmatpush3.bf16.msra.mxu0 %v2385_v27 }
 0x7da   :  { %3674 = vmatmul.mubr.msk.bf16.vlgmr.msra.gmra.mrb[24].mxu0 %vm487_vm2, %v3878_v45 }
 0x7db   :  { %3677 = vmatprep.mubr.msk.bf16.mxu0 %vm487_vm2, %v3879_v36  ;;  %v2424_v36 = vpop.permute.xlu1 %2423 }
 0x7e2   :  { %3678 = vmatmul.mubr.msk.bf16.gmra.mrb[20].mxu0 %vm487_vm2, %v3880_v47 }
 0x8ad   :  { %v3675_v52 = vpop.f32.mrb[24].mxu0 }
 0x8ae   :  { %v2501_v53 = vadd.f32 %v3675_v52, %v2399_v50  ;;  %v2492_v54 = vpop.f32.mrb[25].mxu0 }
 0x8af   :  { %v2493_v57 = vadd.f32 %v2492_v54, %v2389_v44  ;;  %v3676_v3 = vpop.f32.mrb[26].mxu0 }
 0x8b0   :  { %v4730_v19 = vadd.f32 2.0, %v2501_v53  ;;  %v2504_v59 = vadd.f32 %v3676_v3, %v2404_v10  ;;  %v2495_v60 = vpop.f32.mrb[27].mxu0 }
 0x8b1   :  { %v4732_v62 = vadd.f32 2.0, %v2493_v57  ;;  %v2496_v9 = vadd.f32 %v2495_v60, %v2394_v49 }
 0x8b2   :  { %v2529_v28 = vand.u32 2147483647, %v4730_v19  ;;  %v4735_v61 = vadd.f32 2.0, %v2504_v59  ;;  %v2545_v43 = vmin.f32 %v4730_v19, 0.0  ;;  %vm2593_vm9 = vcmp.ge.f32.partialorder %v4730_v19, 0.0 }
 0x8b3   :  { %v2527_v63 = vand.u32 2147483647, %v4732_v62  ;;  %v4738_v13 = vadd.f32 2.0, %v2496_v9  ;;  %v2543_v27 = vmin.f32 %v4732_v62, 0.0  ;;  %vm2591_vm10 = vcmp.ge.f32.partialorder %v4732_v62, 0.0 }
 0x8b4   :  { %v2533_v2 = vsub.f32 0.0, %v2529_v28  ;;  %v2530_v5 = vand.u32 2147483647, %v4735_v61  ;;  %v2546_v29 = vmin.f32 %v4735_v61, 0.0  ;;  %vm2594_vm11 = vcmp.ge.f32.partialorder %v4735_v61, 0.0 }
 0x8b5   :  { %v2531_v37 = vsub.f32 0.0, %v2527_v63  ;;  %v2528_v22 = vand.u32 2147483647, %v4738_v13  ;;  %v4742_v8 = vpop.f32.mrb[20].mxu0  ;;  %v2544_v47 = vmin.f32 %v4738_v13, 0.0  ;;  %vm2592_vm12 = vcmp.ge.f32.partialorder %v4738_v13, 0.0 }
 0x8b6   :  { %v2539_v12 = vmul.f32 1.442695, %v2533_v2  ;;  %v2534_v0 = vsub.f32 0.0, %v2530_v5  ;;  %v4744_v26 = vpop.f32.mrb[21].mxu0  ;;  %v2517_v48 = vadd.f32 %v4742_v8, %v2419_v33 }
 0x8b7   :  { %v2535_v56 = vmul.f32 1.442695, %v2531_v37  ;;  %v2532_v38 = vsub.f32 0.0, %v2528_v22  ;;  %v3680_v17 = vpop.f32.mrb[22].mxu0  ;;  %v2509_v52 = vadd.f32 %v4744_v26, %v2409_v40 }
 0x8b8   :  { %3959 = vpow2.f32 %v2539_v12  ;;  %v2541_v14 = vmul.f32 1.442695, %v2534_v0  ;;  %v4746_v51 = vpop.f32.mrb[23].mxu0  ;;  %v2520_v53 = vadd.f32 %v3680_v17, %v2424_v36 }
 0x8b9   :  { %3961 = vpow2.f32 %v2535_v56  ;;  %v2537_v18 = vmul.f32 1.442695, %v2532_v38  ;;  %v2512_v59 = vadd.f32 %v4746_v51, %v2414_v42 }
 0x8ba   :  { %3963 = vpow2.f32 %v2541_v14 }
 0x8bb   :  { %3965 = vpow2.f32 %v2537_v18 }
 0x8c2   :  { %v4748_v11 = vpop.eup %3959 }
 0x8c3   :  { %v4750_v21 = vpop.eup %3961  ;;  %v2549_v15 = vadd.f32 1.0, %v4748_v11  ;;  %v2597_v3 = vsel %vm2593_vm9, 1.0, %v4748_v11 }
 0x8c4   :  { %v4753_v1 = vpop.eup %3963  ;;  %v2547_v4 = vadd.f32 1.0, %v4750_v21  ;;  %v2595_v2 = vsel %vm2591_vm10, 1.0, %v4750_v21 }
 0x8c5   :  { %v4756_v46 = vpop.eup %3965  ;;  %v4758_v7 = vadd.f32 -1.0, %v2549_v15  ;;  %3967 = vlog2.f32 %v2549_v15  ;;  %v2550_v23 = vadd.f32 1.0, %v4753_v1  ;;  %v2598_v19 = vsel %vm2594_vm11, 1.0, %v4753_v1 }
 0x8c6   :  { %v4761_v20 = vadd.f32 -1.0, %v2547_v4  ;;  %3969 = vlog2.f32 %v2547_v4  ;;  %v2548_v24 = vadd.f32 1.0, %v4756_v46  ;;  %v2596_v62 = vsel %vm2592_vm12, 1.0, %v4756_v46 }
 0x8c7   :  { %vm2557_vm0 = vcmp.eq.f32.partialorder %v4758_v7, 0.0  ;;  %v4765_v25 = vadd.f32 -1.0, %v2550_v23  ;;  %3971 = vlog2.f32 %v2550_v23 }
 0x8c8   :  { %v2561_v6 = vsel %vm2557_vm0, 1.0, %v4758_v7  ;;  %vm2555_vm1 = vcmp.eq.f32.partialorder %v4761_v20, 0.0  ;;  %v4771_v31 = vadd.f32 -1.0, %v2548_v24  ;;  %3973 = vlog2.f32 %v2548_v24 }
 0x8c9   :  { %3975 = vrcp.f32 %v2561_v6  ;;  %v2559_v32 = vsel %vm2555_vm1, 1.0, %v4761_v20  ;;  %vm2558_vm7 = vcmp.eq.f32.partialorder %v4765_v25, 0.0 }
 0x8ca   :  { %3977 = vrcp.f32 %v2559_v32  ;;  %v2562_v34 = vsel %vm2558_vm7, 1.0, %v4765_v25  ;;  %vm2556_vm8 = vcmp.eq.f32.partialorder %v4771_v31, 0.0  ;;  %v3884_v25 = vld [vmem:[%s4997_s8 + $0x38] sm:$0xff]  }
 0x8cb   :  { %3979 = vrcp.f32 %v2562_v34  ;;  %v2560_v30 = vsel %vm2556_vm8, 1.0, %v4771_v31  ;;  %v3885_v31 = vld [vmem:[%s4998_s7 + $0x20] sm:$0xff]  }
 0x8cc   :  { %3981 = vrcp.f32 %v2560_v30 }
 0x8cd   :  { %3983 = vrcp.f32 %v2549_v15 }
 0x8ce   :  { %3985 = vrcp.f32 %v2547_v4 }
 0x8cf   :  { %v3968_v35 = vpop.eup %3967  ;;  %3987 = vrcp.f32 %v2550_v23 }
 0x8d0   :  { %v3970_v16 = vpop.eup %3969  ;;  %3989 = vrcp.f32 %v2548_v24  ;;  %v2568_v49 = vmul.f32 0.6931472, %v3968_v35 }
 0x8d1   :  { %v3972_v39 = vpop.eup %3971  ;;  %v2564_v10 = vmul.f32 0.6931472, %v3970_v16  ;;  %v3887_v16 = vld [vmem:[%s4998_s7 + $0x30] sm:$0xff]  }
 0x8d2   :  { %v3974_v41 = vpop.eup %3973  ;;  %v2570_v28 = vmul.f32 0.6931472, %v3972_v39  ;;  %v3889_v39 = vld [vmem:[%s4995_s9 + $0x10] sm:$0xff]  }
 0x8d3   :  { %v3976_v45 = vpop.eup %3975  ;;  %v2566_v22 = vmul.f32 0.6931472, %v3974_v41 }
 0x8d4   :  { %v3978_v44 = vpop.eup %3977  ;;  %v2576_v50 = vmul.f32 %v3976_v45, %v4748_v11 }
 0x8d5   :  { %v3980_v54 = vpop.eup %3979  ;;  %v2572_v57 = vmul.f32 %v3978_v44, %v4750_v21 }
 0x8d6   :  { %v3982_v60 = vpop.eup %3981  ;;  %v2581_v9 = vmul.f32 %v2576_v50, %v2568_v49  ;;  %v2578_v63 = vmul.f32 %v3980_v54, %v4753_v1  ;;  %v3891_v54 = vld [vmem:[%s4996_s10 + $0x20] sm:$0xff]  }
 0x8d7   :  { %v3984_v5 = vpop.eup %3983  ;;  %v2579_v37 = vmul.f32 %v2572_v57, %v2564_v10  ;;  %v2574_v8 = vmul.f32 %v3982_v60, %v4756_v46  ;;  %v2870_v10 = vpop.permute.xlu0 %2869 }
 0x8d8   :  { %v3986_v12 = vpop.eup %3985  ;;  %v2585_v0 = vsel %vm2557_vm0, %v4748_v11, %v2581_v9  ;;  %v2582_v26 = vmul.f32 %v2578_v63, %v2570_v28  ;;  %v2605_v56 = vmul.f32 %v3984_v5, %v2597_v3  ;;  %v2875_v57 = vpop.permute.xlu1 %2874 }
 0x8d9   :  { %v3988_v38 = vpop.eup %3987  ;;  %v2589_v17 = vsub.f32 %v2545_v43, %v2585_v0  ;;  %v2583_v14 = vsel %vm2555_vm1, %v4750_v21, %v2579_v37  ;;  %v2580_v51 = vmul.f32 %v2574_v8, %v2566_v22  ;;  %v2603_v61 = vmul.f32 %v3986_v12, %v2595_v2 }
 0x8da   :  { %v3990_v18 = vpop.eup %3989  ;;  %v2587_v15 = vsub.f32 %v2543_v27, %v2583_v14  ;;  %v2586_v11 = vsel %vm2558_vm7, %v4753_v1, %v2582_v26  ;;  %v2613_v4 = vmul.f32 %v2605_v56, %v2517_v48  ;;  %v2606_v7 = vmul.f32 %v3988_v38, %v2598_v19  ;;  %v3882_v1 = vld [vmem:[%s4997_s8 + $0x28] sm:$0xff]   ;;  %v3893_v38 = vld [vmem:[%s4996_s10 + $0x30] sm:$0xff]  }
 0x8db   :  { %v2590_v23 = vsub.f32 %v2546_v29, %v2586_v11  ;;  %v2584_v13 = vsel %vm2556_vm8, %v4756_v46, %v2580_v51  ;;  %v2611_v24 = vmul.f32 %v2603_v61, %v2509_v52  ;;  %v2604_v6 = vmul.f32 %v3990_v18, %v2596_v62  ;;  %v3883_v46 = vld [vmem:[%s4997_s8 + $0x30] sm:$0xff]   ;;  %v2880_v3 = vpop.permute.xlu0 %2879  ;;  %v3892_v62 = vld [vmem:[%s4996_s10 + $0x28] sm:$0xff]  }
 0x8dc   :  { %v2588_v32 = vsub.f32 %v2544_v47, %v2584_v13  ;;  %v2614_v20 = vmul.f32 %v2606_v7, %v2520_v53  ;;  %v3890_v53 = vld [vmem:[%s4995_s9 + $0x18] sm:$0xff]   ;;  %v2885_v28 = vpop.permute.xlu1 %2884 }
 0x8dd   :  { %v2612_v21 = vmul.f32 %v2604_v6, %v2512_v59 }
 0x8de   :  { %v2615_v34 = vadd.f32 %v2588_v32, %v2587_v15  ;;  %v2643_v30 = vpack.c.bf16 %v2614_v20, %v2613_v4 }
 0x8df   :  { %v2642_v40 = vpack.c.bf16 %v2612_v21, %v2611_v24  ;;  %v2961_v14 = vpop.permute.xlu0 %2960 }
 0x8e0   :  { %v2616_v42 = vadd.f32 %v2615_v34, %v2589_v17  ;;  %v3894_v17 = vld [vmem:[%s4996_s10 + $0x38] sm:$0xff]   ;;  %v2966_v51 = vpop.permute.xlu1 %2965 }
 0x8e1   :  { %3681 = vmatprep.subr.bf16.mxu1 %v2642_v40 }
 0x8e2   :  { %v4823_v35 = vadd.f32 %v2616_v42, %v2590_v23  ;;  %3682 = vmatpush3.bf16.msra.mxu1 %v2642_v40 }
 0x8e3   :  { %3683 = vmatprep.subr.bf16.mxu1 %v2643_v30  ;;  %v2971_v61 = vpop.permute.xlu0 %2970 }
 0x8e4   :  { %v2976_v4 = vpop.permute.xlu1 %2975 }
 0x8e6   :  { %3684 = vmatpush3.bf16.msra.mxu1 %v2643_v30 }
 0x8e7   :  { %3693 = vmatprep.subr.bf16.mxu1 %v4692_v58 }
 0x8e9   :  { %3686 = vmatmul.mubr.msk.bf16.vlgmr.msra.gmra.mrb[56].mxu1 %vm487_vm2, %v3882_v1 }
 0x8ea   :  { %3694 = vmatpush3.bf16.msra.mxu1 %v4692_v58  ;;  %3689 = vmatprep.mubr.msk.bf16.mxu1 %vm487_vm2, %v3883_v46  ;;  %v3886_v58 = vld [vmem:[%s4998_s7 + $0x28] sm:$0xff]  }
 0x8eb   :  { %3695 = vmatprep.subr.bf16.mxu1 %v4690_v55 }
 0x8ee   :  { %3696 = vmatpush3.bf16.msra.mxu1 %v4690_v55  ;;  %v3888_v55 = vld [vmem:[%s4998_s7 + $0x38] sm:$0xff]  }
 0x8f1   :  { %3690 = vmatmul.mubr.msk.bf16.gmra.mrb[60].mxu1 %vm487_vm2, %v3884_v25 }
 0x8f2   :  { %3697 = vmatprep.mubr.msk.bf16.mxu1 %vm487_vm2, %v3885_v31 }
 0x8f9   :  { %3698 = vmatmul.mubr.msk.bf16.vlgmr.msra.gmra.mrb[56].mxu1 %vm487_vm2, %v3886_v58 }
 0x8fa   :  { %3701 = vmatprep.mubr.msk.bf16.mxu1 %vm487_vm2, %v3887_v16 }
 0x901   :  { %3702 = vmatmul.mubr.msk.bf16.gmra.mrb[60].mxu1 %vm487_vm2, %v3888_v55 }
 0x902   :  { %3709 = vmatprep.mubr.msk.bf16.mxu1 %vm487_vm2, %v3889_v39 }
 0x9cc   :  { %v3699_v43 = vpop.f32.mrb[56].mxu1 }
 0x9cd   :  { %v2807_v41 = vpop.f32.mrb[57].mxu1  ;;  %v3199_v48 = vmul.f32 %v3699_v43, %v3699_v43 }
 0x9ce   :  { %v3700_v33 = vpop.f32.mrb[58].mxu1  ;;  %v3197_v45 = vmul.f32 %v2807_v41, %v2807_v41 }
 0x9cf   :  { %v2866_v27 = vpack.c.bf16 %v3700_v33, %v3699_v43  ;;  %v2810_v29 = vpop.f32.mrb[59].mxu1  ;;  %v3200_v49 = vmul.f32 %v3700_v33, %v3700_v33 }
 0x9d0   :  { %v2865_v36 = vpack.c.bf16 %v2810_v29, %v2807_v41  ;;  %v3198_v47 = vmul.f32 %v2810_v29, %v2810_v29 }
 0x9d2   :  { %v3201_v44 = vadd.f32 %v3198_v47, %v3197_v45  ;;  %3705 = vmatprep.subr.bf16.mxu1 %v2865_v36 }
 0x9d3   :  { %3706 = vmatpush3.bf16.msra.mxu1 %v2865_v36 }
 0x9d4   :  { %v3202_v50 = vadd.f32 %v3201_v44, %v3199_v48  ;;  %3707 = vmatprep.subr.bf16.mxu1 %v2866_v27 }
 0x9d6   :  { %v4861_v52 = vadd.f32 %v3202_v50, %v3200_v49 }
 0x9d7   :  { %3708 = vmatpush3.bf16.msra.mxu1 %v2866_v27 }
 0x9da   :  { %3710 = vmatmul.mubr.msk.bf16.vlgmr.msra.gmra.mrb[64].mxu1 %vm487_vm2, %v3890_v53 }
 0x9db   :  { %3717 = vmatprep.mubr.msk.bf16.mxu1 %vm487_vm2, %v3891_v54 }
 0xaad   :  { %v3711_v59 = vpop.f32.mrb[64].mxu1 }
 0xaae   :  { %v2946_v60 = vadd.f32 %v3711_v59, %v2880_v3  ;;  %v2937_v9 = vpop.f32.mrb[65].mxu1 }
 0xaaf   :  { %v2938_v63 = vadd.f32 %v2937_v9, %v2870_v10  ;;  %v3712_v2 = vpop.f32.mrb[66].mxu1 }
 0xab0   :  { %v2949_v5 = vadd.f32 %v3712_v2, %v2885_v28  ;;  %v2940_v37 = vpop.f32.mrb[67].mxu1  ;;  %v2954_v8 = vmax.f32 %v2946_v60, 0.0 }
 0xab1   :  { %v2941_v22 = vadd.f32 %v2940_v37, %v2875_v57  ;;  %v2952_v12 = vmax.f32 %v2938_v63, 0.0  ;;  %v2981_v63 = vpop.permute.xlu0 %2980 }
 0xab2   :  { %v2955_v19 = vmax.f32 %v2949_v5, 0.0 }
 0xab3   :  { %v2953_v0 = vmax.f32 %v2941_v22, 0.0  ;;  %v2986_v22 = vpop.permute.xlu1 %2985 }
 0xab4   :  { %v2957_v26 = vpack.c.bf16 %v2955_v19, %v2954_v8 }
 0xab5   :  { %v2956_v56 = vpack.c.bf16 %v2953_v0, %v2952_v12  ;;  %v2618_v12 = vrot.slane %v4823_v35, 4 }
 0xab7   :  { %3713 = vmatprep.subr.bf16.mxu1 %v2956_v56 }
 0xab8   :  { %3714 = vmatpush3.bf16.msra.mxu1 %v2956_v56  ;;  %v2991_v56 = vpop.permute.xlu0 %2990 }
 0xab9   :  { %3715 = vmatprep.subr.bf16.mxu1 %v2957_v26 }
 0xabc   :  { %3716 = vmatpush3.bf16.msra.mxu1 %v2957_v26 }
 0xabf   :  { %3718 = vmatmul.mubr.msk.bf16.vlgmr.msra.gmra.mrb[68].mxu1 %vm487_vm2, %v3892_v62 }
 0xac0   :  { %3721 = vmatprep.mubr.msk.bf16.mxu1 %vm487_vm2, %v3893_v38 }
 0xac7   :  { %3722 = vmatmul.mubr.msk.bf16.gmra.mrb[60].mxu1 %vm487_vm2, %v3894_v17 }
 0xb92   :  { %v3719_v18 = vpop.f32.mrb[68].mxu1 }
 0xb93   :  { %v3073_v15 = vadd.f32 %v3719_v18, %v2971_v61  ;;  %v3064_v11 = vpop.f32.mrb[69].mxu1 }
 0xb94   :  { %v3065_v7 = vadd.f32 %v3064_v11, %v2961_v14  ;;  %v3720_v23 = vpop.f32.mrb[70].mxu1 }
 0xb95   :  { %v4883_v13 = vadd.f32 2.0, %v3073_v15  ;;  %v3076_v24 = vadd.f32 %v3720_v23, %v2976_v4  ;;  %v3067_v6 = vpop.f32.mrb[71].mxu1 }
 0xb96   :  { %v4885_v32 = vadd.f32 2.0, %v3065_v7  ;;  %v3068_v20 = vadd.f32 %v3067_v6, %v2966_v51  ;;  %v2996_v6 = vpop.permute.xlu1 %2995 }
 0xb97   :  { %v3101_v21 = vand.u32 2147483647, %v4883_v13  ;;  %v4888_v34 = vadd.f32 2.0, %v3076_v24  ;;  %vm3165_vm3 = vcmp.ge.f32.partialorder %v4883_v13, 0.0 }
 0xb98   :  { %v3099_v30 = vand.u32 2147483647, %v4885_v32  ;;  %v4891_v40 = vadd.f32 2.0, %v3068_v20  ;;  %v3115_v0 = vmin.f32 %v4885_v32, 0.0  ;;  %vm3163_vm4 = vcmp.ge.f32.partialorder %v4885_v32, 0.0 }
 0xb99   :  { %v3105_v42 = vsub.f32 0.0, %v3101_v21  ;;  %v3102_v1 = vand.u32 2147483647, %v4888_v34  ;;  %vm3166_vm5 = vcmp.ge.f32.partialorder %v4888_v34, 0.0 }
 0xb9a   :  { %v3103_v46 = vsub.f32 0.0, %v3099_v30  ;;  %v3100_v25 = vand.u32 2147483647, %v4891_v40  ;;  %v4895_v31 = vpop.f32.mrb[60].mxu1  ;;  %v3116_v38 = vmin.f32 %v4891_v40, 0.0  ;;  %vm3164_vm6 = vcmp.ge.f32.partialorder %v4891_v40, 0.0 }
 0xb9b   :  { %v3111_v58 = vmul.f32 1.442695, %v3105_v42  ;;  %v3106_v16 = vsub.f32 0.0, %v3102_v1  ;;  %v4897_v55 = vpop.f32.mrb[61].mxu1  ;;  %v3089_v18 = vadd.f32 %v4895_v31, %v2991_v56 }
 0xb9c   :  { %v3107_v39 = vmul.f32 1.442695, %v3103_v46  ;;  %v3104_v43 = vsub.f32 0.0, %v3100_v25  ;;  %v4899_v41 = vpop.f32.mrb[62].mxu1  ;;  %v3081_v23 = vadd.f32 %v4897_v55, %v2981_v63 }
 0xb9d   :  { %3991 = vpow2.f32 %v3111_v58  ;;  %v3113_v33 = vmul.f32 1.442695, %v3106_v16  ;;  %v4901_v27 = vpop.f32.mrb[63].mxu1  ;;  %v3092_v31 = vadd.f32 %v4899_v41, %v2996_v6 }
 0xb9e   :  { %3993 = vpow2.f32 %v3107_v39  ;;  %v3109_v29 = vmul.f32 1.442695, %v3104_v43  ;;  %v3084_v32 = vadd.f32 %v4901_v27, %v2986_v22  ;;  %v3204_v27 = vrot.slane %v4861_v52, 4 }
 0xb9f   :  { %3995 = vpow2.f32 %v3113_v33 }
 0xba0   :  { %3997 = vpow2.f32 %v3109_v29  ;;  %v3205_v22 = vadd.f32 %v3204_v27, %v4861_v52 }
 0xba7   :  { %v4903_v45 = vpop.eup %3991 }
 0xba8   :  { %v4905_v36 = vpop.eup %3993  ;;  %v3121_v47 = vadd.f32 1.0, %v4903_v45  ;;  %v3169_v7 = vsel %vm3165_vm3, 1.0, %v4903_v45 }
 0xba9   :  { %v4908_v48 = vpop.eup %3995  ;;  %v3119_v44 = vadd.f32 1.0, %v4905_v36  ;;  %v3167_v25 = vsel %vm3163_vm4, 1.0, %v4905_v36 }
 0xbaa   :  { %v4911_v49 = vpop.eup %3997  ;;  %v4913_v50 = vadd.f32 -1.0, %v3121_v47  ;;  %3999 = vlog2.f32 %v3121_v47  ;;  %v3122_v53 = vadd.f32 1.0, %v4908_v48  ;;  %v3170_v58 = vsel %vm3166_vm5, 1.0, %v4908_v48 }
 0xbab   :  { %v4916_v54 = vadd.f32 -1.0, %v3119_v44  ;;  %4001 = vlog2.f32 %v3119_v44  ;;  %v3120_v10 = vadd.f32 1.0, %v4911_v49  ;;  %v3168_v41 = vsel %vm3164_vm6, 1.0, %v4911_v49 }
 0xbac   :  { %vm3129_vm2 = vcmp.eq.f32.partialorder %v4913_v50, 0.0  ;;  %v4920_v57 = vadd.f32 -1.0, %v3122_v53  ;;  %4003 = vlog2.f32 %v3122_v53 }
 0xbad   :  { %v3133_v3 = vsel %vm3129_vm2, 1.0, %v4913_v50  ;;  %vm3127_vm13 = vcmp.eq.f32.partialorder %v4916_v54, 0.0  ;;  %v4926_v59 = vadd.f32 -1.0, %v3120_v10  ;;  %4005 = vlog2.f32 %v3120_v10 }
 0xbae   :  { %4007 = vrcp.f32 %v3133_v3  ;;  %v3131_v60 = vsel %vm3127_vm13, 1.0, %v4916_v54  ;;  %vm3130_vm14 = vcmp.eq.f32.partialorder %v4920_v57, 0.0  ;;  %v3117_v3 = vmin.f32 %v4883_v13, 0.0 }
 0xbaf   :  { %4009 = vrcp.f32 %v3131_v60  ;;  %v3134_v9 = vsel %vm3130_vm14, 1.0, %v4920_v57  ;;  %vm3128_vm15 = vcmp.eq.f32.partialorder %v4926_v59, 0.0 }
 0xbb0   :  { %4011 = vrcp.f32 %v3134_v9  ;;  %v3132_v28 = vsel %vm3128_vm15, 1.0, %v4926_v59  ;;  %v3118_v59 = vmin.f32 %v4888_v34, 0.0 }
 0xbb1   :  { %4013 = vrcp.f32 %v3132_v28 }
 0xbb2   :  { %4015 = vrcp.f32 %v3121_v47 }
 0xbb3   :  { %4017 = vrcp.f32 %v3119_v44 }
 0xbb4   :  { %v4000_v2 = vpop.eup %3999  ;;  %4019 = vrcp.f32 %v3122_v53 }
 0xbb5   :  { %v4002_v5 = vpop.eup %4001  ;;  %4021 = vrcp.f32 %v3120_v10  ;;  %v3140_v14 = vmul.f32 0.6931472, %v4000_v2 }
 0xbb6   :  { %v4004_v37 = vpop.eup %4003  ;;  %v3136_v51 = vmul.f32 0.6931472, %v4002_v5 }
 0xbb7   :  { %v4006_v8 = vpop.eup %4005  ;;  %v3142_v11 = vmul.f32 0.6931472, %v4004_v37 }
 0xbb8   :  { %v4008_v19 = vpop.eup %4007  ;;  %v3138_v30 = vmul.f32 0.6931472, %v4006_v8 }
 0xbb9   :  { %v4010_v26 = vpop.eup %4009  ;;  %v3148_v62 = vmul.f32 %v4008_v19, %v4903_v45 }
 0xbba   :  { %v4012_v17 = vpop.eup %4011  ;;  %v3144_v61 = vmul.f32 %v4010_v26, %v4905_v36 }
 0xbbb   :  { %v4014_v15 = vpop.eup %4013  ;;  %v3150_v4 = vmul.f32 %v4012_v17, %v4908_v48  ;;  %v3153_v20 = vmul.f32 %v3148_v62, %v3140_v14  ;;  %v3206_v62 = vrot.slane %v3205_v22, 2 }
 0xbbc   :  { %v4016_v24 = vpop.eup %4015  ;;  %v3151_v21 = vmul.f32 %v3144_v61, %v3136_v51  ;;  %v3146_v42 = vmul.f32 %v4014_v15, %v4911_v49 }
 0xbbd   :  { %v4018_v1 = vpop.eup %4017  ;;  %v3177_v46 = vmul.f32 %v4016_v24, %v3169_v7  ;;  %v3154_v39 = vmul.f32 %v3150_v4, %v3142_v11  ;;  %v3157_v53 = vsel %vm3129_vm2, %v4903_v45, %v3153_v20  ;;  %v2619_v45 = vadd.f32 %v2618_v12, %v4823_v35 }
 0xbbe   :  { %v4020_v16 = vpop.eup %4019  ;;  %v3155_v55 = vsel %vm3127_vm13, %v4905_v36, %v3151_v21  ;;  %v3152_v43 = vmul.f32 %v3146_v42, %v3138_v30  ;;  %v3175_v33 = vmul.f32 %v4018_v1, %v3167_v25  ;;  %v3161_v50 = vsub.f32 %v3117_v3, %v3157_v53 }
 0xbbf   :  { %v4022_v29 = vpop.eup %4021  ;;  %v3185_v47 = vmul.f32 %v3177_v46, %v3089_v18  ;;  %v3178_v44 = vmul.f32 %v4020_v16, %v3170_v58  ;;  %v3159_v60 = vsub.f32 %v3115_v0, %v3155_v55  ;;  %v3158_v40 = vsel %vm3130_vm14, %v4908_v48, %v3154_v39 }
 0xbc0   :  { %v3156_v36 = vsel %vm3128_vm15, %v4911_v49, %v3152_v43  ;;  %v3183_v54 = vmul.f32 %v3175_v33, %v3081_v23  ;;  %v3176_v10 = vmul.f32 %v4022_v29, %v3168_v41  ;;  %v3162_v37 = vsub.f32 %v3118_v59, %v3158_v40 }
 0xbc1   :  { %v3160_v9 = vsub.f32 %v3116_v38, %v3156_v36  ;;  %v3186_v28 = vmul.f32 %v3178_v44, %v3092_v31  ;;  %v3212_v8 = vmul.f32 %v3185_v47, %v3185_v47  ;;  %v2620_v0 = vrot.slane %v2619_v45, 2 }
 0xbc2   :  { %v3184_v63 = vmul.f32 %v3176_v10, %v3084_v32  ;;  %v3210_v2 = vmul.f32 %v3183_v54, %v3183_v54  ;;  %v3207_v14 = vadd.f32 %v3206_v62, %v3205_v22 }
 0xbc3   :  { %v3187_v49 = vadd.f32 %v3160_v9, %v3159_v60  ;;  %v3213_v56 = vmul.f32 %v3186_v28, %v3186_v28  ;;  %v2621_v35 = vadd.f32 %v2620_v0, %v2619_v45 }
 0xbc4   :  { %v3211_v5 = vmul.f32 %v3184_v63, %v3184_v63  ;;  %v3208_v52 = vrot.slane %v3207_v14, 1 }
 0xbc5   :  { %v3188_v13 = vadd.f32 %v3187_v49, %v3161_v50  ;;  %v2622_v61 = vrot.slane %v2621_v35, 1 }
 0xbc6   :  { %v3214_v19 = vadd.f32 %v3211_v5, %v3210_v2  ;;  %v3209_v20 = vadd.f32 %v3208_v52, %v3207_v14 }
 0xbc7   :  { %v3189_v26 = vadd.f32 %v3188_v13, %v3162_v37  ;;  %v2623_v7 = vadd.f32 %v2622_v61, %v2621_v35 }
 0xbc8   :  { %v3215_v57 = vadd.f32 %v3214_v19, %v3212_v8 }
 0xbc9   :  { %v3190_v48 = vrot.slane %v3189_v26, 4 }
 0xbca   :  { %v3216_v38 = vadd.f32 %v3215_v57, %v3213_v56 }
 0xbcb   :  { %v3191_v12 = vadd.f32 %v3190_v48, %v3189_v26 }
 0xbcc   :  { %v3217_v17 = vrot.slane %v3216_v38, 4 }
 0xbcd   :  { %v3192_v34 = vrot.slane %v3191_v12, 2 }
 0xbce   :  { %v3218_v51 = vadd.f32 %v3217_v17, %v3216_v38 }
 0xbcf   :  { %v3193_v18 = vadd.f32 %v3192_v34, %v3191_v12 }
 0xbd0   :  { %v3219_v15 = vrot.slane %v3218_v51, 2 }
 0xbd1   :  { %v3194_v11 = vrot.slane %v3193_v18, 1 }
 0xbd2   :  { %v3220_v4 = vadd.f32 %v3219_v15, %v3218_v51 }
 0xbd3   :  { %v3195_v23 = vadd.f32 %v3194_v11, %v3193_v18 }
 0xbd4   :  { %v3221_v24 = vrot.slane %v3220_v4, 1 }
 0xbd5   :  { %v3196_v6 = vadd.f32 %v3195_v23, %v2623_v7 }
 0xbd6   :  { %v3222_v21 = vadd.f32 %v3221_v24, %v3220_v4 }
 0xbd8   :  { %v3223_v30 = vadd.f32 %v3222_v21, %v3209_v20 }
 0xbda   :  { %v3224_v42 = vmul.f32 0.5, %v3223_v30 }
 0xbdc   :  { %v3225_v1 = vsub.f32 %v3196_v6, %v3224_v42 }
 0xbde   :  { %3226 = vst [vmem:[%s4999_s13] sm:$0x1] %v3225_v1 }

</bundles_post_ra>
